<compile_context>
chip_gen: v7x
topology: tpu7x:2x2x1
jax: 0.10.0
libtpu: 0.0.40
codegen_flags: <defaults>
</compile_context>

<pallas_src>
import jax
import jax.numpy as jnp
from jax.experimental import pallas as pl
from jax.experimental.pallas import tpu as pltpu

LN_EPS = 1e-5
F32 = jnp.float32
BF16 = jnp.bfloat16


# ---------------------------------------------------------------------------
# Math helpers shared by the kernels and the pure-JAX reference (identical
# bf16/f32 cast discipline in both paths).
# ---------------------------------------------------------------------------
def _ln(x, g, b):
    """LayerNorm over the last dim in f32 (biased variance, rsqrt, eps=1e-5)."""
    mean = jnp.mean(x, axis=-1, keepdims=True)
    cen = x - mean
    var = jnp.mean(cen * cen, axis=-1, keepdims=True)
    return cen * jax.lax.rsqrt(var + LN_EPS) * g + b


def _dot(a, b):
    """bf16 MXU matmul with f32 accumulation (astype is a no-op on bf16 inputs)."""
    return jnp.dot(a.astype(BF16), b.astype(BF16), preferred_element_type=F32)


def _bond_ffn(x, w_in, w1, b1, g, be, w2, b2):
    """BondFFN (gate_dim=0) with the bond/node input matmuls fused into a single
    K=(E+Nd) matmul: x = [h_bond | h_node], w_in = vstack([Wb, Wn])."""
    inter = _dot(x, w_in)                      # bond_linear + node_linear fused
    h = _dot(inter, w1) + b1                   # inter MLP Linear 1
    h = jnp.maximum(_ln(h, g, be), 0.0)        # inter MLP LayerNorm -> ReLU
    return _dot(h, w2) + b2                    # inter MLP Linear 2


# ---------------------------------------------------------------------------
# Kernel 1: fused left + right BondFFN per-bond messages (bond-tiled, parallel).
# ---------------------------------------------------------------------------
def bond_msg_kernel(hb_ref, hnl_ref, hnr_ref,
                    lwin, lw1, lb1, lg, lbe, lw2, lb2,
                    rwin, rw1, rb1, rg, rbe, rw2, rb2,
                    msgl_ref, msgr_ref):
    hb = hb_ref[...]
    xl = jnp.concatenate([hb, hnl_ref[...]], axis=-1)   # (tile_b, E+Nd) bf16
    xr = jnp.concatenate([hb, hnr_ref[...]], axis=-1)
    msgl_ref[...] = _bond_ffn(xl, lwin[...], lw1[...], lb1[...], lg[...],
                              lbe[...], lw2[...], lb2[...]).astype(msgl_ref.dtype)
    msgr_ref[...] = _bond_ffn(xr, rwin[...], rw1[...], rb1[...], rg[...],
                              rbe[...], rw2[...], rb2[...]).astype(msgr_ref.dtype)


def bond_messages(hb_bf, hnl, hnr, q, *, tile_b):
    b, E = hb_bf.shape
    Nd = hnl.shape[1]
    I = q["l_w1"].shape[0]
    row = lambda i: (i, 0)
    full = lambda i: (0, 0)

    def ffn_specs():
        return [
            pl.BlockSpec((E + Nd, I), full),   # stacked [Wb; Wn]           (bf16)
            pl.BlockSpec((I, I), full),        # inter-MLP W1               (bf16)
            pl.BlockSpec((1, I), full),        # inter-MLP b1               (f32)
            pl.BlockSpec((1, I), full),        # inter-MLP LN gamma         (f32)
            pl.BlockSpec((1, I), full),        # inter-MLP LN beta          (f32)
            pl.BlockSpec((I, E), full),        # inter-MLP W2               (bf16)
            pl.BlockSpec((1, E), full),        # inter-MLP b2               (f32)
        ]

    return pl.pallas_call(
        bond_msg_kernel,
        out_shape=(jax.ShapeDtypeStruct((b, E), BF16),
                   jax.ShapeDtypeStruct((b, E), BF16)),
        grid_spec=pltpu.PrefetchScalarGridSpec(
            num_scalar_prefetch=0,
            grid=(b // tile_b,),
            in_specs=[pl.BlockSpec((tile_b, E), row),     # h_bond tile (bf16)
                      pl.BlockSpec((tile_b, Nd), row),    # h_node[left] tile (bf16)
                      pl.BlockSpec((tile_b, Nd), row)]    # h_node[right] tile (bf16)
                     + ffn_specs() + ffn_specs(),
            out_specs=(pl.BlockSpec((tile_b, E), row),
                       pl.BlockSpec((tile_b, E), row)),
        ),
        compiler_params=pltpu.CompilerParams(
            dimension_semantics=("parallel",),
            vmem_limit_bytes=32 * 1024 * 1024),
    )(hb_bf, hnl, hnr,
      q["l_win"], q["l_w1"], q["l_b1"], q["l_g"], q["l_be"], q["l_w2"], q["l_b2"],
      q["r_win"], q["r_w1"], q["r_b1"], q["r_g"], q["r_be"], q["r_w2"], q["r_b2"])


# ---------------------------------------------------------------------------
# Kernel 2: scatter_sum into per-node accumulators (bond-tiled reduction).
# One-hot masks built in-kernel from int32 index tiles; bf16 MXU, f32 accumulate.
# ---------------------------------------------------------------------------
def scatter_kernel(left_ref, right_ref, msgl_ref, msgr_ref, sl_ref, sr_ref):
    @pl.when(pl.program_id(0) == 0)
    def _():
        sl_ref[...] = jnp.zeros_like(sl_ref)
        sr_ref[...] = jnp.zeros_like(sr_ref)

    n = sl_ref.shape[0]
    tb = msgl_ref.shape[0]
    node_ids = jax.lax.broadcasted_iota(jnp.int32, (n, tb), 0)
    # msgl scatters by `right`, msgr scatters by `left`; padded bonds carry an
    # out-of-range index -> all-zero mask column -> no contribution.
    oh_r_t = jnp.where(node_ids == right_ref[...], 1.0, 0.0).astype(BF16)  # (N, tb)
    oh_l_t = jnp.where(node_ids == left_ref[...], 1.0, 0.0).astype(BF16)
    sl_ref[...] += jnp.dot(oh_r_t, msgl_ref[...], preferred_element_type=F32)
    sr_ref[...] += jnp.dot(oh_l_t, msgr_ref[...], preferred_element_type=F32)


def scatter_node_sums(msgl, msgr, left, right, n_nodes, *, tile_b):
    b, E = msgl.shape
    row = lambda i: (i, 0)
    col = lambda i: (0, i)
    acc = lambda i: (0, 0)
    return pl.pallas_call(
        scatter_kernel,
        out_shape=(jax.ShapeDtypeStruct((n_nodes, E), F32),
                   jax.ShapeDtypeStruct((n_nodes, E), F32)),
        grid_spec=pltpu.PrefetchScalarGridSpec(
            num_scalar_prefetch=0,
            grid=(b // tile_b,),
            in_specs=[pl.BlockSpec((1, tile_b), col),     # left  indices (int32)
                      pl.BlockSpec((1, tile_b), col),     # right indices (int32)
                      pl.BlockSpec((tile_b, E), row),     # msgl tile (bf16)
                      pl.BlockSpec((tile_b, E), row)],    # msgr tile (bf16)
            out_specs=(pl.BlockSpec((n_nodes, E), acc),   # resident accumulators
                       pl.BlockSpec((n_nodes, E), acc)),
        ),
        compiler_params=pltpu.CompilerParams(
            dimension_semantics=("arbitrary",),
            vmem_limit_bytes=32 * 1024 * 1024),
    )(left.reshape(1, b), right.reshape(1, b), msgl, msgr)


# ---------------------------------------------------------------------------
# Kernel 3: fused gather (node sums + h_node) + single K=640 combine matmul
# + out_layer MLP + residual LayerNorm (bond-tiled, parallel).
# ---------------------------------------------------------------------------
def combine_kernel(left_ref, right_ref, hb_ref, shl_ref, shr_ref,
                   wc_ref, bc_ref, ow1_ref, ob1_ref, og_ref, obe_ref,
                   ow2_ref, ob2_ref, lng_ref, lnb_ref, out_ref):
    tb = hb_ref.shape[0]
    n = shl_ref.shape[0]
    node_ids = jax.lax.broadcasted_iota(jnp.int32, (tb, n), 1)
    oh_l = jnp.where(node_ids == left_ref[...], 1.0, 0.0).astype(BF16)   # (tb, N)
    oh_r = jnp.where(node_ids == right_ref[...], 1.0, 0.0).astype(BF16)
    # gather both the scattered message and h_node in ONE matmul per side:
    gl = jnp.dot(oh_l, shl_ref[...], preferred_element_type=F32)   # [ml  | hn_left ]
    gr = jnp.dot(oh_r, shr_ref[...], preferred_element_type=F32)   # [mr  | hn_right]
    hb = hb_ref[...]                                               # f32 (residual)
    combined = jnp.concatenate(
        [gl.astype(BF16), gr.astype(BF16), hb.astype(BF16)], axis=-1)   # (tb, 640)
    upd = _dot(combined, wc_ref[...]) + bc_ref[...]                # 5-way combine
    h = jnp.maximum(_ln(_dot(upd, ow1_ref[...]) + ob1_ref[...],
                        og_ref[...], obe_ref[...]), 0.0)           # out_layer Lin->LN->ReLU
    y = _dot(h, ow2_ref[...]) + ob2_ref[...]                       # out_layer Lin
    out_ref[...] = _ln(y + hb, lng_ref[...], lnb_ref[...]).astype(out_ref.dtype)


def gather_combine(left, right, h_bond, shl, shr, q, *, tile_b):
    b, E = h_bond.shape
    n, en = shl.shape
    k = 2 * en + E
    row = lambda i: (i, 0)
    full = lambda i: (0, 0)
    return pl.pallas_call(
        combine_kernel,
        out_shape=jax.ShapeDtypeStruct((b, E), F32),
        grid_spec=pltpu.PrefetchScalarGridSpec(
            num_scalar_prefetch=0,
            grid=(b // tile_b,),
            in_specs=[pl.BlockSpec((tile_b, 1), row),   # left indices (int32)
                      pl.BlockSpec((tile_b, 1), row),   # right indices (int32)
                      pl.BlockSpec((tile_b, E), row),   # h_bond tile (f32)
                      pl.BlockSpec((n, en), full),      # [S_l | h_node] (bf16)
                      pl.BlockSpec((n, en), full),      # [S_r | h_node] (bf16)
                      pl.BlockSpec((k, E), full),       # stacked combine weight (bf16)
                      pl.BlockSpec((1, E), full),       # pre-summed combine bias (f32)
                      pl.BlockSpec((E, E), full),       # out_layer W1 (bf16)
                      pl.BlockSpec((1, E), full),       # out_layer b1
                      pl.BlockSpec((1, E), full),       # out_layer LN gamma
                      pl.BlockSpec((1, E), full),       # out_layer LN beta
                      pl.BlockSpec((E, E), full),       # out_layer W2 (bf16)
                      pl.BlockSpec((1, E), full),       # out_layer b2
                      pl.BlockSpec((1, E), full),       # final LN gamma
                      pl.BlockSpec((1, E), full)],      # final LN beta
            out_specs=pl.BlockSpec((tile_b, E), row),
        ),
        compiler_params=pltpu.CompilerParams(
            dimension_semantics=("parallel",),
            vmem_limit_bytes=32 * 1024 * 1024),
    )(left.reshape(b, 1), right.reshape(b, 1), h_bond, shl, shr,
      q["w_comb"], q["b_comb"],
      q["o_w1"], q["o_b1"], q["o_g"], q["o_be"], q["o_w2"], q["o_b2"],
      q["ln_g"], q["ln_b"])


# ---------------------------------------------------------------------------
# Parameter pre-processing (done once): bf16 pre-cast + weight stacking.
# ---------------------------------------------------------------------------
def prepare_params(p):
    q = {}
    for s in ("l", "r"):
        q[f"{s}_win"] = jnp.concatenate([p[f"{s}_wb"], p[f"{s}_wn"]], 0).astype(BF16)
        q[f"{s}_w1"] = p[f"{s}_w1"].astype(BF16)
        q[f"{s}_b1"] = p[f"{s}_b1"]
        q[f"{s}_g"] = p[f"{s}_g"]
        q[f"{s}_be"] = p[f"{s}_be"]
        q[f"{s}_w2"] = p[f"{s}_w2"].astype(BF16)
        q[f"{s}_b2"] = p[f"{s}_b2"]
    # Combine order must match kernel 3's concat: [ml | hn_left | mr | hn_right | h_bond]
    q["w_comb"] = jnp.concatenate(
        [p["w_msg_l"], p["w_node_l"], p["w_msg_r"], p["w_node_r"], p["w_self"]],
        axis=0).astype(BF16)
    q["b_comb"] = (p["b_msg_l"] + p["b_node_l"] + p["b_msg_r"] + p["b_node_r"]
                   + p["b_self"])
    q["o_w1"] = p["o_w1"].astype(BF16)
    q["o_b1"] = p["o_b1"]
    q["o_g"], q["o_be"] = p["o_g"], p["o_be"]
    q["o_w2"] = p["o_w2"].astype(BF16)
    q["o_b2"] = p["o_b2"]
    q["ln_g"], q["ln_b"] = p["ln_g"], p["ln_b"]
    return q


# ---------------------------------------------------------------------------
# Full EdgeBlock forward.
# ---------------------------------------------------------------------------
def edge_block_forward(h_bond, bond_index, h_node, bond_extra, q, *, tile_b=128):
    """Pallas EdgeBlock forward (gate_dim=0, layernorm_before=False)."""
    del bond_extra  # unused when gate_dim == 0
    # TODO(synk): gate branch (gate_dim > 0, sigmoid-gated MLP) not implemented.
    B, E = h_bond.shape
    N, _ = h_node.shape
    left = bond_index[0].astype(jnp.int32)
    right = bond_index[1].astype(jnp.int32)

    # Pad the bond axis to a multiple of tile_b. Padded bonds use node index N
    # (out of range) -> all-zero one-hot rows inside the kernels: they neither
    # pollute the node sums nor the (sliced-off) output rows.
    b_pad = -(-B // tile_b) * tile_b
    pad = b_pad - B
    if pad:
        h_bond = jnp.pad(h_bond, ((0, pad), (0, 0)))
        left = jnp.pad(left, (0, pad), constant_values=N)
        right = jnp.pad(right, (0, pad), constant_values=N)

    hb_bf = h_bond.astype(BF16)
    hn_bf = h_node.astype(BF16)
    # Clipped gathers keep padded-bond messages finite (their scatter mask is 0).
    hnl = jnp.take(hn_bf, jnp.minimum(left, N - 1), axis=0)
    hnr = jnp.take(hn_bf, jnp.minimum(right, N - 1), axis=0)

    # Phase 1: per-bond BondFFN messages (parallel over bond tiles, bf16 out).
    msgl, msgr = bond_messages(hb_bf, hnl, hnr, q, tile_b=tile_b)

    # Phase 2: scatter_sum into (N, E) node accumulators (bond-tiled reduction).
    s_l, s_r = scatter_node_sums(msgl, msgr, left, right, N, tile_b=tile_b)

    # Phase 3: fused gather + one-matmul combine + out_layer MLP + residual LN.
    shl = jnp.concatenate([s_l.astype(BF16), hn_bf], axis=-1)   # (N, E+Nd)
    shr = jnp.concatenate([s_r.astype(BF16), hn_bf], axis=-1)
    out = gather_combine(left, right, h_bond, shl, shr, q, tile_b=tile_b)
    return out[:B]


# ---------------------------------------------------------------------------
# Pure-JAX reference (true scatter_sum via segment_sum, same bf16/f32 numerics).
# ---------------------------------------------------------------------------
def reference_forward(h_bond, bond_index, h_node, q):
    left, right = bond_index[0], bond_index[1]
    N = h_node.shape[0]
    hb_bf = h_bond.astype(BF16)
    hn_bf = h_node.astype(BF16)
    hnl, hnr = hn_bf[left], hn_bf[right]
    msgl = _bond_ffn(jnp.concatenate([hb_bf, hnl], -1), q["l_win"], q["l_w1"],
                     q["l_b1"], q["l_g"], q["l_be"], q["l_w2"], q["l_b2"]).astype(BF16)
    msgr = _bond_ffn(jnp.concatenate([hb_bf, hnr], -1), q["r_win"], q["r_w1"],
                     q["r_b1"], q["r_g"], q["r_be"], q["r_w2"], q["r_b2"]).astype(BF16)
    ml = jax.ops.segment_sum(msgl.astype(F32), right, num_segments=N).astype(BF16)[left]
    mr = jax.ops.segment_sum(msgr.astype(F32), left, num_segments=N).astype(BF16)[right]
    combined = jnp.concatenate([ml, hnl, mr, hnr, hb_bf], axis=-1)
    upd = _dot(combined, q["w_comb"]) + q["b_comb"]
    h = jnp.maximum(_ln(_dot(upd, q["o_w1"]) + q["o_b1"], q["o_g"], q["o_be"]), 0.0)
    y = _dot(h, q["o_w2"]) + q["o_b2"]
    return _ln(y + h_bond, q["ln_g"], q["ln_b"])


if __name__ == "__main__":
    # Small but lane-dense demo shapes:
    #   edge_dim E = 128, node_dim = 128, inter_dim I = 2*E = 256, nodes N = 128,
    #   bonds B = 200 (padded to 256 -> 2 parallel tiles of 128), gate_dim = 0.
    E, ND, N, B = 128, 128, 128, 200
    I = 2 * E

    key = jax.random.PRNGKey(0)
    keys = iter(jax.random.split(key, 64))

    def uniform(k, shape, fan_in):
        lim = 1.0 / float(fan_in) ** 0.5
        return jax.random.uniform(k, shape, F32, -lim, lim)

    def linear(fan_in, fan_out):
        return (uniform(next(keys), (fan_in, fan_out), fan_in),
                uniform(next(keys), (1, fan_out), fan_in))

    def ln_params(dim):
        return (1.0 + 0.05 * jax.random.normal(next(keys), (1, dim), F32),
                0.05 * jax.random.normal(next(keys), (1, dim), F32))

    p = {}
    for side in ("l", "r"):                       # bond_ffn_left / bond_ffn_right
        p[f"{side}_wb"] = uniform(next(keys), (E, I), E)     # bond_linear (no bias)
        p[f"{side}_wn"] = uniform(next(keys), (ND, I), ND)   # node_linear (no bias)
        p[f"{side}_w1"], p[f"{side}_b1"] = linear(I, I)      # inter MLP Linear 1
        p[f"{side}_g"], p[f"{side}_be"] = ln_params(I)       # inter MLP LayerNorm
        p[f"{side}_w2"], p[f"{side}_b2"] = linear(I, E)      # inter MLP Linear 2
    p["w_msg_l"], p["b_msg_l"] = linear(E, E)
    p["w_msg_r"], p["b_msg_r"] = linear(E, E)
    p["w_node_l"], p["b_node_l"] = linear(ND, E)
    p["w_node_r"], p["b_node_r"] = linear(ND, E)
    p["w_self"], p["b_self"] = linear(E, E)
    p["o_w1"], p["o_b1"] = linear(E, E)                      # out_layer MLP Linear 1
    p["o_g"], p["o_be"] = ln_params(E)                       # out_layer MLP LayerNorm
    p["o_w2"], p["o_b2"] = linear(E, E)                      # out_layer MLP Linear 2
    p["ln_g"], p["ln_b"] = ln_params(E)                      # final LayerNorm

    h_bond = jax.random.normal(next(keys), (B, E), F32)
    h_node = jax.random.normal(next(keys), (N, ND), F32)
    bond_index = jax.random.randint(next(keys), (2, B), 0, N, dtype=jnp.int32)
    bond_extra = jnp.zeros((B, 0), F32)   # gate_dim = 0 -> unused

    q = prepare_params(p)                 # bf16 pre-cast + weight stacking, done once

    out = jax.jit(edge_block_forward)(h_bond, bond_index, h_node, bond_extra, q)
    out = jax.block_until_ready(out)

    ref = reference_forward(h_bond, bond_index, h_node, q)
    assert out.shape == (B, E)
    max_err = float(jnp.max(jnp.abs(out - ref)))
    assert jnp.allclose(out, ref, atol=5e-3, rtol=5e-3), f"max abs err {max_err}"

    print("KERNEL_OK")
</pallas_src>

<mosaic_0001>
module attributes {stable_mosaic.version = 11 : i64} {
  func.func @scatter_kernel(%arg0: i32, %arg1: memref<1x128xi32, #tpu.memory_space<vmem>>, %arg2: memref<1x128xi32, #tpu.memory_space<vmem>>, %arg3: memref<128x128xbf16, #tpu.memory_space<vmem>>, %arg4: memref<128x128xbf16, #tpu.memory_space<vmem>>, %arg5: memref<128x128xf32, #tpu.memory_space<vmem>>, %arg6: memref<128x128xf32, #tpu.memory_space<vmem>>) attributes {dimension_semantics = [#tpu.dimension_semantics<arbitrary>], iteration_bounds = array<i64: 2>, scalar_prefetch = 0 : i64, scratch_operands = 0 : i64, tpu.core_type = #tpu.core_type<tc>, window_params = [{transform_indices = @transform_0, window_bounds = array<i64: 1, 128>}, {transform_indices = @transform_1, window_bounds = array<i64: 1, 128>}, {transform_indices = @transform_2, window_bounds = array<i64: 128, 128>}, {transform_indices = @transform_3, window_bounds = array<i64: 128, 128>}, {pipeline_mode = #tpu.pipeline_mode<synchronous>, transform_indices = @transform_4, window_bounds = array<i64: 128, 128>}, {pipeline_mode = #tpu.pipeline_mode<synchronous>, transform_indices = @transform_5, window_bounds = array<i64: 128, 128>}]} {
    %c0_i32 = arith.constant 0 : i32
    %0 = arith.cmpi eq, %arg0, %c0_i32 : i32
    %1 = arith.extui %0 : i1 to i32
    %c0_i32_0 = arith.constant 0 : i32
    %2 = arith.cmpi ne, %1, %c0_i32_0 : i32
    scf.if %2 {
      %cst_21 = arith.constant 0.000000e+00 : f32
      %28 = vector.broadcast %cst_21 : f32 to vector<128x128xf32>
      %c0_22 = arith.constant 0 : index
      %c0_23 = arith.constant 0 : index
      %29 = vector.load %arg5[%c0_22, %c0_23] : memref<128x128xf32, #tpu.memory_space<vmem>>, vector<128x128xf32>
      tpu.vector_store %arg5[%c0_22, %c0_23], %28 {strides = array<i32>} : memref<128x128xf32, #tpu.memory_space<vmem>>, vector<128x128xf32>,
      %cst_24 = arith.constant 0.000000e+00 : f32
      %30 = vector.broadcast %cst_24 : f32 to vector<128x128xf32>
      %c0_25 = arith.constant 0 : index
      %c0_26 = arith.constant 0 : index
      %31 = vector.load %arg6[%c0_25, %c0_26] : memref<128x128xf32, #tpu.memory_space<vmem>>, vector<128x128xf32>
      tpu.vector_store %arg6[%c0_25, %c0_26], %30 {strides = array<i32>} : memref<128x128xf32, #tpu.memory_space<vmem>>, vector<128x128xf32>,
    } else {
    }
    %3 = tpu.iota {dimensions = array<i32: 0>} : vector<128x128xi32>
    %c0 = arith.constant 0 : index
    %c0_1 = arith.constant 0 : index
    %4 = vector.load %arg2[%c0, %c0_1] : memref<1x128xi32, #tpu.memory_space<vmem>>, vector<1x128xi32>
    %5 = vector.broadcast %4 : vector<1x128xi32> to vector<128x128xi32>
    %6 = arith.cmpi eq, %3, %5 : vector<128x128xi32>
    %cst = arith.constant 1.000000e+00 : f32
    %cst_2 = arith.constant 0.000000e+00 : f32
    %7 = vector.broadcast %cst : f32 to vector<128x128xf32>
    %8 = vector.broadcast %cst_2 : f32 to vector<128x128xf32>
    %9 = arith.select %6, %7, %8 : vector<128x128xi1>, vector<128x128xf32>
    %10 = arith.truncf %9 : vector<128x128xf32> to vector<128x128xbf16>
    %c0_3 = arith.constant 0 : index
    %c0_4 = arith.constant 0 : index
    %11 = vector.load %arg1[%c0_3, %c0_4] : memref<1x128xi32, #tpu.memory_space<vmem>>, vector<1x128xi32>
    %12 = vector.broadcast %11 : vector<1x128xi32> to vector<128x128xi32>
    %13 = arith.cmpi eq, %3, %12 : vector<128x128xi32>
    %cst_5 = arith.constant 1.000000e+00 : f32
    %cst_6 = arith.constant 0.000000e+00 : f32
    %14 = vector.broadcast %cst_5 : f32 to vector<128x128xf32>
    %15 = vector.broadcast %cst_6 : f32 to vector<128x128xf32>
    %16 = arith.select %13, %14, %15 : vector<128x128xi1>, vector<128x128xf32>
    %17 = arith.truncf %16 : vector<128x128xf32> to vector<128x128xbf16>
    %c0_7 = arith.constant 0 : index
    %c0_8 = arith.constant 0 : index
    %18 = vector.load %arg5[%c0_7, %c0_8] : memref<128x128xf32, #tpu.memory_space<vmem>>, vector<128x128xf32>
    %c0_9 = arith.constant 0 : index
    %c0_10 = arith.constant 0 : index
    %19 = vector.load %arg3[%c0_9, %c0_10] : memref<128x128xbf16, #tpu.memory_space<vmem>>, vector<128x128xbf16>
    %cst_11 = arith.constant dense<0.000000e+00> : vector<128x128xf32>
    %20 = tpu.matmul %10, %19, %cst_11 {dimension_numbers = #tpu.dot_dimension_numbers<[1], [0], [0], [1], [0, 0, 1, 1], [], []>} : vector<128x128xbf16>, vector<128x128xbf16>, vector<128x128xf32> -> vector<128x128xf32>
    %21 = arith.addf %18, %20 : vector<128x128xf32>
    %c0_12 = arith.constant 0 : index
    %c0_13 = arith.constant 0 : index
    %22 = vector.load %arg5[%c0_12, %c0_13] : memref<128x128xf32, #tpu.memory_space<vmem>>, vector<128x128xf32>
    tpu.vector_store %arg5[%c0_12, %c0_13], %21 {strides = array<i32>} : memref<128x128xf32, #tpu.memory_space<vmem>>, vector<128x128xf32>,
    %c0_14 = arith.constant 0 : index
    %c0_15 = arith.constant 0 : index
    %23 = vector.load %arg6[%c0_14, %c0_15] : memref<128x128xf32, #tpu.memory_space<vmem>>, vector<128x128xf32>
    %c0_16 = arith.constant 0 : index
    %c0_17 = arith.constant 0 : index
    %24 = vector.load %arg4[%c0_16, %c0_17] : memref<128x128xbf16, #tpu.memory_space<vmem>>, vector<128x128xbf16>
    %cst_18 = arith.constant dense<0.000000e+00> : vector<128x128xf32>
    %25 = tpu.matmul %17, %24, %cst_18 {dimension_numbers = #tpu.dot_dimension_numbers<[1], [0], [0], [1], [0, 0, 1, 1], [], []>} : vector<128x128xbf16>, vector<128x128xbf16>, vector<128x128xf32> -> vector<128x128xf32>
    %26 = arith.addf %23, %25 : vector<128x128xf32>
    %c0_19 = arith.constant 0 : index
    %c0_20 = arith.constant 0 : index
    %27 = vector.load %arg6[%c0_19, %c0_20] : memref<128x128xf32, #tpu.memory_space<vmem>>, vector<128x128xf32>
    tpu.vector_store %arg6[%c0_19, %c0_20], %26 {strides = array<i32>} : memref<128x128xf32, #tpu.memory_space<vmem>>, vector<128x128xf32>,
    return
  }
  func.func @transform_0(%arg0: i32) -> (i32, i32) {
    %c0_i32 = arith.constant 0 : i32
    %c0_i32_0 = arith.constant 0 : i32
    return %c0_i32, %arg0 : i32, i32
  }
  func.func @transform_1(%arg0: i32) -> (i32, i32) {
    %c0_i32 = arith.constant 0 : i32
    %c0_i32_0 = arith.constant 0 : i32
    return %c0_i32, %arg0 : i32, i32
  }
  func.func @transform_2(%arg0: i32) -> (i32, i32) {
    %c0_i32 = arith.constant 0 : i32
    %c0_i32_0 = arith.constant 0 : i32
    return %arg0, %c0_i32 : i32, i32
  }
  func.func @transform_3(%arg0: i32) -> (i32, i32) {
    %c0_i32 = arith.constant 0 : i32
    %c0_i32_0 = arith.constant 0 : i32
    return %arg0, %c0_i32 : i32, i32
  }
  func.func @transform_4(%arg0: i32) -> (i32, i32) {
    %c0_i32 = arith.constant 0 : i32
    %c0_i32_0 = arith.constant 0 : i32
    %c0_i32_1 = arith.constant 0 : i32
    return %c0_i32, %c0_i32_0 : i32, i32
  }
  func.func @transform_5(%arg0: i32) -> (i32, i32) {
    %c0_i32 = arith.constant 0 : i32
    %c0_i32_0 = arith.constant 0 : i32
    %c0_i32_1 = arith.constant 0 : i32
    return %c0_i32, %c0_i32_0 : i32, i32
  }
}

module attributes {stable_mosaic.version = 11 : i64} {
  func.func @bond_msg_kernel(%arg0: i32, %arg1: memref<128x128xbf16, #tpu.memory_space<vmem>>, %arg2: memref<128x128xbf16, #tpu.memory_space<vmem>>, %arg3: memref<128x128xbf16, #tpu.memory_space<vmem>>, %arg4: memref<256x256xbf16, #tpu.memory_space<vmem>>, %arg5: memref<256x256xbf16, #tpu.memory_space<vmem>>, %arg6: memref<1x256xf32, #tpu.memory_space<vmem>>, %arg7: memref<1x256xf32, #tpu.memory_space<vmem>>, %arg8: memref<1x256xf32, #tpu.memory_space<vmem>>, %arg9: memref<256x128xbf16, #tpu.memory_space<vmem>>, %arg10: memref<1x128xf32, #tpu.memory_space<vmem>>, %arg11: memref<256x256xbf16, #tpu.memory_space<vmem>>, %arg12: memref<256x256xbf16, #tpu.memory_space<vmem>>, %arg13: memref<1x256xf32, #tpu.memory_space<vmem>>, %arg14: memref<1x256xf32, #tpu.memory_space<vmem>>, %arg15: memref<1x256xf32, #tpu.memory_space<vmem>>, %arg16: memref<256x128xbf16, #tpu.memory_space<vmem>>, %arg17: memref<1x128xf32, #tpu.memory_space<vmem>>, %arg18: memref<128x128xbf16, #tpu.memory_space<vmem>>, %arg19: memref<128x128xbf16, #tpu.memory_space<vmem>>) attributes {dimension_semantics = [#tpu.dimension_semantics<parallel>], iteration_bounds = array<i64: 2>, scalar_prefetch = 0 : i64, scratch_operands = 0 : i64, tpu.core_type = #tpu.core_type<tc>, window_params = [{transform_indices = @transform_0, window_bounds = array<i64: 128, 128>}, {transform_indices = @transform_1, window_bounds = array<i64: 128, 128>}, {transform_indices = @transform_2, window_bounds = array<i64: 128, 128>}, {pipeline_mode = #tpu.pipeline_mode<synchronous>, transform_indices = @transform_3, window_bounds = array<i64: 256, 256>}, {pipeline_mode = #tpu.pipeline_mode<synchronous>, transform_indices = @transform_4, window_bounds = array<i64: 256, 256>}, {pipeline_mode = #tpu.pipeline_mode<synchronous>, transform_indices = @transform_5, window_bounds = array<i64: 1, 256>}, {pipeline_mode = #tpu.pipeline_mode<synchronous>, transform_indices = @transform_6, window_bounds = array<i64: 1, 256>}, {pipeline_mode = #tpu.pipeline_mode<synchronous>, transform_indices = @transform_7, window_bounds = array<i64: 1, 256>}, {pipeline_mode = #tpu.pipeline_mode<synchronous>, transform_indices = @transform_8, window_bounds = array<i64: 256, 128>}, {pipeline_mode = #tpu.pipeline_mode<synchronous>, transform_indices = @transform_9, window_bounds = array<i64: 1, 128>}, {pipeline_mode = #tpu.pipeline_mode<synchronous>, transform_indices = @transform_10, window_bounds = array<i64: 256, 256>}, {pipeline_mode = #tpu.pipeline_mode<synchronous>, transform_indices = @transform_11, window_bounds = array<i64: 256, 256>}, {pipeline_mode = #tpu.pipeline_mode<synchronous>, transform_indices = @transform_12, window_bounds = array<i64: 1, 256>}, {pipeline_mode = #tpu.pipeline_mode<synchronous>, transform_indices = @transform_13, window_bounds = array<i64: 1, 256>}, {pipeline_mode = #tpu.pipeline_mode<synchronous>, transform_indices = @transform_14, window_bounds = array<i64: 1, 256>}, {pipeline_mode = #tpu.pipeline_mode<synchronous>, transform_indices = @transform_15, window_bounds = array<i64: 256, 128>}, {pipeline_mode = #tpu.pipeline_mode<synchronous>, transform_indices = @transform_16, window_bounds = array<i64: 1, 128>}, {transform_indices = @transform_17, window_bounds = array<i64: 128, 128>}, {transform_indices = @transform_18, window_bounds = array<i64: 128, 128>}]} {
    %c0 = arith.constant 0 : index
    %c0_0 = arith.constant 0 : index
    %0 = vector.load %arg1[%c0, %c0_0] : memref<128x128xbf16, #tpu.memory_space<vmem>>, vector<128x128xbf16>
    %c0_1 = arith.constant 0 : index
    %c0_2 = arith.constant 0 : index
    %1 = vector.load %arg2[%c0_1, %c0_2] : memref<128x128xbf16, #tpu.memory_space<vmem>>, vector<128x128xbf16>
    %2 = tpu.concatenate %0, %1 in 1 : vector<128x128xbf16>, vector<128x128xbf16> -> vector<128x256xbf16>
    %c0_3 = arith.constant 0 : index
    %c0_4 = arith.constant 0 : index
    %3 = vector.load %arg3[%c0_3, %c0_4] : memref<128x128xbf16, #tpu.memory_space<vmem>>, vector<128x128xbf16>
    %4 = tpu.concatenate %0, %3 in 1 : vector<128x128xbf16>, vector<128x128xbf16> -> vector<128x256xbf16>
    %c0_5 = arith.constant 0 : index
    %c0_6 = arith.constant 0 : index
    %5 = vector.load %arg4[%c0_5, %c0_6] : memref<256x256xbf16, #tpu.memory_space<vmem>>, vector<256x256xbf16>
    %c0_7 = arith.constant 0 : index
    %c0_8 = arith.constant 0 : index
    %6 = vector.load %arg5[%c0_7, %c0_8] : memref<256x256xbf16, #tpu.memory_space<vmem>>, vector<256x256xbf16>
    %c0_9 = arith.constant 0 : index
    %c0_10 = arith.constant 0 : index
    %7 = vector.load %arg6[%c0_9, %c0_10] : memref<1x256xf32, #tpu.memory_space<vmem>>, vector<1x256xf32>
    %c0_11 = arith.constant 0 : index
    %c0_12 = arith.constant 0 : index
    %8 = vector.load %arg7[%c0_11, %c0_12] : memref<1x256xf32, #tpu.memory_space<vmem>>, vector<1x256xf32>
    %c0_13 = arith.constant 0 : index
    %c0_14 = arith.constant 0 : index
    %9 = vector.load %arg8[%c0_13, %c0_14] : memref<1x256xf32, #tpu.memory_space<vmem>>, vector<1x256xf32>
    %c0_15 = arith.constant 0 : index
    %c0_16 = arith.constant 0 : index
    %10 = vector.load %arg9[%c0_15, %c0_16] : memref<256x128xbf16, #tpu.memory_space<vmem>>, vector<256x128xbf16>
    %c0_17 = arith.constant 0 : index
    %c0_18 = arith.constant 0 : index
    %11 = vector.load %arg10[%c0_17, %c0_18] : memref<1x128xf32, #tpu.memory_space<vmem>>, vector<1x128xf32>
    %cst = arith.constant dense<0.000000e+00> : vector<128x256xf32>
    %12 = tpu.matmul %2, %5, %cst {dimension_numbers = #tpu.dot_dimension_numbers<[1], [0], [0], [1], [0, 0, 1, 1], [], []>} : vector<128x256xbf16>, vector<256x256xbf16>, vector<128x256xf32> -> vector<128x256xf32>
    %13 = arith.truncf %12 : vector<128x256xf32> to vector<128x256xbf16>
    %cst_19 = arith.constant dense<0.000000e+00> : vector<128x256xf32>
    %14 = tpu.matmul %13, %6, %cst_19 {dimension_numbers = #tpu.dot_dimension_numbers<[1], [0], [0], [1], [0, 0, 1, 1], [], []>} : vector<128x256xbf16>, vector<256x256xbf16>, vector<128x256xf32> -> vector<128x256xf32>
    %15 = vector.broadcast %7 : vector<1x256xf32> to vector<128x256xf32>
    %16 = arith.addf %14, %15 : vector<128x256xf32>
    %cst_20 = arith.constant dense<0.000000e+00> : vector<128xf32>
    %17 = vector.multi_reduction <add>, %16, %cst_20 [1] : vector<128x256xf32> to vector<128xf32>
    %18 = vector.shape_cast %17 : vector<128xf32> to vector<128x1xf32>
    %cst_21 = arith.constant 2.560000e+02 : f32
    %19 = vector.broadcast %cst_21 : f32 to vector<128x1xf32>
    %20 = arith.divf %18, %19 : vector<128x1xf32>
    %21 = vector.broadcast %20 : vector<128x1xf32> to vector<128x256xf32>
    %22 = arith.subf %16, %21 : vector<128x256xf32>
    %23 = arith.mulf %22, %22 : vector<128x256xf32>
    %cst_22 = arith.constant dense<0.000000e+00> : vector<128xf32>
    %24 = vector.multi_reduction <add>, %23, %cst_22 [1] : vector<128x256xf32> to vector<128xf32>
    %25 = vector.shape_cast %24 : vector<128xf32> to vector<128x1xf32>
    %cst_23 = arith.constant 2.560000e+02 : f32
    %26 = vector.broadcast %cst_23 : f32 to vector<128x1xf32>
    %27 = arith.divf %25, %26 : vector<128x1xf32>
    %cst_24 = arith.constant 9.99999974E-6 : f32
    %28 = vector.broadcast %cst_24 : f32 to vector<128x1xf32>
    %29 = arith.addf %27, %28 : vector<128x1xf32>
    %30 = math.rsqrt %29 : vector<128x1xf32>
    %31 = vector.broadcast %30 : vector<128x1xf32> to vector<128x256xf32>
    %32 = arith.mulf %22, %31 : vector<128x256xf32>
    %33 = vector.broadcast %8 : vector<1x256xf32> to vector<128x256xf32>
    %34 = arith.mulf %32, %33 : vector<128x256xf32>
    %35 = vector.broadcast %9 : vector<1x256xf32> to vector<128x256xf32>
    %36 = arith.addf %34, %35 : vector<128x256xf32>
    %cst_25 = arith.constant 0.000000e+00 : f32
    %37 = vector.broadcast %cst_25 : f32 to vector<128x256xf32>
    %38 = arith.maximumf %36, %37 : vector<128x256xf32>
    %39 = arith.truncf %38 : vector<128x256xf32> to vector<128x256xbf16>
    %cst_26 = arith.constant dense<0.000000e+00> : vector<128x128xf32>
    %40 = tpu.matmul %39, %10, %cst_26 {dimension_numbers = #tpu.dot_dimension_numbers<[1], [0], [0], [1], [0, 0, 1, 1], [], []>} : vector<128x256xbf16>, vector<256x128xbf16>, vector<128x128xf32> -> vector<128x128xf32>
    %41 = vector.broadcast %11 : vector<1x128xf32> to vector<128x128xf32>
    %42 = arith.addf %40, %41 : vector<128x128xf32>
    %43 = arith.truncf %42 : vector<128x128xf32> to vector<128x128xbf16>
    %c0_27 = arith.constant 0 : index
    %c0_28 = arith.constant 0 : index
    %44 = vector.load %arg18[%c0_27, %c0_28] : memref<128x128xbf16, #tpu.memory_space<vmem>>, vector<128x128xbf16>
    tpu.vector_store %arg18[%c0_27, %c0_28], %43 {strides = array<i32>} : memref<128x128xbf16, #tpu.memory_space<vmem>>, vector<128x128xbf16>,
    %c0_29 = arith.constant 0 : index
    %c0_30 = arith.constant 0 : index
    %45 = vector.load %arg11[%c0_29, %c0_30] : memref<256x256xbf16, #tpu.memory_space<vmem>>, vector<256x256xbf16>
    %c0_31 = arith.constant 0 : index
    %c0_32 = arith.constant 0 : index
    %46 = vector.load %arg12[%c0_31, %c0_32] : memref<256x256xbf16, #tpu.memory_space<vmem>>, vector<256x256xbf16>
    %c0_33 = arith.constant 0 : index
    %c0_34 = arith.constant 0 : index
    %47 = vector.load %arg13[%c0_33, %c0_34] : memref<1x256xf32, #tpu.memory_space<vmem>>, vector<1x256xf32>
    %c0_35 = arith.constant 0 : index
    %c0_36 = arith.constant 0 : index
    %48 = vector.load %arg14[%c0_35, %c0_36] : memref<1x256xf32, #tpu.memory_space<vmem>>, vector<1x256xf32>
    %c0_37 = arith.constant 0 : index
    %c0_38 = arith.constant 0 : index
    %49 = vector.load %arg15[%c0_37, %c0_38] : memref<1x256xf32, #tpu.memory_space<vmem>>, vector<1x256xf32>
    %c0_39 = arith.constant 0 : index
    %c0_40 = arith.constant 0 : index
    %50 = vector.load %arg16[%c0_39, %c0_40] : memref<256x128xbf16, #tpu.memory_space<vmem>>, vector<256x128xbf16>
    %c0_41 = arith.constant 0 : index
    %c0_42 = arith.constant 0 : index
    %51 = vector.load %arg17[%c0_41, %c0_42] : memref<1x128xf32, #tpu.memory_space<vmem>>, vector<1x128xf32>
    %cst_43 = arith.constant dense<0.000000e+00> : vector<128x256xf32>
    %52 = tpu.matmul %4, %45, %cst_43 {dimension_numbers = #tpu.dot_dimension_numbers<[1], [0], [0], [1], [0, 0, 1, 1], [], []>} : vector<128x256xbf16>, vector<256x256xbf16>, vector<128x256xf32> -> vector<128x256xf32>
    %53 = arith.truncf %52 : vector<128x256xf32> to vector<128x256xbf16>
    %cst_44 = arith.constant dense<0.000000e+00> : vector<128x256xf32>
    %54 = tpu.matmul %53, %46, %cst_44 {dimension_numbers = #tpu.dot_dimension_numbers<[1], [0], [0], [1], [0, 0, 1, 1], [], []>} : vector<128x256xbf16>, vector<256x256xbf16>, vector<128x256xf32> -> vector<128x256xf32>
    %55 = vector.broadcast %47 : vector<1x256xf32> to vector<128x256xf32>
    %56 = arith.addf %54, %55 : vector<128x256xf32>
    %cst_45 = arith.constant dense<0.000000e+00> : vector<128xf32>
    %57 = vector.multi_reduction <add>, %56, %cst_45 [1] : vector<128x256xf32> to vector<128xf32>
    %58 = vector.shape_cast %57 : vector<128xf32> to vector<128x1xf32>
    %cst_46 = arith.constant 2.560000e+02 : f32
    %59 = vector.broadcast %cst_46 : f32 to vector<128x1xf32>
    %60 = arith.divf %58, %59 : vector<128x1xf32>
    %61 = vector.broadcast %60 : vector<128x1xf32> to vector<128x256xf32>
    %62 = arith.subf %56, %61 : vector<128x256xf32>
    %63 = arith.mulf %62, %62 : vector<128x256xf32>
    %cst_47 = arith.constant dense<0.000000e+00> : vector<128xf32>
    %64 = vector.multi_reduction <add>, %63, %cst_47 [1] : vector<128x256xf32> to vector<128xf32>
    %65 = vector.shape_cast %64 : vector<128xf32> to vector<128x1xf32>
    %cst_48 = arith.constant 2.560000e+02 : f32
    %66 = vector.broadcast %cst_48 : f32 to vector<128x1xf32>
    %67 = arith.divf %65, %66 : vector<128x1xf32>
    %cst_49 = arith.constant 9.99999974E-6 : f32
    %68 = vector.broadcast %cst_49 : f32 to vector<128x1xf32>
    %69 = arith.addf %67, %68 : vector<128x1xf32>
    %70 = math.rsqrt %69 : vector<128x1xf32>
    %71 = vector.broadcast %70 : vector<128x1xf32> to vector<128x256xf32>
    %72 = arith.mulf %62, %71 : vector<128x256xf32>
    %73 = vector.broadcast %48 : vector<1x256xf32> to vector<128x256xf32>
    %74 = arith.mulf %72, %73 : vector<128x256xf32>
    %75 = vector.broadcast %49 : vector<1x256xf32> to vector<128x256xf32>
    %76 = arith.addf %74, %75 : vector<128x256xf32>
    %cst_50 = arith.constant 0.000000e+00 : f32
    %77 = vector.broadcast %cst_50 : f32 to vector<128x256xf32>
    %78 = arith.maximumf %76, %77 : vector<128x256xf32>
    %79 = arith.truncf %78 : vector<128x256xf32> to vector<128x256xbf16>
    %cst_51 = arith.constant dense<0.000000e+00> : vector<128x128xf32>
    %80 = tpu.matmul %79, %50, %cst_51 {dimension_numbers = #tpu.dot_dimension_numbers<[1], [0], [0], [1], [0, 0, 1, 1], [], []>} : vector<128x256xbf16>, vector<256x128xbf16>, vector<128x128xf32> -> vector<128x128xf32>
    %81 = vector.broadcast %51 : vector<1x128xf32> to vector<128x128xf32>
    %82 = arith.addf %80, %81 : vector<128x128xf32>
    %83 = arith.truncf %82 : vector<128x128xf32> to vector<128x128xbf16>
    %c0_52 = arith.constant 0 : index
    %c0_53 = arith.constant 0 : index
    %84 = vector.load %arg19[%c0_52, %c0_53] : memref<128x128xbf16, #tpu.memory_space<vmem>>, vector<128x128xbf16>
    tpu.vector_store %arg19[%c0_52, %c0_53], %83 {strides = array<i32>} : memref<128x128xbf16, #tpu.memory_space<vmem>>, vector<128x128xbf16>,
    return
  }
  func.func @transform_0(%arg0: i32) -> (i32, i32) {
    %c0_i32 = arith.constant 0 : i32
    %c0_i32_0 = arith.constant 0 : i32
    return %arg0, %c0_i32 : i32, i32
  }
  func.func @transform_1(%arg0: i32) -> (i32, i32) {
    %c0_i32 = arith.constant 0 : i32
    %c0_i32_0 = arith.constant 0 : i32
    return %arg0, %c0_i32 : i32, i32
  }
  func.func @transform_2(%arg0: i32) -> (i32, i32) {
    %c0_i32 = arith.constant 0 : i32
    %c0_i32_0 = arith.constant 0 : i32
    return %arg0, %c0_i32 : i32, i32
  }
  func.func @transform_3(%arg0: i32) -> (i32, i32) {
    %c0_i32 = arith.constant 0 : i32
    %c0_i32_0 = arith.constant 0 : i32
    %c0_i32_1 = arith.constant 0 : i32
    return %c0_i32, %c0_i32_0 : i32, i32
  }
  func.func @transform_4(%arg0: i32) -> (i32, i32) {
    %c0_i32 = arith.constant 0 : i32
    %c0_i32_0 = arith.constant 0 : i32
    %c0_i32_1 = arith.constant 0 : i32
    return %c0_i32, %c0_i32_0 : i32, i32
  }
  func.func @transform_5(%arg0: i32) -> (i32, i32) {
    %c0_i32 = arith.constant 0 : i32
    %c0_i32_0 = arith.constant 0 : i32
    %c0_i32_1 = arith.constant 0 : i32
    return %c0_i32, %c0_i32_0 : i32, i32
  }
  func.func @transform_6(%arg0: i32) -> (i32, i32) {
    %c0_i32 = arith.constant 0 : i32
    %c0_i32_0 = arith.constant 0 : i32
    %c0_i32_1 = arith.constant 0 : i32
    return %c0_i32, %c0_i32_0 : i32, i32
  }
  func.func @transform_7(%arg0: i32) -> (i32, i32) {
    %c0_i32 = arith.constant 0 : i32
    %c0_i32_0 = arith.constant 0 : i32
    %c0_i32_1 = arith.constant 0 : i32
    return %c0_i32, %c0_i32_0 : i32, i32
  }
  func.func @transform_8(%arg0: i32) -> (i32, i32) {
    %c0_i32 = arith.constant 0 : i32
    %c0_i32_0 = arith.constant 0 : i32
    %c0_i32_1 = arith.constant 0 : i32
    return %c0_i32, %c0_i32_0 : i32, i32
  }
  func.func @transform_9(%arg0: i32) -> (i32, i32) {
    %c0_i32 = arith.constant 0 : i32
    %c0_i32_0 = arith.constant 0 : i32
    %c0_i32_1 = arith.constant 0 : i32
    return %c0_i32, %c0_i32_0 : i32, i32
  }
  func.func @transform_10(%arg0: i32) -> (i32, i32) {
    %c0_i32 = arith.constant 0 : i32
    %c0_i32_0 = arith.constant 0 : i32
    %c0_i32_1 = arith.constant 0 : i32
    return %c0_i32, %c0_i32_0 : i32, i32
  }
  func.func @transform_11(%arg0: i32) -> (i32, i32) {
    %c0_i32 = arith.constant 0 : i32
    %c0_i32_0 = arith.constant 0 : i32
    %c0_i32_1 = arith.constant 0 : i32
    return %c0_i32, %c0_i32_0 : i32, i32
  }
  func.func @transform_12(%arg0: i32) -> (i32, i32) {
    %c0_i32 = arith.constant 0 : i32
    %c0_i32_0 = arith.constant 0 : i32
    %c0_i32_1 = arith.constant 0 : i32
    return %c0_i32, %c0_i32_0 : i32, i32
  }
  func.func @transform_13(%arg0: i32) -> (i32, i32) {
    %c0_i32 = arith.constant 0 : i32
    %c0_i32_0 = arith.constant 0 : i32
    %c0_i32_1 = arith.constant 0 : i32
    return %c0_i32, %c0_i32_0 : i32, i32
  }
  func.func @transform_14(%arg0: i32) -> (i32, i32) {
    %c0_i32 = arith.constant 0 : i32
    %c0_i32_0 = arith.constant 0 : i32
    %c0_i32_1 = arith.constant 0 : i32
    return %c0_i32, %c0_i32_0 : i32, i32
  }
  func.func @transform_15(%arg0: i32) -> (i32, i32) {
    %c0_i32 = arith.constant 0 : i32
    %c0_i32_0 = arith.constant 0 : i32
    %c0_i32_1 = arith.constant 0 : i32
    return %c0_i32, %c0_i32_0 : i32, i32
  }
  func.func @transform_16(%arg0: i32) -> (i32, i32) {
    %c0_i32 = arith.constant 0 : i32
    %c0_i32_0 = arith.constant 0 : i32
    %c0_i32_1 = arith.constant 0 : i32
    return %c0_i32, %c0_i32_0 : i32, i32
  }
  func.func @transform_17(%arg0: i32) -> (i32, i32) {
    %c0_i32 = arith.constant 0 : i32
    %c0_i32_0 = arith.constant 0 : i32
    return %arg0, %c0_i32 : i32, i32
  }
  func.func @transform_18(%arg0: i32) -> (i32, i32) {
    %c0_i32 = arith.constant 0 : i32
    %c0_i32_0 = arith.constant 0 : i32
    return %arg0, %c0_i32 : i32, i32
  }
}

module attributes {stable_mosaic.version = 11 : i64} {
  func.func @combine_kernel(%arg0: i32, %arg1: memref<128x1xi32, #tpu.memory_space<vmem>>, %arg2: memref<128x1xi32, #tpu.memory_space<vmem>>, %arg3: memref<128x128xf32, #tpu.memory_space<vmem>>, %arg4: memref<128x256xbf16, #tpu.memory_space<vmem>>, %arg5: memref<128x256xbf16, #tpu.memory_space<vmem>>, %arg6: memref<640x128xbf16, #tpu.memory_space<vmem>>, %arg7: memref<1x128xf32, #tpu.memory_space<vmem>>, %arg8: memref<128x128xbf16, #tpu.memory_space<vmem>>, %arg9: memref<1x128xf32, #tpu.memory_space<vmem>>, %arg10: memref<1x128xf32, #tpu.memory_space<vmem>>, %arg11: memref<1x128xf32, #tpu.memory_space<vmem>>, %arg12: memref<128x128xbf16, #tpu.memory_space<vmem>>, %arg13: memref<1x128xf32, #tpu.memory_space<vmem>>, %arg14: memref<1x128xf32, #tpu.memory_space<vmem>>, %arg15: memref<1x128xf32, #tpu.memory_space<vmem>>, %arg16: memref<128x128xf32, #tpu.memory_space<vmem>>) attributes {dimension_semantics = [#tpu.dimension_semantics<parallel>], iteration_bounds = array<i64: 2>, scalar_prefetch = 0 : i64, scratch_operands = 0 : i64, tpu.core_type = #tpu.core_type<tc>, window_params = [{transform_indices = @transform_0, window_bounds = array<i64: 128, 1>}, {transform_indices = @transform_1, window_bounds = array<i64: 128, 1>}, {transform_indices = @transform_2, window_bounds = array<i64: 128, 128>}, {pipeline_mode = #tpu.pipeline_mode<synchronous>, transform_indices = @transform_3, window_bounds = array<i64: 128, 256>}, {pipeline_mode = #tpu.pipeline_mode<synchronous>, transform_indices = @transform_4, window_bounds = array<i64: 128, 256>}, {pipeline_mode = #tpu.pipeline_mode<synchronous>, transform_indices = @transform_5, window_bounds = array<i64: 640, 128>}, {pipeline_mode = #tpu.pipeline_mode<synchronous>, transform_indices = @transform_6, window_bounds = array<i64: 1, 128>}, {pipeline_mode = #tpu.pipeline_mode<synchronous>, transform_indices = @transform_7, window_bounds = array<i64: 128, 128>}, {pipeline_mode = #tpu.pipeline_mode<synchronous>, transform_indices = @transform_8, window_bounds = array<i64: 1, 128>}, {pipeline_mode = #tpu.pipeline_mode<synchronous>, transform_indices = @transform_9, window_bounds = array<i64: 1, 128>}, {pipeline_mode = #tpu.pipeline_mode<synchronous>, transform_indices = @transform_10, window_bounds = array<i64: 1, 128>}, {pipeline_mode = #tpu.pipeline_mode<synchronous>, transform_indices = @transform_11, window_bounds = array<i64: 128, 128>}, {pipeline_mode = #tpu.pipeline_mode<synchronous>, transform_indices = @transform_12, window_bounds = array<i64: 1, 128>}, {pipeline_mode = #tpu.pipeline_mode<synchronous>, transform_indices = @transform_13, window_bounds = array<i64: 1, 128>}, {pipeline_mode = #tpu.pipeline_mode<synchronous>, transform_indices = @transform_14, window_bounds = array<i64: 1, 128>}, {transform_indices = @transform_15, window_bounds = array<i64: 128, 128>}]} {
    %0 = tpu.iota {dimensions = array<i32: 1>} : vector<128x128xi32>
    %c0 = arith.constant 0 : index
    %c0_0 = arith.constant 0 : index
    %1 = vector.load %arg1[%c0, %c0_0] : memref<128x1xi32, #tpu.memory_space<vmem>>, vector<128x1xi32>
    %2 = vector.broadcast %1 : vector<128x1xi32> to vector<128x128xi32>
    %3 = arith.cmpi eq, %0, %2 : vector<128x128xi32>
    %cst = arith.constant 1.000000e+00 : f32
    %cst_1 = arith.constant 0.000000e+00 : f32
    %4 = vector.broadcast %cst : f32 to vector<128x128xf32>
    %5 = vector.broadcast %cst_1 : f32 to vector<128x128xf32>
    %6 = arith.select %3, %4, %5 : vector<128x128xi1>, vector<128x128xf32>
    %7 = arith.truncf %6 : vector<128x128xf32> to vector<128x128xbf16>
    %c0_2 = arith.constant 0 : index
    %c0_3 = arith.constant 0 : index
    %8 = vector.load %arg2[%c0_2, %c0_3] : memref<128x1xi32, #tpu.memory_space<vmem>>, vector<128x1xi32>
    %9 = vector.broadcast %8 : vector<128x1xi32> to vector<128x128xi32>
    %10 = arith.cmpi eq, %0, %9 : vector<128x128xi32>
    %cst_4 = arith.constant 1.000000e+00 : f32
    %cst_5 = arith.constant 0.000000e+00 : f32
    %11 = vector.broadcast %cst_4 : f32 to vector<128x128xf32>
    %12 = vector.broadcast %cst_5 : f32 to vector<128x128xf32>
    %13 = arith.select %10, %11, %12 : vector<128x128xi1>, vector<128x128xf32>
    %14 = arith.truncf %13 : vector<128x128xf32> to vector<128x128xbf16>
    %c0_6 = arith.constant 0 : index
    %c0_7 = arith.constant 0 : index
    %15 = vector.load %arg4[%c0_6, %c0_7] : memref<128x256xbf16, #tpu.memory_space<vmem>>, vector<128x256xbf16>
    %cst_8 = arith.constant dense<0.000000e+00> : vector<128x256xf32>
    %16 = tpu.matmul %7, %15, %cst_8 {dimension_numbers = #tpu.dot_dimension_numbers<[1], [0], [0], [1], [0, 0, 1, 1], [], []>} : vector<128x128xbf16>, vector<128x256xbf16>, vector<128x256xf32> -> vector<128x256xf32>
    %c0_9 = arith.constant 0 : index
    %c0_10 = arith.constant 0 : index
    %17 = vector.load %arg5[%c0_9, %c0_10] : memref<128x256xbf16, #tpu.memory_space<vmem>>, vector<128x256xbf16>
    %cst_11 = arith.constant dense<0.000000e+00> : vector<128x256xf32>
    %18 = tpu.matmul %14, %17, %cst_11 {dimension_numbers = #tpu.dot_dimension_numbers<[1], [0], [0], [1], [0, 0, 1, 1], [], []>} : vector<128x128xbf16>, vector<128x256xbf16>, vector<128x256xf32> -> vector<128x256xf32>
    %c0_12 = arith.constant 0 : index
    %c0_13 = arith.constant 0 : index
    %19 = vector.load %arg3[%c0_12, %c0_13] : memref<128x128xf32, #tpu.memory_space<vmem>>, vector<128x128xf32>
    %20 = arith.truncf %16 : vector<128x256xf32> to vector<128x256xbf16>
    %21 = arith.truncf %18 : vector<128x256xf32> to vector<128x256xbf16>
    %22 = arith.truncf %19 : vector<128x128xf32> to vector<128x128xbf16>
    %23 = tpu.concatenate %20, %21, %22 in 1 : vector<128x256xbf16>, vector<128x256xbf16>, vector<128x128xbf16> -> vector<128x640xbf16>
    %c0_14 = arith.constant 0 : index
    %c0_15 = arith.constant 0 : index
    %24 = vector.load %arg6[%c0_14, %c0_15] : memref<640x128xbf16, #tpu.memory_space<vmem>>, vector<640x128xbf16>
    %cst_16 = arith.constant dense<0.000000e+00> : vector<128x128xf32>
    %25 = tpu.matmul %23, %24, %cst_16 {dimension_numbers = #tpu.dot_dimension_numbers<[1], [0], [0], [1], [0, 0, 1, 1], [], []>} : vector<128x640xbf16>, vector<640x128xbf16>, vector<128x128xf32> -> vector<128x128xf32>
    %c0_17 = arith.constant 0 : index
    %c0_18 = arith.constant 0 : index
    %26 = vector.load %arg7[%c0_17, %c0_18] : memref<1x128xf32, #tpu.memory_space<vmem>>, vector<1x128xf32>
    %27 = vector.broadcast %26 : vector<1x128xf32> to vector<128x128xf32>
    %28 = arith.addf %25, %27 : vector<128x128xf32>
    %c0_19 = arith.constant 0 : index
    %c0_20 = arith.constant 0 : index
    %29 = vector.load %arg8[%c0_19, %c0_20] : memref<128x128xbf16, #tpu.memory_space<vmem>>, vector<128x128xbf16>
    %30 = arith.truncf %28 : vector<128x128xf32> to vector<128x128xbf16>
    %cst_21 = arith.constant dense<0.000000e+00> : vector<128x128xf32>
    %31 = tpu.matmul %30, %29, %cst_21 {dimension_numbers = #tpu.dot_dimension_numbers<[1], [0], [0], [1], [0, 0, 1, 1], [], []>} : vector<128x128xbf16>, vector<128x128xbf16>, vector<128x128xf32> -> vector<128x128xf32>
    %c0_22 = arith.constant 0 : index
    %c0_23 = arith.constant 0 : index
    %32 = vector.load %arg9[%c0_22, %c0_23] : memref<1x128xf32, #tpu.memory_space<vmem>>, vector<1x128xf32>
    %33 = vector.broadcast %32 : vector<1x128xf32> to vector<128x128xf32>
    %34 = arith.addf %31, %33 : vector<128x128xf32>
    %c0_24 = arith.constant 0 : index
    %c0_25 = arith.constant 0 : index
    %35 = vector.load %arg10[%c0_24, %c0_25] : memref<1x128xf32, #tpu.memory_space<vmem>>, vector<1x128xf32>
    %c0_26 = arith.constant 0 : index
    %c0_27 = arith.constant 0 : index
    %36 = vector.load %arg11[%c0_26, %c0_27] : memref<1x128xf32, #tpu.memory_space<vmem>>, vector<1x128xf32>
    %cst_28 = arith.constant dense<0.000000e+00> : vector<128xf32>
    %37 = vector.multi_reduction <add>, %34, %cst_28 [1] : vector<128x128xf32> to vector<128xf32>
    %38 = vector.shape_cast %37 : vector<128xf32> to vector<128x1xf32>
    %cst_29 = arith.constant 1.280000e+02 : f32
    %39 = vector.broadcast %cst_29 : f32 to vector<128x1xf32>
    %40 = arith.divf %38, %39 : vector<128x1xf32>
    %41 = vector.broadcast %40 : vector<128x1xf32> to vector<128x128xf32>
    %42 = arith.subf %34, %41 : vector<128x128xf32>
    %43 = arith.mulf %42, %42 : vector<128x128xf32>
    %cst_30 = arith.constant dense<0.000000e+00> : vector<128xf32>
    %44 = vector.multi_reduction <add>, %43, %cst_30 [1] : vector<128x128xf32> to vector<128xf32>
    %45 = vector.shape_cast %44 : vector<128xf32> to vector<128x1xf32>
    %cst_31 = arith.constant 1.280000e+02 : f32
    %46 = vector.broadcast %cst_31 : f32 to vector<128x1xf32>
    %47 = arith.divf %45, %46 : vector<128x1xf32>
    %cst_32 = arith.constant 9.99999974E-6 : f32
    %48 = vector.broadcast %cst_32 : f32 to vector<128x1xf32>
    %49 = arith.addf %47, %48 : vector<128x1xf32>
    %50 = math.rsqrt %49 : vector<128x1xf32>
    %51 = vector.broadcast %50 : vector<128x1xf32> to vector<128x128xf32>
    %52 = arith.mulf %42, %51 : vector<128x128xf32>
    %53 = vector.broadcast %35 : vector<1x128xf32> to vector<128x128xf32>
    %54 = arith.mulf %52, %53 : vector<128x128xf32>
    %55 = vector.broadcast %36 : vector<1x128xf32> to vector<128x128xf32>
    %56 = arith.addf %54, %55 : vector<128x128xf32>
    %cst_33 = arith.constant 0.000000e+00 : f32
    %57 = vector.broadcast %cst_33 : f32 to vector<128x128xf32>
    %58 = arith.maximumf %56, %57 : vector<128x128xf32>
    %c0_34 = arith.constant 0 : index
    %c0_35 = arith.constant 0 : index
    %59 = vector.load %arg12[%c0_34, %c0_35] : memref<128x128xbf16, #tpu.memory_space<vmem>>, vector<128x128xbf16>
    %60 = arith.truncf %58 : vector<128x128xf32> to vector<128x128xbf16>
    %cst_36 = arith.constant dense<0.000000e+00> : vector<128x128xf32>
    %61 = tpu.matmul %60, %59, %cst_36 {dimension_numbers = #tpu.dot_dimension_numbers<[1], [0], [0], [1], [0, 0, 1, 1], [], []>} : vector<128x128xbf16>, vector<128x128xbf16>, vector<128x128xf32> -> vector<128x128xf32>
    %c0_37 = arith.constant 0 : index
    %c0_38 = arith.constant 0 : index
    %62 = vector.load %arg13[%c0_37, %c0_38] : memref<1x128xf32, #tpu.memory_space<vmem>>, vector<1x128xf32>
    %63 = vector.broadcast %62 : vector<1x128xf32> to vector<128x128xf32>
    %64 = arith.addf %61, %63 : vector<128x128xf32>
    %65 = arith.addf %64, %19 : vector<128x128xf32>
    %c0_39 = arith.constant 0 : index
    %c0_40 = arith.constant 0 : index
    %66 = vector.load %arg14[%c0_39, %c0_40] : memref<1x128xf32, #tpu.memory_space<vmem>>, vector<1x128xf32>
    %c0_41 = arith.constant 0 : index
    %c0_42 = arith.constant 0 : index
    %67 = vector.load %arg15[%c0_41, %c0_42] : memref<1x128xf32, #tpu.memory_space<vmem>>, vector<1x128xf32>
    %cst_43 = arith.constant dense<0.000000e+00> : vector<128xf32>
    %68 = vector.multi_reduction <add>, %65, %cst_43 [1] : vector<128x128xf32> to vector<128xf32>
    %69 = vector.shape_cast %68 : vector<128xf32> to vector<128x1xf32>
    %cst_44 = arith.constant 1.280000e+02 : f32
    %70 = vector.broadcast %cst_44 : f32 to vector<128x1xf32>
    %71 = arith.divf %69, %70 : vector<128x1xf32>
    %72 = vector.broadcast %71 : vector<128x1xf32> to vector<128x128xf32>
    %73 = arith.subf %65, %72 : vector<128x128xf32>
    %74 = arith.mulf %73, %73 : vector<128x128xf32>
    %cst_45 = arith.constant dense<0.000000e+00> : vector<128xf32>
    %75 = vector.multi_reduction <add>, %74, %cst_45 [1] : vector<128x128xf32> to vector<128xf32>
    %76 = vector.shape_cast %75 : vector<128xf32> to vector<128x1xf32>
    %cst_46 = arith.constant 1.280000e+02 : f32
    %77 = vector.broadcast %cst_46 : f32 to vector<128x1xf32>
    %78 = arith.divf %76, %77 : vector<128x1xf32>
    %cst_47 = arith.constant 9.99999974E-6 : f32
    %79 = vector.broadcast %cst_47 : f32 to vector<128x1xf32>
    %80 = arith.addf %78, %79 : vector<128x1xf32>
    %81 = math.rsqrt %80 : vector<128x1xf32>
    %82 = vector.broadcast %81 : vector<128x1xf32> to vector<128x128xf32>
    %83 = arith.mulf %73, %82 : vector<128x128xf32>
    %84 = vector.broadcast %66 : vector<1x128xf32> to vector<128x128xf32>
    %85 = arith.mulf %83, %84 : vector<128x128xf32>
    %86 = vector.broadcast %67 : vector<1x128xf32> to vector<128x128xf32>
    %87 = arith.addf %85, %86 : vector<128x128xf32>
    %c0_48 = arith.constant 0 : index
    %c0_49 = arith.constant 0 : index
    %88 = vector.load %arg16[%c0_48, %c0_49] : memref<128x128xf32, #tpu.memory_space<vmem>>, vector<128x128xf32>
    tpu.vector_store %arg16[%c0_48, %c0_49], %87 {strides = array<i32>} : memref<128x128xf32, #tpu.memory_space<vmem>>, vector<128x128xf32>,
    return
  }
  func.func @transform_0(%arg0: i32) -> (i32, i32) {
    %c0_i32 = arith.constant 0 : i32
    %c0_i32_0 = arith.constant 0 : i32
    return %arg0, %c0_i32 : i32, i32
  }
  func.func @transform_1(%arg0: i32) -> (i32, i32) {
    %c0_i32 = arith.constant 0 : i32
    %c0_i32_0 = arith.constant 0 : i32
    return %arg0, %c0_i32 : i32, i32
  }
  func.func @transform_2(%arg0: i32) -> (i32, i32) {
    %c0_i32 = arith.constant 0 : i32
    %c0_i32_0 = arith.constant 0 : i32
    return %arg0, %c0_i32 : i32, i32
  }
  func.func @transform_3(%arg0: i32) -> (i32, i32) {
    %c0_i32 = arith.constant 0 : i32
    %c0_i32_0 = arith.constant 0 : i32
    %c0_i32_1 = arith.constant 0 : i32
    return %c0_i32, %c0_i32_0 : i32, i32
  }
  func.func @transform_4(%arg0: i32) -> (i32, i32) {
    %c0_i32 = arith.constant 0 : i32
    %c0_i32_0 = arith.constant 0 : i32
    %c0_i32_1 = arith.constant 0 : i32
    return %c0_i32, %c0_i32_0 : i32, i32
  }
  func.func @transform_5(%arg0: i32) -> (i32, i32) {
    %c0_i32 = arith.constant 0 : i32
    %c0_i32_0 = arith.constant 0 : i32
    %c0_i32_1 = arith.constant 0 : i32
    return %c0_i32, %c0_i32_0 : i32, i32
  }
  func.func @transform_6(%arg0: i32) -> (i32, i32) {
    %c0_i32 = arith.constant 0 : i32
    %c0_i32_0 = arith.constant 0 : i32
    %c0_i32_1 = arith.constant 0 : i32
    return %c0_i32, %c0_i32_0 : i32, i32
  }
  func.func @transform_7(%arg0: i32) -> (i32, i32) {
    %c0_i32 = arith.constant 0 : i32
    %c0_i32_0 = arith.constant 0 : i32
    %c0_i32_1 = arith.constant 0 : i32
    return %c0_i32, %c0_i32_0 : i32, i32
  }
  func.func @transform_8(%arg0: i32) -> (i32, i32) {
    %c0_i32 = arith.constant 0 : i32
    %c0_i32_0 = arith.constant 0 : i32
    %c0_i32_1 = arith.constant 0 : i32
    return %c0_i32, %c0_i32_0 : i32, i32
  }
  func.func @transform_9(%arg0: i32) -> (i32, i32) {
    %c0_i32 = arith.constant 0 : i32
    %c0_i32_0 = arith.constant 0 : i32
    %c0_i32_1 = arith.constant 0 : i32
    return %c0_i32, %c0_i32_0 : i32, i32
  }
  func.func @transform_10(%arg0: i32) -> (i32, i32) {
    %c0_i32 = arith.constant 0 : i32
    %c0_i32_0 = arith.constant 0 : i32
    %c0_i32_1 = arith.constant 0 : i32
    return %c0_i32, %c0_i32_0 : i32, i32
  }
  func.func @transform_11(%arg0: i32) -> (i32, i32) {
    %c0_i32 = arith.constant 0 : i32
    %c0_i32_0 = arith.constant 0 : i32
    %c0_i32_1 = arith.constant 0 : i32
    return %c0_i32, %c0_i32_0 : i32, i32
  }
  func.func @transform_12(%arg0: i32) -> (i32, i32) {
    %c0_i32 = arith.constant 0 : i32
    %c0_i32_0 = arith.constant 0 : i32
    %c0_i32_1 = arith.constant 0 : i32
    return %c0_i32, %c0_i32_0 : i32, i32
  }
  func.func @transform_13(%arg0: i32) -> (i32, i32) {
    %c0_i32 = arith.constant 0 : i32
    %c0_i32_0 = arith.constant 0 : i32
    %c0_i32_1 = arith.constant 0 : i32
    return %c0_i32, %c0_i32_0 : i32, i32
  }
  func.func @transform_14(%arg0: i32) -> (i32, i32) {
    %c0_i32 = arith.constant 0 : i32
    %c0_i32_0 = arith.constant 0 : i32
    %c0_i32_1 = arith.constant 0 : i32
    return %c0_i32, %c0_i32_0 : i32, i32
  }
  func.func @transform_15(%arg0: i32) -> (i32, i32) {
    %c0_i32 = arith.constant 0 : i32
    %c0_i32_0 = arith.constant 0 : i32
    return %arg0, %c0_i32 : i32, i32
  }
}

</mosaic_0001>

<bundles_post_ra>
// kernel: edge_block_forward.4
= control target key start
LH: loop header
LB: loop body
LE: loop exit
PB: predicated region body
PF: predicated region fallthrough
CT: control target
= control target key end

     0   :  { %s1109_s18 = smov 0   ;;  %s1525_s0 = inlined_call_operand.vmem [shape: s32[1,256], index: 0, kind: input, shape index: {}]   ;;  %s1526_s1 = inlined_call_operand.vmem [shape: s32[1,256], index: 1, kind: input, shape index: {}]   ;;  %s1527_s2 = inlined_call_operand.vmem [shape: bf16[256,128], index: 2, kind: input, shape index: {}]   ;;  %s1528_s3 = inlined_call_operand.vmem [shape: bf16[256,128], index: 3, kind: input, shape index: {}]   ;;  %s1529_s4 = inlined_call_operand.vmem [shape: f32[128,128], index: 4, kind: output, shape index: {0}]   ;;  %s1530_s5 = inlined_call_operand.vmem [shape: f32[128,128], index: 5, kind: output, shape index: {1}]  }
   0x1 LB: > { %s886_s19 = sadd.s32 4294967295, %s1075_s18   ;;  %p889_p0 = scmp.ge.s32.totalorder %s1075_s18, 1  ;;  %s1075_s18 = sphi %s1109_s18, %s16_s18  }
   0x2   : > { %p208_p1 = scmp.lt.s32.totalorder %s1075_s18, 3 }
   0x4   : > { %p209_p2 = pnand %p889_p0, %p208_p1 }
   0x5   : > { %p242_p3 = scmp.lt.s32.totalorder (!%p209_p2), %s886_s19, 1  ;;  %s890_s20 = sshll.u32 (!%p209_p2), %s886_s19, 4 }
   0x6   : > { %212 = sbr.rel (%p209_p2) target bundleno = 308 (0x134), region = 36  ;;  %p249_p4 = scmp.lt.s32.totalorder (!%p209_p2), %s890_s20, 31 }
   0x7   : > { %p894_p5 = scmp.ne.s32.totalorder (!%p209_p2), %s886_s19, 0 }
   0xd   : > { %s1117_s21 = scalar_select %p242_p3, %s886_s19, 1 }
   0xe   : > { %s1532_s20 = smov (!%p249_p4, %s890_s20), 31  ;;  %264 = sbr.rel (%p894_p5) target bundleno = 32 (0x20), region = 40 }
   0xf   : > { %s244_s24 = scalar_lea.vmem %s1525_s0, %s1117_s21  ;;  %s247_s27 = scalar_lea.vmem %s1526_s1, %s1117_s21  ;;  %v1077_v0 = vmov (!%p894_p5), 0.0  }
  0x10   : > { %s891_s28 = sshll.u32 %s1532_s20, 2  ;;  %265 = vst [vmem:[%s1529_s4] sm:$0xff] (!%p894_p5), %v1077_v0  ;;  %266 = vst [vmem:[%s1529_s4 + $0x8] sm:$0xff] (!%p894_p5), %v1077_v0 }
  0x11   : > { %s1130_s6 = scalar_lea.vmem %s1527_s2, %s891_s28  ;;  %s1135_s9 = scalar_lea.vmem %s1528_s3, %s891_s28  ;;  %267 = vst [vmem:[%s1529_s4 + $0x10] sm:$0xff] (!%p894_p5), %v1077_v0  ;;  %268 = vst [vmem:[%s1529_s4 + $0x18] sm:$0xff] (!%p894_p5), %v1077_v0 }
  0x12   : > { %269 = vst [vmem:[%s1529_s4 + $0x20] sm:$0xff] (!%p894_p5), %v1077_v0  ;;  %270 = vst [vmem:[%s1529_s4 + $0x28] sm:$0xff] (!%p894_p5), %v1077_v0 }
  0x13   : > { %271 = vst [vmem:[%s1529_s4 + $0x30] sm:$0xff] (!%p894_p5), %v1077_v0  ;;  %272 = vst [vmem:[%s1529_s4 + $0x38] sm:$0xff] (!%p894_p5), %v1077_v0 }
  0x14   : > { %273 = vst [vmem:[%s1529_s4 + $0x40] sm:$0xff] (!%p894_p5), %v1077_v0  ;;  %274 = vst [vmem:[%s1529_s4 + $0x48] sm:$0xff] (!%p894_p5), %v1077_v0 }
  0x15   : > { %275 = vst [vmem:[%s1529_s4 + $0x50] sm:$0xff] %v1077_v0  ;;  %276 = vst [vmem:[%s1529_s4 + $0x58] sm:$0xff] %v1077_v0 }
  0x16   : > { %277 = vst [vmem:[%s1529_s4 + $0x60] sm:$0xff] %v1077_v0  ;;  %278 = vst [vmem:[%s1529_s4 + $0x68] sm:$0xff] %v1077_v0 }
  0x17   : > { %279 = vst [vmem:[%s1529_s4 + $0x70] sm:$0xff] %v1077_v0  ;;  %280 = vst [vmem:[%s1529_s4 + $0x78] sm:$0xff] %v1077_v0 }
  0x18   : > { %281 = vst [vmem:[%s1530_s5] sm:$0xff] %v1077_v0  ;;  %282 = vst [vmem:[%s1530_s5 + $0x8] sm:$0xff] %v1077_v0 }
  0x19   : > { %283 = vst [vmem:[%s1530_s5 + $0x10] sm:$0xff] %v1077_v0  ;;  %284 = vst [vmem:[%s1530_s5 + $0x18] sm:$0xff] %v1077_v0 }
  0x1a   : > { %285 = vst [vmem:[%s1530_s5 + $0x20] sm:$0xff] %v1077_v0  ;;  %286 = vst [vmem:[%s1530_s5 + $0x28] sm:$0xff] %v1077_v0 }
  0x1b   : > { %287 = vst [vmem:[%s1530_s5 + $0x30] sm:$0xff] %v1077_v0  ;;  %288 = vst [vmem:[%s1530_s5 + $0x38] sm:$0xff] %v1077_v0 }
  0x1c   : > { %289 = vst [vmem:[%s1530_s5 + $0x40] sm:$0xff] %v1077_v0  ;;  %290 = vst [vmem:[%s1530_s5 + $0x48] sm:$0xff] %v1077_v0 }
  0x1d   : > { %291 = vst [vmem:[%s1530_s5 + $0x50] sm:$0xff] %v1077_v0  ;;  %292 = vst [vmem:[%s1530_s5 + $0x58] sm:$0xff] %v1077_v0 }
  0x1e   : > { %293 = vst [vmem:[%s1530_s5 + $0x60] sm:$0xff] %v1077_v0  ;;  %294 = vst [vmem:[%s1530_s5 + $0x68] sm:$0xff] %v1077_v0 }
  0x1f   : > { %295 = vst [vmem:[%s1530_s5 + $0x70] sm:$0xff] %v1077_v0  ;;  %296 = vst [vmem:[%s1530_s5 + $0x78] sm:$0xff] %v1077_v0 }
  0x20 PF: > { %v1053_v1 = vld [vmem:[%s1130_s6] sm:$0xff]   ;;  %v1055_v3 = vld [vmem:[%s1130_s6 + $0x8] sm:$0xff]   ;;  %v1057_v5 = vld [vmem:[%s1130_s6 + $0x10] sm:$0xff]   ;;  %v297_v7 = vlaneseq  ;;  %v1078_v18 = vmov 1.0|1.0  }
  0x21   : > { %v1054_v2 = vld [vmem:[%s1135_s9] sm:$0xff]   ;;  %979 = vmatprep.subr.bf16.mxu0 %v1053_v1  ;;  %v1056_v4 = vld [vmem:[%s1135_s9 + $0x8] sm:$0xff]   ;;  %v1058_v6 = vld [vmem:[%s1135_s9 + $0x10] sm:$0xff]  }
  0x22   : > { %1011 = vmatprep.subr.bf16.mxu1 %v1054_v2  ;;  %980 = vmatpush3.bf16.msra.mxu0 %v1053_v1  ;;  %v1059_v8 = vld [vmem:[%s1130_s6 + $0x18] sm:$0xff]   ;;  %v1241_v10 = vshrl.u32 %v297_v7, 7  ;;  %v1061_v11 = vld [vmem:[%s1130_s6 + $0x20] sm:$0xff]   ;;  %v1063_v14 = vld [vmem:[%s1130_s6 + $0x28] sm:$0xff]  }
  0x23   : > { %1012 = vmatpush3.bf16.msra.mxu1 %v1054_v2  ;;  %981 = vmatprep.subr.bf16.mxu0 %v1055_v3  ;;  %v1060_v9 = vld [vmem:[%s1135_s9 + $0x18] sm:$0xff]   ;;  %v1062_v12 = vld [vmem:[%s1135_s9 + $0x20] sm:$0xff]   ;;  %v1064_v17 = vld [vmem:[%s1135_s9 + $0x28] sm:$0xff]  }
  0x24   : > { %1013 = vmatprep.subr.bf16.mxu1 %v1056_v4  ;;  %v299_v13 = vadd.s32 8, %v1241_v10  ;;  %v1252_v15 = vld [vmem:[%s247_s27] ss:$0 sm:$0xff]  ;;  %v1065_v19 = vld [vmem:[%s1130_s6 + $0x30] sm:$0xff]   ;;  %v300_v21 = vadd.s32 16, %v1241_v10  ;;  %v301_v22 = vadd.s32 24, %v1241_v10 }
  0x25   : > { %v1259_v16 = vld [vmem:[%s244_s24] ss:$0 sm:$0xff]  ;;  %vm319_vm0 = vcmp.eq.s32.totalorder %v1241_v10, %v1252_v15  ;;  %v1066_v20 = vld [vmem:[%s1135_s9 + $0x30] sm:$0xff]   ;;  %v1067_v23 = vld [vmem:[%s1130_s6 + $0x38] sm:$0xff]   ;;  %v302_v25 = vadd.s32 32, %v1241_v10  ;;  %v303_v26 = vadd.s32 40, %v1241_v10 }
  0x26   : > { %982 = vmatpush3.bf16.msra.mxu0 %v1055_v3  ;;  %vm320_vm1 = vcmp.eq.s32.totalorder %v299_v13, %v1252_v15  ;;  %vm364_vm2 = vcmp.eq.s32.totalorder %v1241_v10, %v1259_v16  ;;  %vm365_vm3 = vcmp.eq.s32.totalorder %v299_v13, %v1259_v16  ;;  %v1068_v24 = vld [vmem:[%s1135_s9 + $0x38] sm:$0xff]   ;;  %vm321_vm6 = vcmp.eq.s32.totalorder %v300_v21, %v1252_v15  ;;  %v406_v37 = vld [vmem:[%s1529_s4 + $0x10] sm:$0xff]  ;;  %v404_v39 = vld [vmem:[%s1529_s4] sm:$0xff] }
  0x27   : > { %1014 = vmatpush3.bf16.msra.mxu1 %v1056_v4  ;;  %983 = vmatprep.subr.bf16.mxu0 %v1057_v5  ;;  %vm905_vm4 = vmpackc.low %vm320_vm1, %vm319_vm0  ;;  %vm322_vm7 = vcmp.eq.s32.totalorder %v301_v22, %v1252_v15  ;;  %vm366_vm8 = vcmp.eq.s32.totalorder %v300_v21, %v1259_v16  ;;  %vm367_vm9 = vcmp.eq.s32.totalorder %v301_v22, %v1259_v16  ;;  %v304_v27 = vadd.s32 48, %v1241_v10  ;;  %v615_v38 = vld [vmem:[%s1530_s5 + $0x10] sm:$0xff]  ;;  %v613_v41 = vld [vmem:[%s1530_s5] sm:$0xff] }
  0x28   : > { %1015 = vmatprep.subr.bf16.mxu1 %v1058_v6  ;;  %995 = vmatprep.mubr.msk.bf16.mxu0 %vm905_vm4, %v1078_v18  ;;  %vm929_vm5 = vmpackc.low %vm365_vm3, %vm364_vm2  ;;  %vm323_vm10 = vcmp.eq.s32.totalorder %v302_v25, %v1252_v15  ;;  %vm324_vm11 = vcmp.eq.s32.totalorder %v303_v26, %v1252_v15  ;;  %vm368_vm13 = vcmp.eq.s32.totalorder %v302_v25, %v1259_v16  ;;  %v305_v28 = vadd.s32 56, %v1241_v10  ;;  %v407_v42 = vld [vmem:[%s1529_s4 + $0x18] sm:$0xff]  ;;  %v405_v47 = vld [vmem:[%s1529_s4 + $0x8] sm:$0xff] }
  0x29   : > { %1027 = vmatprep.mubr.msk.bf16.mxu1 %vm929_vm5, %v1078_v18  ;;  %vm907_vm12 = vmpackc.low %vm322_vm7, %vm321_vm6  ;;  %vm369_vm14 = vcmp.eq.s32.totalorder %v303_v26, %v1259_v16  ;;  %v306_v29 = vadd.s32 64, %v1241_v10  ;;  %v307_v30 = vadd.s32 72, %v1241_v10  ;;  %vm325_vm2 = vcmp.eq.s32.totalorder %v304_v27, %v1252_v15  ;;  %v616_v46 = vld [vmem:[%s1530_s5 + $0x18] sm:$0xff]  ;;  %v614_v52 = vld [vmem:[%s1530_s5 + $0x8] sm:$0xff] }
  0x2a   : > { %984 = vmatpush3.bf16.msra.mxu0 %v1057_v5  ;;  %vm931_vm15 = vmpackc.low %vm367_vm9, %vm366_vm8  ;;  %vm326_vm3 = vcmp.eq.s32.totalorder %v305_v28, %v1252_v15  ;;  %vm370_vm4 = vcmp.eq.s32.totalorder %v304_v27, %v1259_v16  ;;  %vm371_vm5 = vcmp.eq.s32.totalorder %v305_v28, %v1259_v16  ;;  %v308_v31 = vadd.s32 80, %v1241_v10  ;;  %v410_v61 = vld [vmem:[%s1529_s4 + $0x30] sm:$0xff]  ;;  %v408_v63 = vld [vmem:[%s1529_s4 + $0x20] sm:$0xff] }
  0x2b   : > { %1016 = vmatpush3.bf16.msra.mxu1 %v1058_v6  ;;  %985 = vmatprep.subr.bf16.mxu0 %v1059_v8  ;;  %vm909_vm0 = vmpackc.low %vm324_vm11, %vm323_vm10  ;;  %vm327_vm6 = vcmp.eq.s32.totalorder %v306_v29, %v1252_v15  ;;  %vm328_vm7 = vcmp.eq.s32.totalorder %v307_v30, %v1252_v15  ;;  %vm372_vm9 = vcmp.eq.s32.totalorder %v306_v29, %v1259_v16  ;;  %v309_v32 = vadd.s32 88, %v1241_v10  ;;  %v619_v62 = vld [vmem:[%s1530_s5 + $0x30] sm:$0xff]  ;;  %v617_v1 = vld [vmem:[%s1530_s5 + $0x20] sm:$0xff] }
  0x2c   : > { %1017 = vmatprep.subr.bf16.mxu1 %v1060_v9  ;;  %vm933_vm1 = vmpackc.low %vm369_vm14, %vm368_vm13  ;;  %vm373_vm10 = vcmp.eq.s32.totalorder %v307_v30, %v1259_v16  ;;  %v310_v33 = vadd.s32 96, %v1241_v10  ;;  %v311_v34 = vadd.s32 104, %v1241_v10  ;;  %vm329_vm14 = vcmp.eq.s32.totalorder %v308_v31, %v1252_v15  ;;  %v411_v2 = vld [vmem:[%s1529_s4 + $0x38] sm:$0xff]  ;;  %v409_v7 = vld [vmem:[%s1529_s4 + $0x28] sm:$0xff] }
  0x2d   : > { %vm911_vm8 = vmpackc.low %vm326_vm3, %vm325_vm2  ;;  %v312_v35 = vadd.s32 112, %v1241_v10  ;;  %v313_v36 = vadd.s32 120, %v1241_v10  ;;  %v620_v6 = vld [vmem:[%s1530_s5 + $0x38] sm:$0xff]  ;;  %v414_v21 = vld [vmem:[%s1529_s4 + $0x50] sm:$0xff] }
  0x2e   : > { %986 = vmatpush3.bf16.msra.mxu0 %v1059_v8  ;;  %vm935_vm11 = vmpackc.low %vm371_vm5, %vm370_vm4  ;;  %vm331_vm2 = vcmp.eq.s32.totalorder %v310_v33, %v1252_v15  ;;  %vm332_vm3 = vcmp.eq.s32.totalorder %v311_v34, %v1252_v15  ;;  %vm376_vm5 = vcmp.eq.s32.totalorder %v310_v33, %v1259_v16  ;;  %v623_v22 = vld [vmem:[%s1530_s5 + $0x50] sm:$0xff]  ;;  %v621_v25 = vld [vmem:[%s1530_s5 + $0x40] sm:$0xff] }
  0x2f   : > { %1018 = vmatpush3.bf16.msra.mxu1 %v1060_v9  ;;  %987 = vmatprep.subr.bf16.mxu0 %v1061_v11  ;;  %vm937_vm13 = vmpackc.low %vm373_vm10, %vm372_vm9  ;;  %vm333_vm10 = vcmp.eq.s32.totalorder %v312_v35, %v1252_v15  ;;  %v415_v26 = vld [vmem:[%s1529_s4 + $0x58] sm:$0xff] }
  0x30   : > { %1019 = vmatprep.subr.bf16.mxu1 %v1062_v12  ;;  %v624_v30 = vld [vmem:[%s1530_s5 + $0x58] sm:$0xff] }
  0x32   : > { %988 = vmatpush3.bf16.msra.mxu0 %v1061_v11 }
  0x33   : > { %1020 = vmatpush3.bf16.msra.mxu1 %v1062_v12  ;;  %989 = vmatprep.subr.bf16.mxu0 %v1063_v14  ;;  %v618_v12 = vld [vmem:[%s1530_s5 + $0x28] sm:$0xff] }
  0x34   : > { %1021 = vmatprep.subr.bf16.mxu1 %v1064_v17 }
  0x36   : > { %990 = vmatpush3.bf16.msra.mxu0 %v1063_v14 }
  0x37   : > { %1022 = vmatpush3.bf16.msra.mxu1 %v1064_v17  ;;  %991 = vmatprep.subr.bf16.mxu0 %v1065_v19 }
  0x38   : > { %1023 = vmatprep.subr.bf16.mxu1 %v1066_v20 }
  0x3a   : > { %992 = vmatpush3.bf16.msra.mxu0 %v1065_v19 }
  0x3b   : > { %1024 = vmatpush3.bf16.msra.mxu1 %v1066_v20  ;;  %993 = vmatprep.subr.bf16.mxu0 %v1067_v23 }
  0x3c   : > { %1025 = vmatprep.subr.bf16.mxu1 %v1068_v24 }
  0x3e   : > { %994 = vmatpush3.bf16.msra.mxu0 %v1067_v23  ;;  %v412_v23 = vld [vmem:[%s1529_s4 + $0x40] sm:$0xff] }
  0x3f   : > { %1026 = vmatpush3.bf16.msra.mxu1 %v1068_v24 }
  0x41   : > { %996 = vmatmul.mubr.msk.bf16.vlgmr.msra.gmra.mrb[0].mxu0 %vm907_vm12, %v1078_v18  ;;  %vm913_vm12 = vmpackc.low %vm328_vm7, %vm327_vm6  ;;  %vm377_vm6 = vcmp.eq.s32.totalorder %v311_v34, %v1259_v16 }
  0x42   : > { %1028 = vmatmul.mubr.msk.bf16.vlgmr.msra.gmra.mrb[0].mxu1 %vm931_vm15, %v1078_v18  ;;  %999 = vmatprep.mubr.msk.bf16.mxu0 %vm909_vm0, %v1078_v18  ;;  %vm330_vm15 = vcmp.eq.s32.totalorder %v309_v32, %v1252_v15  ;;  %vm374_vm0 = vcmp.eq.s32.totalorder %v308_v31, %v1259_v16  ;;  %vm941_vm9 = vmpackc.low %vm377_vm6, %vm376_vm5  ;;  %v413_v31 = vld [vmem:[%s1529_s4 + $0x48] sm:$0xff] }
  0x43   : > { %1031 = vmatprep.mubr.msk.bf16.mxu1 %vm933_vm1, %v1078_v18  ;;  %vm375_vm1 = vcmp.eq.s32.totalorder %v309_v32, %v1259_v16  ;;  %vm915_vm4 = vmpackc.low %vm330_vm15, %vm329_vm14 }
  0x44   : > { %vm939_vm7 = vmpackc.low %vm375_vm1, %vm374_vm0 }
  0x49   : > { %1000 = vmatmul.mubr.msk.bf16.gmra.mrb[4].mxu0 %vm911_vm8, %v1078_v18  ;;  %vm917_vm8 = vmpackc.low %vm332_vm3, %vm331_vm2 }
  0x4a   : > { %1032 = vmatmul.mubr.msk.bf16.gmra.mrb[4].mxu1 %vm935_vm11, %v1078_v18  ;;  %1003 = vmatprep.mubr.msk.bf16.mxu0 %vm913_vm12, %v1078_v18  ;;  %vm334_vm11 = vcmp.eq.s32.totalorder %v313_v36, %v1252_v15  ;;  %vm378_vm12 = vcmp.eq.s32.totalorder %v312_v35, %v1259_v16 }
  0x4b   : > { %1035 = vmatprep.mubr.msk.bf16.mxu1 %vm937_vm13, %v1078_v18  ;;  %vm379_vm13 = vcmp.eq.s32.totalorder %v313_v36, %v1259_v16  ;;  %vm919_vm14 = vmpackc.low %vm334_vm11, %vm333_vm10  ;;  %v622_v36 = vld [vmem:[%s1530_s5 + $0x48] sm:$0xff] }
  0x4c   : > { %vm943_vm15 = vmpackc.low %vm379_vm13, %vm378_vm12 }
  0x51   : > { %1004 = vmatmul.mubr.msk.bf16.gmra.mrb[8].mxu0 %vm915_vm4, %v1078_v18 }
  0x52   : > { %1036 = vmatmul.mubr.msk.bf16.gmra.mrb[8].mxu1 %vm939_vm7, %v1078_v18  ;;  %1007 = vmatprep.mubr.msk.bf16.mxu0 %vm917_vm8, %v1078_v18 }
  0x53   : > { %1039 = vmatprep.mubr.msk.bf16.mxu1 %vm941_vm9, %v1078_v18 }
  0x59   : > { %1008 = vmatmul.mubr.msk.bf16.gmra.mrb[12].mxu0 %vm919_vm14, %v1078_v18 }
  0x5a   : > { %1040 = vmatmul.mubr.msk.bf16.gmra.mrb[12].mxu1 %vm943_vm15, %v1078_v18 }
 0x114   : > { %v997_v40 = vpop.f32.mrb[0].mxu0 }
 0x115   : > { %v583_v43 = vadd.f32 %v997_v40, %v406_v37  ;;  %v1029_v44 = vpop.f32.mrb[0].mxu1  ;;  %v518_v45 = vpop.f32.mrb[1].mxu0 }
 0x116   : > { %v792_v48 = vadd.f32 %v1029_v44, %v615_v38  ;;  %v581_v49 = vadd.f32 %v518_v45, %v404_v39  ;;  %v727_v50 = vpop.f32.mrb[1].mxu1  ;;  %v998_v51 = vpop.f32.mrb[2].mxu0  ;;  %v418_v45 = vld [vmem:[%s1529_s4 + $0x70] sm:$0xff] }
 0x117   : > { %599 = vst [vmem:[%s1529_s4 + $0x10] sm:$0xff] %v583_v43  ;;  %v790_v53 = vadd.f32 %v727_v50, %v613_v41  ;;  %v584_v54 = vadd.f32 %v998_v51, %v407_v42  ;;  %v1030_v55 = vpop.f32.mrb[2].mxu1  ;;  %v521_v56 = vpop.f32.mrb[3].mxu0  ;;  %v419_v50 = vld [vmem:[%s1529_s4 + $0x78] sm:$0xff] }
 0x118   : > { %808 = vst [vmem:[%s1530_s5 + $0x10] sm:$0xff] %v792_v48  ;;  %597 = vst [vmem:[%s1529_s4] sm:$0xff] %v581_v49  ;;  %v793_v57 = vadd.f32 %v1030_v55, %v616_v46  ;;  %v582_v58 = vadd.f32 %v521_v56, %v405_v47  ;;  %v730_v59 = vpop.f32.mrb[3].mxu1  ;;  %v627_v46 = vld [vmem:[%s1530_s5 + $0x70] sm:$0xff]  ;;  %v416_v47 = vld [vmem:[%s1529_s4 + $0x60] sm:$0xff] }
 0x119   : > { %806 = vst [vmem:[%s1530_s5] sm:$0xff] %v790_v53  ;;  %600 = vst [vmem:[%s1529_s4 + $0x18] sm:$0xff] %v584_v54  ;;  %v791_v60 = vadd.f32 %v730_v59, %v614_v52  ;;  %v625_v49 = vld [vmem:[%s1530_s5 + $0x60] sm:$0xff]  ;;  %v628_v54 = vld [vmem:[%s1530_s5 + $0x78] sm:$0xff] }
 0x11a   : > { %809 = vst [vmem:[%s1530_s5 + $0x18] sm:$0xff] %v793_v57  ;;  %598 = vst [vmem:[%s1529_s4 + $0x8] sm:$0xff] %v582_v58  ;;  %v417_v55 = vld [vmem:[%s1529_s4 + $0x68] sm:$0xff] }
 0x11b   : > { %807 = vst [vmem:[%s1530_s5 + $0x8] sm:$0xff] %v791_v60  ;;  %v626_v60 = vld [vmem:[%s1530_s5 + $0x68] sm:$0xff] }
 0x11c   : > { %v1001_v0 = vpop.f32.mrb[4].mxu0 }
 0x11d   : > { %v587_v3 = vadd.f32 %v1001_v0, %v410_v61  ;;  %v1033_v4 = vpop.f32.mrb[4].mxu1  ;;  %v534_v5 = vpop.f32.mrb[5].mxu0 }
 0x11e   : > { %v796_v8 = vadd.f32 %v1033_v4, %v619_v62  ;;  %v585_v9 = vadd.f32 %v534_v5, %v408_v63  ;;  %v743_v10 = vpop.f32.mrb[5].mxu1  ;;  %v1002_v11 = vpop.f32.mrb[6].mxu0 }
 0x11f   : > { %603 = vst [vmem:[%s1529_s4 + $0x30] sm:$0xff] %v587_v3  ;;  %v794_v13 = vadd.f32 %v743_v10, %v617_v1  ;;  %v588_v14 = vadd.f32 %v1002_v11, %v411_v2  ;;  %v1034_v15 = vpop.f32.mrb[6].mxu1  ;;  %v537_v16 = vpop.f32.mrb[7].mxu0 }
 0x120   : > { %812 = vst [vmem:[%s1530_s5 + $0x30] sm:$0xff] %v796_v8  ;;  %601 = vst [vmem:[%s1529_s4 + $0x20] sm:$0xff] %v585_v9  ;;  %v797_v17 = vadd.f32 %v1034_v15, %v620_v6  ;;  %v586_v18 = vadd.f32 %v537_v16, %v409_v7  ;;  %v746_v19 = vpop.f32.mrb[7].mxu1 }
 0x121   : > { %810 = vst [vmem:[%s1530_s5 + $0x20] sm:$0xff] %v794_v13  ;;  %604 = vst [vmem:[%s1529_s4 + $0x38] sm:$0xff] %v588_v14  ;;  %v795_v20 = vadd.f32 %v746_v19, %v618_v12 }
 0x122   : > { %813 = vst [vmem:[%s1530_s5 + $0x38] sm:$0xff] %v797_v17  ;;  %602 = vst [vmem:[%s1529_s4 + $0x28] sm:$0xff] %v586_v18 }
 0x123   : > { %811 = vst [vmem:[%s1530_s5 + $0x28] sm:$0xff] %v795_v20 }
 0x124   : > { %v1005_v24 = vpop.f32.mrb[8].mxu0 }
 0x125   : > { %v591_v27 = vadd.f32 %v1005_v24, %v414_v21  ;;  %v1037_v28 = vpop.f32.mrb[8].mxu1  ;;  %v550_v29 = vpop.f32.mrb[9].mxu0 }
 0x126   : > { %v800_v32 = vadd.f32 %v1037_v28, %v623_v22  ;;  %v589_v33 = vadd.f32 %v550_v29, %v412_v23  ;;  %v759_v34 = vpop.f32.mrb[9].mxu1  ;;  %v1006_v35 = vpop.f32.mrb[10].mxu0 }
 0x127   : > { %607 = vst [vmem:[%s1529_s4 + $0x50] sm:$0xff] %v591_v27  ;;  %v798_v37 = vadd.f32 %v759_v34, %v621_v25  ;;  %v592_v38 = vadd.f32 %v1006_v35, %v415_v26  ;;  %v1038_v39 = vpop.f32.mrb[10].mxu1  ;;  %v553_v40 = vpop.f32.mrb[11].mxu0 }
 0x128   : > { %816 = vst [vmem:[%s1530_s5 + $0x50] sm:$0xff] %v800_v32  ;;  %605 = vst [vmem:[%s1529_s4 + $0x40] sm:$0xff] %v589_v33  ;;  %v801_v41 = vadd.f32 %v1038_v39, %v624_v30  ;;  %v590_v42 = vadd.f32 %v553_v40, %v413_v31  ;;  %v762_v43 = vpop.f32.mrb[11].mxu1 }
 0x129   : > { %814 = vst [vmem:[%s1530_s5 + $0x40] sm:$0xff] %v798_v37  ;;  %608 = vst [vmem:[%s1529_s4 + $0x58] sm:$0xff] %v592_v38  ;;  %v799_v44 = vadd.f32 %v762_v43, %v622_v36 }
 0x12a   : > { %817 = vst [vmem:[%s1530_s5 + $0x58] sm:$0xff] %v801_v41  ;;  %606 = vst [vmem:[%s1529_s4 + $0x48] sm:$0xff] %v590_v42 }
 0x12b   : > { %815 = vst [vmem:[%s1530_s5 + $0x48] sm:$0xff] %v799_v44 }
 0x12c   : > { %v1009_v48 = vpop.f32.mrb[12].mxu0 }
 0x12d   : > { %v595_v51 = vadd.f32 %v1009_v48, %v418_v45  ;;  %v1041_v52 = vpop.f32.mrb[12].mxu1  ;;  %v566_v53 = vpop.f32.mrb[13].mxu0 }
 0x12e   : > { %v804_v56 = vadd.f32 %v1041_v52, %v627_v46  ;;  %v593_v57 = vadd.f32 %v566_v53, %v416_v47  ;;  %v775_v58 = vpop.f32.mrb[13].mxu1  ;;  %v1010_v59 = vpop.f32.mrb[14].mxu0 }
 0x12f   : > { %611 = vst [vmem:[%s1529_s4 + $0x70] sm:$0xff] %v595_v51  ;;  %v802_v61 = vadd.f32 %v775_v58, %v625_v49  ;;  %v596_v62 = vadd.f32 %v1010_v59, %v419_v50  ;;  %v1042_v63 = vpop.f32.mrb[14].mxu1  ;;  %v569_v0 = vpop.f32.mrb[15].mxu0 }
 0x130   : > { %820 = vst [vmem:[%s1530_s5 + $0x70] sm:$0xff] %v804_v56  ;;  %609 = vst [vmem:[%s1529_s4 + $0x60] sm:$0xff] %v593_v57  ;;  %v805_v1 = vadd.f32 %v1042_v63, %v628_v54  ;;  %v594_v2 = vadd.f32 %v569_v0, %v417_v55  ;;  %v778_v3 = vpop.f32.mrb[15].mxu1 }
 0x131   : > { %818 = vst [vmem:[%s1530_s5 + $0x60] sm:$0xff] %v802_v61  ;;  %612 = vst [vmem:[%s1529_s4 + $0x78] sm:$0xff] %v596_v62  ;;  %v803_v4 = vadd.f32 %v778_v3, %v626_v60 }
 0x132   : > { %821 = vst [vmem:[%s1530_s5 + $0x78] sm:$0xff] %v805_v1  ;;  %610 = vst [vmem:[%s1529_s4 + $0x68] sm:$0xff] %v594_v2 }
 0x133   : > { %819 = vst [vmem:[%s1530_s5 + $0x68] sm:$0xff] %v803_v4 }
 0x134 PF: > { %s16_s18 = sadd.s32 1, %s1075_s18  }
 0x135   : > { %p13_p6 = scmp.ge.s32.totalorder %s16_s18, 4  }
 0x137   :  { %15 = sbr.rel (!%p13_p6) target bundleno = 1 (0x1), region = 83 }

// kernel: edge_block_forward.3
= control target key start
LH: loop header
LB: loop body
LE: loop exit
PB: predicated region body
PF: predicated region fallthrough
CT: control target
= control target key end

     0   :  { %s4541_s27 = smov 0   ;;  %s6148_s0 = inlined_call_operand.vmem [shape: bf16[256,128], index: 0, kind: input, shape index: {}]   ;;  %s6149_s1 = inlined_call_operand.vmem [shape: bf16[256,128], index: 1, kind: input, shape index: {}]   ;;  %s6150_s2 = inlined_call_operand.vmem [shape: bf16[256,128], index: 2, kind: input, shape index: {}]   ;;  %s6151_s3 = inlined_call_operand.vmem [shape: bf16[256,256], index: 3, kind: input, shape index: {}]   ;;  %s6152_s4 = inlined_call_operand.vmem [shape: bf16[256,256], index: 4, kind: input, shape index: {}]   ;;  %s6153_s5 = inlined_call_operand.vmem [shape: f32[1,256], index: 5, kind: input, shape index: {}]   ;;  %s6154_s6 = inlined_call_operand.vmem [shape: f32[1,256], index: 6, kind: input, shape index: {}]   ;;  %s6155_s7 = inlined_call_operand.vmem [shape: f32[1,256], index: 7, kind: input, shape index: {}]   ;;  %s6156_s8 = inlined_call_operand.vmem [shape: bf16[256,128], index: 8, kind: input, shape index: {}]   ;;  %s6157_s9 = inlined_call_operand.vmem [shape: f32[1,128], index: 9, kind: input, shape index: {}]   ;;  %s6158_s10 = inlined_call_operand.vmem [shape: bf16[256,256], index: 10, kind: input, shape index: {}]   ;;  %s6159_s11 = inlined_call_operand.vmem [shape: bf16[256,256], index: 11, kind: input, shape index: {}]   ;;  %s6160_s12 = inlined_call_operand.vmem [shape: f32[1,256], index: 12, kind: input, shape index: {}]   ;;  %s6161_s13 = inlined_call_operand.vmem [shape: f32[1,256], index: 13, kind: input, shape index: {}]   ;;  %s6162_s14 = inlined_call_operand.vmem [shape: f32[1,256], index: 14, kind: input, shape index: {}]   ;;  %s6163_s15 = inlined_call_operand.vmem [shape: bf16[256,128], index: 15, kind: input, shape index: {}]   ;;  %s6164_s16 = inlined_call_operand.vmem [shape: f32[1,128], index: 16, kind: input, shape index: {}]   ;;  %s6165_s17 = inlined_call_operand.vmem [shape: bf16[256,128], index: 17, kind: output, shape index: {0}]   ;;  %s6166_s18 = inlined_call_operand.vmem [shape: bf16[256,128], index: 18, kind: output, shape index: {1}]  }
   0x1   :  { %6192 = sst [smem:[#allocation25_spill]] %s6148_s0 }
   0x2   :  { %6193 = sst [smem:[#allocation26_spill]] %s6149_s1 }
   0x3   :  { %6194 = sst [smem:[#allocation27_spill]] %s6150_s2 }
   0x4 LB: > { %s3629_s28 = sadd.s32 4294967295, %s4444_s27   ;;  %p3633_p0 = scmp.ge.s32.totalorder %s4444_s27, 1  ;;  %s4444_s27 = sphi %s4541_s27, %s29_s27  }
   0x5   : > { %p538_p1 = scmp.lt.s32.totalorder %s4444_s27, 3 }
   0x7   : > { %p539_p2 = pnand %p3633_p0, %p538_p1 }
   0x9   : > { %542 = sbr.rel (%p539_p2) target bundleno = 1717 (0x6b5), region = 88 }
  0x10   : > { %v4126_v0 = vld [vmem:[%s6151_s3 + $0x4] ss:$8 sps:$4 sm:$0xff]   ;;  %v4128_v1 = vld [vmem:[%s6151_s3] ss:$8 sps:$4 sm:$0xff]   ;;  %v4129_v2 = vld [vmem:[%s6151_s3 + $0x14] ss:$8 sps:$4 sm:$0xff]  }
  0x11   : > { %1090 = vmatprep.subr.bf16.mxu0 %v4126_v0  ;;  %v4131_v3 = vld [vmem:[%s6151_s3 + $0x10] ss:$8 sps:$4 sm:$0xff]   ;;  %v4132_v4 = vld [vmem:[%s6151_s3 + $0x24] ss:$8 sps:$4 sm:$0xff]   ;;  %s3634_s24 = sshll.u32 %s3629_s28, 4  ;;  %s6195_s0 = sld [smem:[#allocation26_spill]] }
  0x12   : > { %1091 = vmatpush1.bf16.msra.mxu0 %v4128_v1  ;;  %v4134_v5 = vld [vmem:[%s6151_s3 + $0x20] ss:$8 sps:$4 sm:$0xff]   ;;  %v4135_v6 = vld [vmem:[%s6151_s3 + $0x34] ss:$8 sps:$4 sm:$0xff]   ;;  %p608_p3 = scmp.lt.s32.totalorder %s3634_s24, 31  ;;  %s6196_s21 = sld [smem:[#allocation25_spill]] }
  0x13   : > { %1092 = vmatprep.subr.bf16.mxu0 %v4129_v2  ;;  %v4137_v7 = vld [vmem:[%s6151_s3 + $0x30] ss:$8 sps:$4 sm:$0xff]   ;;  %v4138_v8 = vld [vmem:[%s6151_s3 + $0x44] ss:$8 sps:$4 sm:$0xff]   ;;  %v4140_v9 = vld [vmem:[%s6151_s3 + $0x40] ss:$8 sps:$4 sm:$0xff]  }
  0x14   : > { %s6261_s24 = smov (!%p608_p3, %s3634_s24), 31  ;;  %v4141_v10 = vld [vmem:[%s6151_s3 + $0x54] ss:$8 sps:$4 sm:$0xff]   ;;  %v4143_v11 = vld [vmem:[%s6151_s3 + $0x50] ss:$8 sps:$4 sm:$0xff]   ;;  %s6199_s30 = sld [smem:[#allocation27_spill]] }
  0x15   : > { %s4582_s23 = sshll.u32 %s6261_s24, 2  ;;  %v4144_v12 = vld [vmem:[%s6151_s3 + $0x64] ss:$8 sps:$4 sm:$0xff]   ;;  %v4146_v14 = vld [vmem:[%s6151_s3 + $0x60] ss:$8 sps:$4 sm:$0xff]  }
  0x16   : > { %1093 = vmatpush1.bf16.msra.mxu0 %v4131_v3  ;;  %v4147_v15 = vld [vmem:[%s6151_s3 + $0x74] ss:$8 sps:$4 sm:$0xff]   ;;  %v4149_v16 = vld [vmem:[%s6151_s3 + $0x70] ss:$8 sps:$4 sm:$0xff]   ;;  %v4150_v17 = vld [vmem:[%s6151_s3 + $0x84] ss:$8 sps:$4 sm:$0xff]   ;;  %s5627_s1 = scalar_lea.vmem %s6165_s17, %s4582_s23 }
  0x17   : > { %1094 = vmatprep.subr.bf16.mxu0 %v4132_v4  ;;  %s4591_s19 = scalar_lea.vmem %s6195_s0, %s4582_s23  ;;  %v4152_v18 = vld [vmem:[%s6151_s3 + $0x80] ss:$8 sps:$4 sm:$0xff]   ;;  %v4153_v19 = vld [vmem:[%s6151_s3 + $0x94] ss:$8 sps:$4 sm:$0xff]   ;;  %v4155_v20 = vld [vmem:[%s6151_s3 + $0x90] ss:$8 sps:$4 sm:$0xff]  }
  0x18   : > { %s4600_s22 = scalar_lea.vmem %s6196_s21, %s4582_s23  ;;  %v4174_v13 = vld [vmem:[%s4591_s19] sm:$0xff]   ;;  %v4193_v25 = vld [vmem:[%s6152_s4 + $0x14] ss:$8 sps:$4 sm:$0xff]   ;;  %v4195_v27 = vld [vmem:[%s6152_s4 + $0x10] ss:$8 sps:$4 sm:$0xff]   ;;  %s6121_s21 = scalar_lea.vmem %s6166_s18, %s4582_s23 }
  0x19   : > { %1122 = vmatprep.mubr.bf16.mxu0 %v4174_v13  ;;  %v4156_v21 = vld [vmem:[%s6151_s3 + $0xa4] ss:$8 sps:$4 sm:$0xff]   ;;  %v4192_v23 = vld [vmem:[%s6152_s4] ss:$8 sps:$4 sm:$0xff]   ;;  %v4159_v26 = vld [vmem:[%s6151_s3 + $0xb4] ss:$8 sps:$4 sm:$0xff]  }
  0x1a   : > { %1095 = vmatpush1.bf16.msra.mxu0 %v4134_v5  ;;  %v4190_v22 = vld [vmem:[%s6152_s4 + $0x4] ss:$8 sps:$4 sm:$0xff]   ;;  %v4158_v24 = vld [vmem:[%s6151_s3 + $0xa0] ss:$8 sps:$4 sm:$0xff]   ;;  %v4161_v29 = vld [vmem:[%s6151_s3 + $0xb0] ss:$8 sps:$4 sm:$0xff]   ;;  %s4988_s0 = scalar_lea.vmem %s6199_s30, %s4582_s23 }
  0x1b   : > { %1096 = vmatprep.subr.bf16.mxu0 %v4135_v6  ;;  %1390 = vmatprep.subr.bf16.mxu1 %v4190_v22  ;;  %v4196_v28 = vld [vmem:[%s6152_s4 + $0x24] ss:$8 sps:$4 sm:$0xff]   ;;  %v4198_v31 = vld [vmem:[%s6152_s4 + $0x20] ss:$8 sps:$4 sm:$0xff]   ;;  %v4199_v32 = vld [vmem:[%s6152_s4 + $0x34] ss:$8 sps:$4 sm:$0xff]  }
  0x1c   : > { %1391 = vmatpush1.bf16.msra.mxu1 %v4192_v23  ;;  %v4162_v30 = vld [vmem:[%s6151_s3 + $0xc4] ss:$8 sps:$4 sm:$0xff]   ;;  %v4164_v33 = vld [vmem:[%s6151_s3 + $0xc0] ss:$8 sps:$4 sm:$0xff]   ;;  %v4165_v34 = vld [vmem:[%s6151_s3 + $0xd4] ss:$8 sps:$4 sm:$0xff]  }
  0x1d   : > { %1392 = vmatprep.subr.bf16.mxu1 %v4193_v25  ;;  %v4201_v35 = vld [vmem:[%s6152_s4 + $0x30] ss:$8 sps:$4 sm:$0xff]   ;;  %v4202_v36 = vld [vmem:[%s6152_s4 + $0x44] ss:$8 sps:$4 sm:$0xff]   ;;  %v4204_v39 = vld [vmem:[%s6152_s4 + $0x40] ss:$8 sps:$4 sm:$0xff]  }
  0x1e   : > { %1097 = vmatpush1.bf16.msra.mxu0 %v4137_v7  ;;  %v4167_v37 = vld [vmem:[%s6151_s3 + $0xd0] ss:$8 sps:$4 sm:$0xff]   ;;  %v4168_v38 = vld [vmem:[%s6151_s3 + $0xe4] ss:$8 sps:$4 sm:$0xff]   ;;  %v4170_v40 = vld [vmem:[%s6151_s3 + $0xe0] ss:$8 sps:$4 sm:$0xff]  }
  0x1f   : > { %1098 = vmatprep.subr.bf16.mxu0 %v4138_v8  ;;  %v4205_v41 = vld [vmem:[%s6152_s4 + $0x54] ss:$8 sps:$4 sm:$0xff]   ;;  %v4207_v43 = vld [vmem:[%s6152_s4 + $0x50] ss:$8 sps:$4 sm:$0xff]   ;;  %v4208_v44 = vld [vmem:[%s6152_s4 + $0x64] ss:$8 sps:$4 sm:$0xff]  }
  0x20   : > { %1393 = vmatpush1.bf16.msra.mxu1 %v4195_v27  ;;  %v4171_v42 = vld [vmem:[%s6151_s3 + $0xf4] ss:$8 sps:$4 sm:$0xff]   ;;  %v4173_v45 = vld [vmem:[%s6151_s3 + $0xf0] ss:$8 sps:$4 sm:$0xff]   ;;  %v4210_v46 = vld [vmem:[%s6152_s4 + $0x60] ss:$8 sps:$4 sm:$0xff]  }
  0x21   : > { %1394 = vmatprep.subr.bf16.mxu1 %v4196_v28  ;;  %v4703_v47 = vld [vmem:[%s4600_s22] sm:$0xff]   ;;  %v4211_v48 = vld [vmem:[%s6152_s4 + $0x74] ss:$8 sps:$4 sm:$0xff]   ;;  %v4176_v49 = vld [vmem:[%s4591_s19 + $0x8] sm:$0xff]  }
  0x22   : > { %1099 = vmatpush1.bf16.msra.mxu0 %v4140_v9  ;;  %v4213_v50 = vld [vmem:[%s6152_s4 + $0x70] ss:$8 sps:$4 sm:$0xff]   ;;  %v4214_v51 = vld [vmem:[%s6152_s4 + $0x84] ss:$8 sps:$4 sm:$0xff]   ;;  %v4216_v52 = vld [vmem:[%s6152_s4 + $0x80] ss:$8 sps:$4 sm:$0xff]  }
  0x23   : > { %1100 = vmatprep.subr.bf16.mxu0 %v4141_v10  ;;  %v4720_v53 = vld [vmem:[%s4600_s22 + $0x8] sm:$0xff]   ;;  %v4217_v54 = vld [vmem:[%s6152_s4 + $0x94] ss:$8 sps:$4 sm:$0xff]   ;;  %v4219_v56 = vld [vmem:[%s6152_s4 + $0x90] ss:$8 sps:$4 sm:$0xff]  }
  0x24   : > { %1395 = vmatpush1.bf16.msra.mxu1 %v4198_v31  ;;  %v4178_v55 = vld [vmem:[%s4591_s19 + $0x10] sm:$0xff]   ;;  %v4220_v57 = vld [vmem:[%s6152_s4 + $0xa4] ss:$8 sps:$4 sm:$0xff]   ;;  %v4222_v58 = vld [vmem:[%s6152_s4 + $0xa0] ss:$8 sps:$4 sm:$0xff]  }
  0x25   : > { %1396 = vmatprep.subr.bf16.mxu1 %v4199_v32  ;;  %v4737_v59 = vld [vmem:[%s4600_s22 + $0x10] sm:$0xff]   ;;  %v4180_v61 = vld [vmem:[%s4591_s19 + $0x18] sm:$0xff]   ;;  %v4226_v63 = vld [vmem:[%s6152_s4 + $0xc4] ss:$8 sps:$4 sm:$0xff]  }
  0x26   : > { %1101 = vmatpush1.bf16.msra.mxu0 %v4143_v11  ;;  %v4223_v60 = vld [vmem:[%s6152_s4 + $0xb4] ss:$8 sps:$4 sm:$0xff]   ;;  %v4225_v62 = vld [vmem:[%s6152_s4 + $0xb0] ss:$8 sps:$4 sm:$0xff]   ;;  %v4228_v0 = vld [vmem:[%s6152_s4 + $0xc0] ss:$8 sps:$4 sm:$0xff]  }
  0x27   : > { %1102 = vmatprep.subr.bf16.mxu0 %v4144_v12  ;;  %v4754_v1 = vld [vmem:[%s4600_s22 + $0x18] sm:$0xff]   ;;  %v4182_v3 = vld [vmem:[%s4591_s19 + $0x20] sm:$0xff]   ;;  %v4184_v7 = vld [vmem:[%s4591_s19 + $0x28] sm:$0xff]  }
  0x28   : > { %1397 = vmatpush1.bf16.msra.mxu1 %v4201_v35  ;;  %v4229_v2 = vld [vmem:[%s6152_s4 + $0xd4] ss:$8 sps:$4 sm:$0xff]   ;;  %v4231_v4 = vld [vmem:[%s6152_s4 + $0xd0] ss:$8 sps:$4 sm:$0xff]   ;;  %v4232_v5 = vld [vmem:[%s6152_s4 + $0xe4] ss:$8 sps:$4 sm:$0xff]  }
  0x29   : > { %1398 = vmatprep.subr.bf16.mxu1 %v4202_v36  ;;  %v4768_v6 = vld [vmem:[%s4600_s22 + $0x20] sm:$0xff]   ;;  %v4773_v8 = vld [vmem:[%s4600_s22 + $0x28] sm:$0xff]   ;;  %v4186_v9 = vld [vmem:[%s4591_s19 + $0x30] sm:$0xff]  }
  0x2a   : > { %1103 = vmatpush1.bf16.msra.mxu0 %v4146_v14  ;;  %v4778_v10 = vld [vmem:[%s4600_s22 + $0x30] sm:$0xff]   ;;  %v4188_v11 = vld [vmem:[%s4591_s19 + $0x38] sm:$0xff]   ;;  %v4234_v13 = vld [vmem:[%s6152_s4 + $0xe0] ss:$8 sps:$4 sm:$0xff]  }
  0x2b   : > { %1104 = vmatprep.subr.bf16.mxu0 %v4147_v15  ;;  %v4783_v12 = vld [vmem:[%s4600_s22 + $0x38] sm:$0xff]  }
  0x2c   : > { %1399 = vmatpush1.bf16.msra.mxu1 %v4204_v39  ;;  %v4235_v14 = vld [vmem:[%s6152_s4 + $0xf4] ss:$8 sps:$4 sm:$0xff]   ;;  %v4237_v15 = vld [vmem:[%s6152_s4 + $0xf0] ss:$8 sps:$4 sm:$0xff]  }
  0x2d   : > { %1400 = vmatprep.subr.bf16.mxu1 %v4205_v41 }
  0x2e   : > { %1105 = vmatpush1.bf16.msra.mxu0 %v4149_v16 }
  0x2f   : > { %1106 = vmatprep.subr.bf16.mxu0 %v4150_v17 }
  0x30   : > { %1401 = vmatpush1.bf16.msra.mxu1 %v4207_v43 }
  0x31   : > { %1402 = vmatprep.subr.bf16.mxu1 %v4208_v44 }
  0x32   : > { %1107 = vmatpush1.bf16.msra.mxu0 %v4152_v18 }
  0x33   : > { %1108 = vmatprep.subr.bf16.mxu0 %v4153_v19 }
  0x34   : > { %1403 = vmatpush1.bf16.msra.mxu1 %v4210_v46 }
  0x35   : > { %1404 = vmatprep.subr.bf16.mxu1 %v4211_v48 }
  0x36   : > { %1109 = vmatpush1.bf16.msra.mxu0 %v4155_v20 }
  0x37   : > { %1110 = vmatprep.subr.bf16.mxu0 %v4156_v21 }
  0x38   : > { %1405 = vmatpush1.bf16.msra.mxu1 %v4213_v50 }
  0x39   : > { %1406 = vmatprep.subr.bf16.mxu1 %v4214_v51 }
  0x3a   : > { %1111 = vmatpush1.bf16.msra.mxu0 %v4158_v24 }
  0x3b   : > { %1112 = vmatprep.subr.bf16.mxu0 %v4159_v26 }
  0x3c   : > { %1407 = vmatpush1.bf16.msra.mxu1 %v4216_v52 }
  0x3d   : > { %1408 = vmatprep.subr.bf16.mxu1 %v4217_v54 }
  0x3e   : > { %1113 = vmatpush1.bf16.msra.mxu0 %v4161_v29 }
  0x3f   : > { %1114 = vmatprep.subr.bf16.mxu0 %v4162_v30 }
  0x40   : > { %1409 = vmatpush1.bf16.msra.mxu1 %v4219_v56 }
  0x41   : > { %1410 = vmatprep.subr.bf16.mxu1 %v4220_v57 }
  0x42   : > { %1115 = vmatpush1.bf16.msra.mxu0 %v4164_v33 }
  0x43   : > { %1116 = vmatprep.subr.bf16.mxu0 %v4165_v34 }
  0x44   : > { %1411 = vmatpush1.bf16.msra.mxu1 %v4222_v58 }
  0x45   : > { %1412 = vmatprep.subr.bf16.mxu1 %v4223_v60 }
  0x46   : > { %1117 = vmatpush1.bf16.msra.mxu0 %v4167_v37 }
  0x47   : > { %1118 = vmatprep.subr.bf16.mxu0 %v4168_v38 }
  0x48   : > { %1413 = vmatpush1.bf16.msra.mxu1 %v4225_v62 }
  0x49   : > { %1414 = vmatprep.subr.bf16.mxu1 %v4226_v63 }
  0x4a   : > { %1119 = vmatpush1.bf16.msra.mxu0 %v4170_v40 }
  0x4b   : > { %1120 = vmatprep.subr.bf16.mxu0 %v4171_v42 }
  0x4c   : > { %1415 = vmatpush1.bf16.msra.mxu1 %v4228_v0 }
  0x4d   : > { %1416 = vmatprep.subr.bf16.mxu1 %v4229_v2 }
  0x4e   : > { %1121 = vmatpush1.bf16.msra.mxu0 %v4173_v45 }
  0x50   : > { %1417 = vmatpush1.bf16.msra.mxu1 %v4231_v4  ;;  %v4238_v4 = vld [vmem:[%s6158_s10] ss:$8 sps:$4 sm:$0xff]  }
  0x51   : > { %1123 = vmatmul.mubr.bf16.vlgmr.msra.gmra.mrb[0].mxu0 %v4703_v47  ;;  %1418 = vmatprep.subr.bf16.mxu1 %v4232_v5  ;;  %v4240_v5 = vld [vmem:[%s6158_s10 + $0x4] ss:$8 sps:$4 sm:$0xff]  }
  0x52   : > { %1132 = vmatprep.mubr.bf16.mxu0 %v4176_v49 }
  0x54   : > { %1419 = vmatpush1.bf16.msra.mxu1 %v4234_v13  ;;  %v4244_v13 = vld [vmem:[%s6158_s10 + $0x20] ss:$8 sps:$4 sm:$0xff]  }
  0x55   : > { %1420 = vmatprep.subr.bf16.mxu1 %v4235_v14  ;;  %v4249_v14 = vld [vmem:[%s6158_s10 + $0x34] ss:$8 sps:$4 sm:$0xff]  }
  0x58   : > { %1421 = vmatpush1.bf16.msra.mxu1 %v4237_v15  ;;  %v4247_v15 = vld [vmem:[%s6158_s10 + $0x30] ss:$8 sps:$4 sm:$0xff]  }
  0x59   : > { %1133 = vmatmul.mubr.bf16.gmra.mrb[4].mxu0 %v4720_v53  ;;  %2433 = vmatprep.subr.bf16.mxu1 %v4240_v5 }
  0x5a   : > { %1142 = vmatprep.mubr.bf16.mxu0 %v4178_v55 }
  0x61   : > { %1143 = vmatmul.mubr.bf16.gmra.mrb[8].mxu0 %v4737_v59 }
  0x62   : > { %1152 = vmatprep.mubr.bf16.mxu0 %v4180_v61 }
  0x69   : > { %1153 = vmatmul.mubr.bf16.gmra.mrb[12].mxu0 %v4754_v1 }
  0x6a   : > { %1162 = vmatprep.mubr.bf16.mxu0 %v4182_v3 }
  0x71   : > { %1163 = vmatmul.mubr.bf16.gmra.mrb[16].mxu0 %v4768_v6 }
  0x72   : > { %1172 = vmatprep.mubr.bf16.mxu0 %v4184_v7  ;;  %v4243_v7 = vld [vmem:[%s6158_s10 + $0x14] ss:$8 sps:$4 sm:$0xff]  }
  0x79   : > { %1173 = vmatmul.mubr.bf16.gmra.mrb[20].mxu0 %v4773_v8 }
  0x7a   : > { %1182 = vmatprep.mubr.bf16.mxu0 %v4186_v9  ;;  %v4241_v9 = vld [vmem:[%s6158_s10 + $0x10] ss:$8 sps:$4 sm:$0xff]  }
  0x81   : > { %1183 = vmatmul.mubr.bf16.gmra.mrb[24].mxu0 %v4778_v10 }
  0x82   : > { %1192 = vmatprep.mubr.bf16.mxu0 %v4188_v11  ;;  %v4246_v11 = vld [vmem:[%s6158_s10 + $0x24] ss:$8 sps:$4 sm:$0xff]  }
  0x89   : > { %1193 = vmatmul.mubr.bf16.gmra.mrb[28].mxu0 %v4783_v12 }
 0x124   : > { %v1124_v16 = vpop.f32.mrb[0].mxu0 }
 0x125   : > { %v1126_v17 = vpop.f32.mrb[1].mxu0 }
 0x126   : > { %v1128_v18 = vpop.f32.mrb[2].mxu0 }
 0x127   : > { %v1203_v19 = vpack.c.bf16 %v1128_v18, %v1124_v16  ;;  %v1130_v20 = vpop.f32.mrb[3].mxu0  ;;  %v4252_v16 = vld [vmem:[%s6158_s10 + $0x44] ss:$8 sps:$4 sm:$0xff]   ;;  %v4255_v18 = vld [vmem:[%s6158_s10 + $0x54] ss:$8 sps:$4 sm:$0xff]  }
 0x128   : > { %v1204_v21 = vpack.c.bf16 %v1130_v20, %v1126_v17  ;;  %v4250_v17 = vld [vmem:[%s6158_s10 + $0x40] ss:$8 sps:$4 sm:$0xff]   ;;  %v4258_v20 = vld [vmem:[%s6158_s10 + $0x64] ss:$8 sps:$4 sm:$0xff]  }
 0x12a   : > { %1422 = vmatprep.mubr.bf16.mxu1 %v1204_v21  ;;  %v4256_v21 = vld [vmem:[%s6158_s10 + $0x60] ss:$8 sps:$4 sm:$0xff]  }
 0x12b   : > { %1423 = vmatmul.mubr.bf16.vlgmr.msra.gmra.mrb[0].mxu1 %v1203_v19  ;;  %v4253_v19 = vld [vmem:[%s6158_s10 + $0x50] ss:$8 sps:$4 sm:$0xff]  }
 0x12c   : > { %v1134_v22 = vpop.f32.mrb[4].mxu0  ;;  %2434 = vmatpush1.bf16.msra.mxu1 %v4238_v4 }
 0x12d   : > { %v1136_v23 = vpop.f32.mrb[5].mxu0  ;;  %2435 = vmatprep.subr.bf16.mxu1 %v4243_v7  ;;  %v4273_v7 = vld [vmem:[%s6158_s10 + $0xb4] ss:$8 sps:$4 sm:$0xff]  }
 0x12e   : > { %v1138_v24 = vpop.f32.mrb[6].mxu0 }
 0x12f   : > { %v1205_v25 = vpack.c.bf16 %v1138_v24, %v1134_v22  ;;  %v1140_v26 = vpop.f32.mrb[7].mxu0  ;;  %v4261_v22 = vld [vmem:[%s6158_s10 + $0x74] ss:$8 sps:$4 sm:$0xff]   ;;  %v4264_v24 = vld [vmem:[%s6158_s10 + $0x84] ss:$8 sps:$4 sm:$0xff]  }
 0x130   : > { %v1206_v27 = vpack.c.bf16 %v1140_v26, %v1136_v23  ;;  %2436 = vmatpush1.bf16.msra.mxu1 %v4241_v9  ;;  %v4259_v23 = vld [vmem:[%s6158_s10 + $0x70] ss:$8 sps:$4 sm:$0xff]   ;;  %v4267_v26 = vld [vmem:[%s6158_s10 + $0x94] ss:$8 sps:$4 sm:$0xff]  }
 0x131   : > { %2437 = vmatprep.subr.bf16.mxu1 %v4246_v11  ;;  %v4271_v11 = vld [vmem:[%s6158_s10 + $0xb0] ss:$8 sps:$4 sm:$0xff]  }
 0x132   : > { %1432 = vmatprep.mubr.bf16.mxu1 %v1206_v27  ;;  %v4265_v27 = vld [vmem:[%s6158_s10 + $0x90] ss:$8 sps:$4 sm:$0xff]  }
 0x133   : > { %1433 = vmatmul.mubr.bf16.gmra.mrb[4].mxu1 %v1205_v25  ;;  %v4262_v25 = vld [vmem:[%s6158_s10 + $0x80] ss:$8 sps:$4 sm:$0xff]  }
 0x134   : > { %v1144_v28 = vpop.f32.mrb[8].mxu0  ;;  %2438 = vmatpush1.bf16.msra.mxu1 %v4244_v13 }
 0x135   : > { %v1146_v29 = vpop.f32.mrb[9].mxu0  ;;  %2439 = vmatprep.subr.bf16.mxu1 %v4249_v14 }
 0x136   : > { %v1148_v30 = vpop.f32.mrb[10].mxu0 }
 0x137   : > { %v1207_v31 = vpack.c.bf16 %v1148_v30, %v1144_v28  ;;  %v1150_v32 = vpop.f32.mrb[11].mxu0  ;;  %v4270_v28 = vld [vmem:[%s6158_s10 + $0xa4] ss:$8 sps:$4 sm:$0xff]   ;;  %v1220_v30 = vlaneseq }
 0x138   : > { %v1208_v33 = vpack.c.bf16 %v1150_v32, %v1146_v29  ;;  %2440 = vmatpush1.bf16.msra.mxu1 %v4247_v15  ;;  %v4268_v29 = vld [vmem:[%s6158_s10 + $0xa0] ss:$8 sps:$4 sm:$0xff]  }
 0x139   : > { %2441 = vmatprep.subr.bf16.mxu1 %v4252_v16  ;;  %v4276_v16 = vld [vmem:[%s6158_s10 + $0xc4] ss:$8 sps:$4 sm:$0xff]  }
 0x13a   : > { %1442 = vmatprep.mubr.bf16.mxu1 %v1208_v33  ;;  %v894_v33 = vld [vmem:[%s6153_s5] sm:$0x3] }
 0x13b   : > { %1443 = vmatmul.mubr.bf16.gmra.mrb[8].mxu1 %v1207_v31  ;;  %v1221_v31 = vshrl.u32 %v1220_v30, 7  ;;  %v4282_v30 = vld [vmem:[%s6158_s10 + $0xe4] ss:$8 sps:$4 sm:$0xff]  }
 0x13c   : > { %v1154_v34 = vpop.f32.mrb[12].mxu0  ;;  %2442 = vmatpush1.bf16.msra.mxu1 %v4250_v17 }
 0x13d   : > { %v1156_v35 = vpop.f32.mrb[13].mxu0  ;;  %2443 = vmatprep.subr.bf16.mxu1 %v4255_v18  ;;  %v4861_v32 = vsub.s32 0, %v1221_v31 }
 0x13e   : > { %v1158_v36 = vpop.f32.mrb[14].mxu0 }
 0x13f   : > { %v1209_v37 = vpack.c.bf16 %v1158_v36, %v1154_v34  ;;  %v1160_v38 = vpop.f32.mrb[15].mxu0  ;;  %6197 = vst [vmem:[#allocation2_spill] sm:$0xff] %v4861_v32  ;;  %v4866_v34 = vsub.s32 1, %v1221_v31 }
 0x140   : > { %v1210_v39 = vpack.c.bf16 %v1160_v38, %v1156_v35  ;;  %2444 = vmatpush1.bf16.msra.mxu1 %v4253_v19  ;;  %v4869_v35 = vrot.slane %v894_v33, %v4861_v32  ;;  %v4274_v19 = vld [vmem:[%s6158_s10 + $0xc0] ss:$8 sps:$4 sm:$0xff]  }
 0x141   : > { %2445 = vmatprep.subr.bf16.mxu1 %v4258_v20  ;;  %6198 = vst [vmem:[#allocation3_spill] sm:$0xff] %v4866_v34  ;;  %v4872_v36 = vrot.slane %v894_v33, %v4866_v34 }
 0x142   : > { %1452 = vmatprep.mubr.bf16.mxu1 %v1210_v39 }
 0x143   : > { %1453 = vmatmul.mubr.bf16.gmra.mrb[12].mxu1 %v1209_v37 }
 0x144   : > { %v1164_v40 = vpop.f32.mrb[16].mxu0  ;;  %2446 = vmatpush1.bf16.msra.mxu1 %v4256_v21 }
 0x145   : > { %v1166_v41 = vpop.f32.mrb[17].mxu0  ;;  %2447 = vmatprep.subr.bf16.mxu1 %v4261_v22 }
 0x146   : > { %v1168_v42 = vpop.f32.mrb[18].mxu0 }
 0x147   : > { %v1211_v43 = vpack.c.bf16 %v1168_v42, %v1164_v40  ;;  %v1170_v44 = vpop.f32.mrb[19].mxu0 }
 0x148   : > { %v1212_v45 = vpack.c.bf16 %v1170_v44, %v1166_v41  ;;  %2448 = vmatpush1.bf16.msra.mxu1 %v4259_v23 }
 0x149   : > { %2449 = vmatprep.subr.bf16.mxu1 %v4264_v24  ;;  %v4279_v24 = vld [vmem:[%s6158_s10 + $0xd4] ss:$8 sps:$4 sm:$0xff]  }
 0x14a   : > { %1462 = vmatprep.mubr.bf16.mxu1 %v1212_v45 }
 0x14b   : > { %1463 = vmatmul.mubr.bf16.gmra.mrb[16].mxu1 %v1211_v43 }
 0x14c   : > { %v1174_v46 = vpop.f32.mrb[20].mxu0  ;;  %2450 = vmatpush1.bf16.msra.mxu1 %v4262_v25 }
 0x14d   : > { %v1176_v48 = vpop.f32.mrb[21].mxu0  ;;  %2451 = vmatprep.subr.bf16.mxu1 %v4267_v26  ;;  %v4277_v26 = vld [vmem:[%s6158_s10 + $0xd0] ss:$8 sps:$4 sm:$0xff]  }
 0x14e   : > { %v1178_v49 = vpop.f32.mrb[22].mxu0 }
 0x14f   : > { %v1213_v50 = vpack.c.bf16 %v1178_v49, %v1174_v46  ;;  %v1180_v51 = vpop.f32.mrb[23].mxu0 }
 0x150   : > { %v1214_v52 = vpack.c.bf16 %v1180_v51, %v1176_v48  ;;  %2452 = vmatpush1.bf16.msra.mxu1 %v4265_v27 }
 0x151   : > { %2453 = vmatprep.subr.bf16.mxu1 %v4270_v28 }
 0x152   : > { %1472 = vmatprep.mubr.bf16.mxu1 %v1214_v52 }
 0x153   : > { %1473 = vmatmul.mubr.bf16.gmra.mrb[20].mxu1 %v1213_v50 }
 0x154   : > { %v1184_v54 = vpop.f32.mrb[24].mxu0  ;;  %2454 = vmatpush1.bf16.msra.mxu1 %v4268_v29 }
 0x155   : > { %v1186_v55 = vpop.f32.mrb[25].mxu0  ;;  %2455 = vmatprep.subr.bf16.mxu1 %v4273_v7 }
 0x156   : > { %v1188_v56 = vpop.f32.mrb[26].mxu0 }
 0x157   : > { %v1215_v57 = vpack.c.bf16 %v1188_v56, %v1184_v54  ;;  %v1190_v58 = vpop.f32.mrb[27].mxu0 }
 0x158   : > { %v1216_v60 = vpack.c.bf16 %v1190_v58, %v1186_v55  ;;  %2456 = vmatpush1.bf16.msra.mxu1 %v4271_v11 }
 0x159   : > { %2457 = vmatprep.subr.bf16.mxu1 %v4276_v16 }
 0x15a   : > { %1482 = vmatprep.mubr.bf16.mxu1 %v1216_v60 }
 0x15b   : > { %1483 = vmatmul.mubr.bf16.gmra.mrb[24].mxu1 %v1215_v57 }
 0x15c   : > { %v1194_v61 = vpop.f32.mrb[28].mxu0  ;;  %2458 = vmatpush1.bf16.msra.mxu1 %v4274_v19 }
 0x15d   : > { %v1196_v62 = vpop.f32.mrb[29].mxu0  ;;  %2459 = vmatprep.subr.bf16.mxu1 %v4279_v24 }
 0x15e   : > { %v1198_v63 = vpop.f32.mrb[30].mxu0 }
 0x15f   : > { %v1217_v0 = vpack.c.bf16 %v1198_v63, %v1194_v61  ;;  %v1200_v2 = vpop.f32.mrb[31].mxu0 }
 0x160   : > { %v1218_v3 = vpack.c.bf16 %v1200_v2, %v1196_v62  ;;  %2460 = vmatpush1.bf16.msra.mxu1 %v4277_v26 }
 0x161   : > { %2461 = vmatprep.subr.bf16.mxu1 %v4282_v30 }
 0x162   : > { %1492 = vmatprep.mubr.bf16.mxu1 %v1218_v3 }
 0x163   : > { %1493 = vmatmul.mubr.bf16.gmra.mrb[28].mxu1 %v1217_v0 }
 0x1fe   : > { %v1424_v37 = vpop.f32.mrb[0].mxu1 }
 0x1ff   : > { %v4875_v38 = vadd.f32 %v1424_v37, %v4869_v35  ;;  %v1426_v39 = vpop.f32.mrb[1].mxu1  ;;  %v4280_v37 = vld [vmem:[%s6158_s10 + $0xe0] ss:$8 sps:$4 sm:$0xff]  }
 0x200   : > { %v4878_v40 = vadd.f32 %v1426_v39, %v4872_v36  ;;  %v1428_v41 = vpop.f32.mrb[2].mxu1  ;;  %2462 = vmatpush1.bf16.msra.mxu1 %v4280_v37 }
 0x201   : > { %v1430_v42 = vpop.f32.mrb[3].mxu1  ;;  %v4881_v43 = vadd.f32 %v1428_v41, %v4869_v35 }
 0x202   : > { %v4884_v44 = vadd.f32 %v1430_v42, %v4872_v36  ;;  %v1503_v45 = vadd.f32 %v4878_v40, %v4875_v38 }
 0x204   : > { %1504 = vadd.xlane.f32.xlu0 %v1503_v45  ;;  %v1506_v48 = vadd.f32 %v4884_v44, %v4881_v43 }
 0x206   : > { %v1434_v46 = vpop.f32.mrb[4].mxu1 }
 0x207   : > { %v4891_v49 = vadd.f32 %v1434_v46, %v4869_v35  ;;  %v1436_v50 = vpop.f32.mrb[5].mxu1  ;;  %v4285_v46 = vld [vmem:[%s6158_s10 + $0xf4] ss:$8 sps:$4 sm:$0xff]  }
 0x208   : > { %v4894_v51 = vadd.f32 %v1436_v50, %v4872_v36  ;;  %1507 = vadd.xlane.f32.xlu0 %v1506_v48  ;;  %v1438_v52 = vpop.f32.mrb[6].mxu1  ;;  %v4283_v50 = vld [vmem:[%s6158_s10 + $0xf0] ss:$8 sps:$4 sm:$0xff]   ;;  %2463 = vmatprep.subr.bf16.mxu1 %v4285_v46 }
 0x209   : > { %v1440_v54 = vpop.f32.mrb[7].mxu1  ;;  %v4897_v55 = vadd.f32 %v1438_v52, %v4869_v35  ;;  %2464 = vmatpush1.bf16.msra.mxu1 %v4283_v50  ;;  %v4289_v50 = vld [vmem:[%s4988_s0 + $0x18] sm:$0xff]  }
 0x20a   : > { %v4900_v56 = vadd.f32 %v1440_v54, %v4872_v36  ;;  %v1509_v57 = vadd.f32 %v4894_v51, %v4891_v49  ;;  %v4286_v54 = vld [vmem:[%s4988_s0] sm:$0xff]  }
 0x20b   : > { %2465 = vmatprep.mubr.bf16.mxu1 %v4286_v54  ;;  %v4295_v54 = vld [vmem:[%s6156_s8] sm:$0xff]  }
 0x20c   : > { %1510 = vadd.xlane.f32.xlu1 %v1509_v57  ;;  %v1512_v60 = vadd.f32 %v4900_v56, %v4897_v55  ;;  %2466 = vmatmul.mubr.bf16.vlgmr.msra.gmra.mrb[32].mxu1 %v4703_v47 }
 0x20e   : > { %v1444_v58 = vpop.f32.mrb[8].mxu1 }
 0x20f   : > { %v4907_v61 = vadd.f32 %v1444_v58, %v4869_v35  ;;  %v1446_v62 = vpop.f32.mrb[9].mxu1 }
 0x210   : > { %v4910_v63 = vadd.f32 %v1446_v62, %v4872_v36  ;;  %1513 = vadd.xlane.f32.xlu1 %v1512_v60  ;;  %v1448_v0 = vpop.f32.mrb[10].mxu1 }
 0x211   : > { %v4913_v2 = vadd.f32 %v1448_v0, %v4869_v35  ;;  %v1450_v3 = vpop.f32.mrb[11].mxu1 }
 0x212   : > { %v4916_v4 = vadd.f32 %v1450_v3, %v4872_v36  ;;  %v1515_v5 = vadd.f32 %v4910_v63, %v4907_v61 }
 0x214   : > { %1516 = vadd.xlane.f32.xlu0 %v1515_v5  ;;  %v1518_v9 = vadd.f32 %v4916_v4, %v4913_v2 }
 0x216   : > { %1519 = vadd.xlane.f32.xlu1 %v1518_v9  ;;  %v1454_v13 = vpop.f32.mrb[12].mxu1 }
 0x217   : > { %v4929_v14 = vadd.f32 %v1454_v13, %v4869_v35  ;;  %v1456_v15 = vpop.f32.mrb[13].mxu1  ;;  %v4287_v13 = vld [vmem:[%s4988_s0 + $0x8] sm:$0xff]  }
 0x218   : > { %v4935_v17 = vadd.f32 %v1456_v15, %v4872_v36  ;;  %v1458_v18 = vpop.f32.mrb[14].mxu1  ;;  %2475 = vmatprep.mubr.bf16.mxu1 %v4287_v13 }
 0x219   : > { %v4941_v20 = vadd.f32 %v1458_v18, %v4869_v35  ;;  %v1460_v21 = vpop.f32.mrb[15].mxu1  ;;  %2476 = vmatmul.mubr.bf16.gmra.mrb[36].mxu1 %v4720_v53 }
 0x21a   : > { %v4944_v22 = vadd.f32 %v1460_v21, %v4872_v36  ;;  %v1521_v23 = vadd.f32 %v4935_v17, %v4929_v14 }
 0x21c   : > { %1522 = vadd.xlane.f32.xlu0 %v1521_v23  ;;  %v1524_v25 = vadd.f32 %v4944_v22, %v4941_v20 }
 0x21e   : > { %1525 = vadd.xlane.f32.xlu1 %v1524_v25  ;;  %v1464_v27 = vpop.f32.mrb[16].mxu1 }
 0x21f   : > { %v4957_v28 = vadd.f32 %v1464_v27, %v4869_v35  ;;  %v1466_v29 = vpop.f32.mrb[17].mxu1  ;;  %v4288_v27 = vld [vmem:[%s4988_s0 + $0x10] sm:$0xff]  }
 0x220   : > { %v4963_v31 = vadd.f32 %v1466_v29, %v4872_v36  ;;  %v1468_v33 = vpop.f32.mrb[18].mxu1  ;;  %2485 = vmatprep.mubr.bf16.mxu1 %v4288_v27 }
 0x221   : > { %v4969_v39 = vadd.f32 %v1468_v33, %v4869_v35  ;;  %v1470_v41 = vpop.f32.mrb[19].mxu1  ;;  %2486 = vmatmul.mubr.bf16.gmra.mrb[40].mxu1 %v4737_v59  ;;  %v4291_v59 = vld [vmem:[%s4988_s0 + $0x28] sm:$0xff]  }
 0x222   : > { %v4972_v42 = vadd.f32 %v1470_v41, %v4872_v36  ;;  %v1527_v45 = vadd.f32 %v4963_v31, %v4957_v28  ;;  %2495 = vmatprep.mubr.bf16.mxu1 %v4289_v50 }
 0x224   : > { %1528 = vadd.xlane.f32.xlu0 %v1527_v45  ;;  %v1530_v48 = vadd.f32 %v4972_v42, %v4969_v39 }
 0x226   : > { %1531 = vadd.xlane.f32.xlu1 %v1530_v48  ;;  %v1474_v52 = vpop.f32.mrb[20].mxu1 }
 0x227   : > { %v4992_v57 = vadd.f32 %v1474_v52, %v4869_v35  ;;  %v1476_v58 = vpop.f32.mrb[21].mxu1  ;;  %v4294_v52 = vld [vmem:[%s6156_s8 + $0x40] sm:$0xff]  }
 0x228   : > { %v4995_v60 = vadd.f32 %v1476_v58, %v4872_v36  ;;  %v1478_v62 = vpop.f32.mrb[22].mxu1  ;;  %v4293_v58 = vld [vmem:[%s4988_s0 + $0x38] sm:$0xff]   ;;  %3990 = vmatprep.subr.bf16.mxu0 %v4294_v52 }
 0x229   : > { %v4998_v0 = vadd.f32 %v1478_v62, %v4869_v35  ;;  %v1480_v3 = vpop.f32.mrb[23].mxu1  ;;  %2496 = vmatmul.mubr.bf16.gmra.mrb[44].mxu1 %v4754_v1  ;;  %v4296_v1 = vld [vmem:[%s6156_s8 + $0x48] sm:$0xff]   ;;  %3991 = vmatpush3.bf16.msra.mxu0 %v4295_v54  ;;  %v4299_v62 = vld [vmem:[%s6156_s8 + $0x10] sm:$0xff]  }
 0x22a   : > { %v5002_v5 = vadd.f32 %v1480_v3, %v4872_v36  ;;  %v1533_v7 = vadd.f32 %v4995_v60, %v4992_v57  ;;  %3992 = vmatprep.subr.bf16.mxu0 %v4296_v1  ;;  %v4300_v3 = vld [vmem:[%s6156_s8 + $0x58] sm:$0xff]  }
 0x22c   : > { %1534 = vadd.xlane.f32.xlu0 %v1533_v7  ;;  %v1536_v9 = vadd.f32 %v5002_v5, %v4998_v0  ;;  %v4301_v7 = vld [vmem:[%s6156_s8 + $0x18] sm:$0xff]  }
 0x22e   : > { %1537 = vadd.xlane.f32.xlu1 %v1536_v9  ;;  %v1484_v11 = vpop.f32.mrb[24].mxu1  ;;  %v4303_v9 = vld [vmem:[%s6156_s8 + $0x20] sm:$0xff]  }
 0x22f   : > { %v5010_v15 = vadd.f32 %v1484_v11, %v4869_v35  ;;  %v1486_v16 = vpop.f32.mrb[25].mxu1 }
 0x230   : > { %v5013_v47 = vadd.f32 %v1486_v16, %v4872_v36  ;;  %v1488_v18 = vpop.f32.mrb[26].mxu1 }
 0x231   : > { %v5016_v19 = vadd.f32 %v1488_v18, %v4869_v35  ;;  %v1490_v21 = vpop.f32.mrb[27].mxu1 }
 0x232   : > { %v5020_v23 = vadd.f32 %v1490_v21, %v4872_v36  ;;  %v1539_v24 = vadd.f32 %v5013_v47, %v5010_v15 }
 0x234   : > { %1540 = vadd.xlane.f32.xlu0 %v1539_v24  ;;  %v1542_v25 = vadd.f32 %v5020_v23, %v5016_v19 }
 0x236   : > { %1543 = vadd.xlane.f32.xlu1 %v1542_v25  ;;  %v1494_v26 = vpop.f32.mrb[28].mxu1 }
 0x237   : > { %v5028_v29 = vadd.f32 %v1494_v26, %v4869_v35  ;;  %v1496_v30 = vpop.f32.mrb[29].mxu1 }
 0x238   : > { %v5031_v53 = vadd.f32 %v1496_v30, %v4872_v36  ;;  %v1498_v33 = vpop.f32.mrb[30].mxu1 }
 0x239   : > { %v5034_v37 = vadd.f32 %v1498_v33, %v4869_v35  ;;  %v1500_v41 = vpop.f32.mrb[31].mxu1  ;;  %v4290_v35 = vld [vmem:[%s4988_s0 + $0x20] sm:$0xff]  }
 0x23a   : > { %v5038_v45 = vadd.f32 %v1500_v41, %v4872_v36  ;;  %v1545_v46 = vadd.f32 %v5031_v53, %v5028_v29  ;;  %2505 = vmatprep.mubr.bf16.mxu1 %v4290_v35  ;;  %v4292_v36 = vld [vmem:[%s4988_s0 + $0x30] sm:$0xff]  }
 0x23b   : > { %2506 = vmatmul.mubr.bf16.gmra.mrb[48].mxu1 %v4768_v6  ;;  %v4297_v6 = vld [vmem:[%s6156_s8 + $0x8] sm:$0xff]  }
 0x23c   : > { %1546 = vadd.xlane.f32.xlu0 %v1545_v46  ;;  %v1548_v48 = vadd.f32 %v5038_v45, %v5034_v37  ;;  %2515 = vmatprep.mubr.bf16.mxu1 %v4291_v59 }
 0x23d   : > { %3993 = vmatpush3.bf16.msra.mxu0 %v4297_v6 }
 0x23e   : > { %1549 = vadd.xlane.f32.xlu1 %v1548_v48 }
 0x243   : > { %2516 = vmatmul.mubr.bf16.gmra.mrb[52].mxu1 %v4773_v8  ;;  %v4298_v8 = vld [vmem:[%s6156_s8 + $0x50] sm:$0xff]  }
 0x244   : > { %2525 = vmatprep.mubr.bf16.mxu1 %v4292_v36  ;;  %3994 = vmatprep.subr.bf16.mxu0 %v4298_v8 }
 0x245   : > { %3995 = vmatpush3.bf16.msra.mxu0 %v4299_v62 }
 0x246   : > { %3996 = vmatprep.subr.bf16.mxu0 %v4300_v3 }
 0x249   : > { %3997 = vmatpush3.bf16.msra.mxu0 %v4301_v7 }
 0x24b   : > { %2526 = vmatmul.mubr.bf16.gmra.mrb[56].mxu1 %v4778_v10  ;;  %v4302_v10 = vld [vmem:[%s6156_s8 + $0x60] sm:$0xff]  }
 0x24c   : > { %2535 = vmatprep.mubr.bf16.mxu1 %v4293_v58  ;;  %3998 = vmatprep.subr.bf16.mxu0 %v4302_v10 }
 0x24d   : > { %3999 = vmatpush3.bf16.msra.mxu0 %v4303_v9 }
 0x253   : > { %2536 = vmatmul.mubr.bf16.gmra.mrb[60].mxu1 %v4783_v12 }
 0x291   : > { %v1505_v11 = vpop.xlane.xlu0 %1504 }
 0x292   : > { %v1552_v13 = vmul.f32 0.00390625, %v1505_v11 }
 0x294   : > { %v5085_v16 = vsub.f32 %v4875_v38, %v1552_v13  ;;  %v5088_v18 = vsub.f32 %v4878_v40, %v1552_v13 }
 0x295   : > { %v1508_v21 = vpop.xlane.xlu0 %1507 }
 0x296   : > { %v1553_v24 = vmul.f32 0.00390625, %v1508_v21  ;;  %v1600_v12 = vmul.f32 %v5085_v16, %v5085_v16  ;;  %v1601_v25 = vmul.f32 %v5088_v18, %v5088_v18 }
 0x298   : > { %v5095_v26 = vsub.f32 %v4881_v43, %v1553_v24  ;;  %v5098_v27 = vsub.f32 %v4884_v44, %v1553_v24  ;;  %v1632_v30 = vadd.f32 %v1601_v25, %v1600_v12 }
 0x299   : > { %v1511_v38 = vpop.xlane.xlu1 %1510 }
 0x29a   : > { %v1554_v33 = vmul.f32 0.00390625, %v1511_v38  ;;  %1633 = vadd.xlane.f32.xlu0 %v1632_v30  ;;  %v1602_v40 = vmul.f32 %v5095_v26, %v5095_v26  ;;  %v1603_v41 = vmul.f32 %v5098_v27, %v5098_v27 }
 0x29c   : > { %v5105_v46 = vsub.f32 %v4891_v49, %v1554_v33  ;;  %v5108_v48 = vsub.f32 %v4894_v51, %v1554_v33  ;;  %v1635_v43 = vadd.f32 %v1603_v41, %v1602_v40 }
 0x29d   : > { %v1514_v50 = vpop.xlane.xlu1 %1513 }
 0x29e   : > { %v1555_v44 = vmul.f32 0.00390625, %v1514_v50  ;;  %1636 = vadd.xlane.f32.xlu1 %v1635_v43  ;;  %v1604_v35 = vmul.f32 %v5105_v46, %v5105_v46  ;;  %v1605_v59 = vmul.f32 %v5108_v48, %v5108_v48 }
 0x2a0   : > { %v5115_v36 = vsub.f32 %v4897_v55, %v1555_v44  ;;  %v5118_v52 = vsub.f32 %v4900_v56, %v1555_v44  ;;  %v1638_v49 = vadd.f32 %v1605_v59, %v1604_v35 }
 0x2a1   : > { %v1517_v54 = vpop.xlane.xlu0 %1516 }
 0x2a2   : > { %v1556_v51 = vmul.f32 0.00390625, %v1517_v54  ;;  %1639 = vadd.xlane.f32.xlu0 %v1638_v49  ;;  %v1606_v1 = vmul.f32 %v5115_v36, %v5115_v36  ;;  %v1607_v58 = vmul.f32 %v5118_v52, %v5118_v52 }
 0x2a3   : > { %v1520_v6 = vpop.xlane.xlu1 %1519 }
 0x2a4   : > { %v5125_v8 = vsub.f32 %v4907_v61, %v1556_v51  ;;  %v5128_v55 = vsub.f32 %v4910_v63, %v1556_v51  ;;  %v1557_v62 = vmul.f32 0.00390625, %v1520_v6  ;;  %v1641_v56 = vadd.f32 %v1607_v58, %v1606_v1 }
 0x2a6   : > { %v5131_v3 = vsub.f32 %v4913_v2, %v1557_v62  ;;  %v5134_v7 = vsub.f32 %v4916_v4, %v1557_v62  ;;  %1642 = vadd.xlane.f32.xlu1 %v1641_v56  ;;  %v1608_v10 = vmul.f32 %v5125_v8, %v5125_v8  ;;  %v1609_v9 = vmul.f32 %v5128_v55, %v5128_v55 }
 0x2a8   : > { %v1644_v61 = vadd.f32 %v1609_v9, %v1608_v10  ;;  %v1610_v63 = vmul.f32 %v5131_v3, %v5131_v3  ;;  %v1611_v11 = vmul.f32 %v5134_v7, %v5134_v7 }
 0x2a9   : > { %v1523_v13 = vpop.xlane.xlu0 %1522 }
 0x2aa   : > { %v1558_v2 = vmul.f32 0.00390625, %v1523_v13  ;;  %1645 = vadd.xlane.f32.xlu0 %v1644_v61  ;;  %v1647_v21 = vadd.f32 %v1611_v11, %v1610_v63  ;;  %v4306_v11 = vld [vmem:[%s6156_s8 + $0x70] sm:$0xff]  }
 0x2ab   : > { %v1526_v4 = vpop.xlane.xlu1 %1525  ;;  %v4307_v13 = vld [vmem:[%s6156_s8 + $0x30] sm:$0xff]  }
 0x2ac   : > { %v5145_v24 = vsub.f32 %v4929_v14, %v1558_v2  ;;  %v5148_v12 = vsub.f32 %v4935_v17, %v1558_v2  ;;  %v1559_v25 = vmul.f32 0.00390625, %v1526_v4  ;;  %1648 = vadd.xlane.f32.xlu1 %v1647_v21  ;;  %v4308_v4 = vld [vmem:[%s6156_s8 + $0x78] sm:$0xff]  }
 0x2ae   : > { %v5151_v30 = vsub.f32 %v4941_v20, %v1559_v25  ;;  %v5154_v38 = vsub.f32 %v4944_v22, %v1559_v25  ;;  %v1612_v33 = vmul.f32 %v5145_v24, %v5145_v24  ;;  %v1613_v40 = vmul.f32 %v5148_v12, %v5148_v12 }
 0x2b0   : > { %v1650_v41 = vadd.f32 %v1613_v40, %v1612_v33  ;;  %v1614_v14 = vmul.f32 %v5151_v30, %v5151_v30  ;;  %v1615_v17 = vmul.f32 %v5154_v38, %v5154_v38 }
 0x2b1   : > { %v1529_v43 = vpop.xlane.xlu0 %1528 }
 0x2b2   : > { %v1560_v50 = vmul.f32 0.00390625, %v1529_v43  ;;  %1651 = vadd.xlane.f32.xlu0 %v1650_v41  ;;  %v1653_v20 = vadd.f32 %v1615_v17, %v1614_v14 }
 0x2b3   : > { %v1532_v44 = vpop.xlane.xlu1 %1531 }
 0x2b4   : > { %v5165_v22 = vsub.f32 %v4957_v28, %v1560_v50  ;;  %v5168_v35 = vsub.f32 %v4963_v31, %v1560_v50  ;;  %v1561_v59 = vmul.f32 0.00390625, %v1532_v44  ;;  %1654 = vadd.xlane.f32.xlu1 %v1653_v20  ;;  %v4312_v44 = vld [vmem:[%s6159_s11 + $0x4] ss:$8 sps:$4 sm:$0xff]  }
 0x2b6   : > { %v5171_v49 = vsub.f32 %v4969_v39, %v1561_v59  ;;  %v5174_v54 = vsub.f32 %v4972_v42, %v1561_v59  ;;  %v1616_v51 = vmul.f32 %v5165_v22, %v5165_v22  ;;  %v1617_v1 = vmul.f32 %v5168_v35, %v5168_v35  ;;  %v4304_v39 = vld [vmem:[%s6156_s8 + $0x68] sm:$0xff]  }
 0x2b7   : > { %v4305_v42 = vld [vmem:[%s6156_s8 + $0x28] sm:$0xff]   ;;  %4000 = vmatprep.subr.bf16.mxu0 %v4304_v39 }
 0x2b8   : > { %v1656_v58 = vadd.f32 %v1617_v1, %v1616_v51  ;;  %v1618_v28 = vmul.f32 %v5171_v49, %v5171_v49  ;;  %v1619_v31 = vmul.f32 %v5174_v54, %v5174_v54  ;;  %4001 = vmatpush3.bf16.msra.mxu0 %v4305_v42 }
 0x2b9   : > { %v1535_v6 = vpop.xlane.xlu0 %1534  ;;  %4002 = vmatprep.subr.bf16.mxu0 %v4306_v11 }
 0x2ba   : > { %v1562_v62 = vmul.f32 0.00390625, %v1535_v6  ;;  %1657 = vadd.xlane.f32.xlu0 %v1656_v58  ;;  %v1659_v56 = vadd.f32 %v1619_v31, %v1618_v28 }
 0x2bb   : > { %v1538_v10 = vpop.xlane.xlu1 %1537 }
 0x2bc   : > { %v5191_v9 = vsub.f32 %v4992_v57, %v1562_v62  ;;  %v5194_v61 = vsub.f32 %v4995_v60, %v1562_v62  ;;  %v1563_v63 = vmul.f32 0.00390625, %v1538_v10  ;;  %1660 = vadd.xlane.f32.xlu1 %v1659_v56  ;;  %4003 = vmatpush3.bf16.msra.mxu0 %v4307_v13 }
 0x2bd   : > { %4004 = vmatprep.subr.bf16.mxu0 %v4308_v4 }
 0x2be   : > { %v5203_v2 = vsub.f32 %v4998_v0, %v1563_v63  ;;  %v5206_v21 = vsub.f32 %v5002_v5, %v1563_v63  ;;  %v1620_v57 = vmul.f32 %v5191_v9, %v5191_v9  ;;  %v1621_v60 = vmul.f32 %v5194_v61, %v5194_v61  ;;  %v4309_v0 = vld [vmem:[%s6156_s8 + $0x38] sm:$0xff]  }
 0x2c0   : > { %v1662_v25 = vadd.f32 %v1621_v60, %v1620_v57  ;;  %v1622_v5 = vmul.f32 %v5203_v2, %v5203_v2  ;;  %v1623_v33 = vmul.f32 %v5206_v21, %v5206_v21  ;;  %4005 = vmatpush3.bf16.msra.mxu0 %v4309_v0 }
 0x2c1   : > { %v1541_v40 = vpop.xlane.xlu0 %1540  ;;  %2733 = vmatprep.subr.bf16.mxu0 %v4312_v44 }
 0x2c2   : > { %v1564_v41 = vmul.f32 0.00390625, %v1541_v40  ;;  %1663 = vadd.xlane.f32.xlu0 %v1662_v25  ;;  %v1665_v14 = vadd.f32 %v1623_v33, %v1622_v5 }
 0x2c3   : > { %v1544_v17 = vpop.xlane.xlu1 %1543 }
 0x2c4   : > { %v5223_v43 = vsub.f32 %v5010_v15, %v1564_v41  ;;  %v5226_v50 = vsub.f32 %v5013_v47, %v1564_v41  ;;  %v1565_v20 = vmul.f32 0.00390625, %v1544_v17  ;;  %1666 = vadd.xlane.f32.xlu1 %v1665_v14 }
 0x2c6   : > { %v5232_v59 = vsub.f32 %v5016_v19, %v1565_v20  ;;  %v5235_v51 = vsub.f32 %v5020_v23, %v1565_v20  ;;  %v1624_v1 = vmul.f32 %v5223_v43, %v5223_v43  ;;  %v1625_v15 = vmul.f32 %v5226_v50, %v5226_v50 }
 0x2c8   : > { %v1668_v47 = vadd.f32 %v1625_v15, %v1624_v1  ;;  %v1626_v58 = vmul.f32 %v5232_v59, %v5232_v59  ;;  %v1627_v28 = vmul.f32 %v5235_v51, %v5235_v51 }
 0x2c9   : > { %v1547_v31 = vpop.xlane.xlu0 %1546 }
 0x2ca   : > { %v1566_v19 = vmul.f32 0.00390625, %v1547_v31  ;;  %1669 = vadd.xlane.f32.xlu0 %v1668_v47  ;;  %v1671_v39 = vadd.f32 %v1627_v28, %v1626_v58 }
 0x2cb   : > { %v1550_v23 = vpop.xlane.xlu1 %1549 }
 0x2cc   : > { %v5246_v6 = vsub.f32 %v5028_v29, %v1566_v19  ;;  %v5249_v42 = vsub.f32 %v5031_v53, %v1566_v19  ;;  %v1567_v62 = vmul.f32 0.00390625, %v1550_v23  ;;  %1672 = vadd.xlane.f32.xlu1 %v1671_v39 }
 0x2ce   : > { %v5252_v56 = vsub.f32 %v5034_v37, %v1567_v62  ;;  %v5255_v10 = vsub.f32 %v5038_v45, %v1567_v62  ;;  %v1628_v63 = vmul.f32 %v5246_v6, %v5246_v6  ;;  %v1629_v11 = vmul.f32 %v5249_v42, %v5249_v42 }
 0x2d0   : > { %v1674_v13 = vadd.f32 %v1629_v11, %v1628_v63  ;;  %v1630_v29 = vmul.f32 %v5252_v56, %v5252_v56  ;;  %v1631_v53 = vmul.f32 %v5255_v10, %v5255_v10 }
 0x2d2   : > { %1675 = vadd.xlane.f32.xlu0 %v1674_v13  ;;  %v1677_v57 = vadd.f32 %v1631_v53, %v1630_v29 }
 0x2d4   : > { %1678 = vadd.xlane.f32.xlu1 %v1677_v57 }
 0x2df   : > { %v5265_v37 = vpop.f32.mrb[32].mxu1 }
 0x2e0   : > { %v5267_v45 = vpop.f32.mrb[33].mxu1 }
 0x2e1   : > { %v5269_v60 = vpop.f32.mrb[34].mxu1 }
 0x2e2   : > { %v5273_v0 = vpop.f32.mrb[35].mxu1 }
 0x2ec   : > { %v5277_v5 = vpop.f32.mrb[36].mxu1 }
 0x2ed   : > { %v5279_v33 = vpop.f32.mrb[37].mxu1 }
 0x2ee   : > { %v5281_v40 = vpop.f32.mrb[38].mxu1 }
 0x2ef   : > { %v5285_v14 = vpop.f32.mrb[39].mxu1 }
 0x2f4   : > { %v5289_v20 = vpop.f32.mrb[40].mxu1 }
 0x2f5   : > { %6200 = vst [vmem:[#allocation4_spill] sm:$0xff] %v5289_v20  ;;  %v5291_v44 = vpop.f32.mrb[41].mxu1 }
 0x2f6   : > { %v5293_v1 = vpop.f32.mrb[42].mxu1 }
 0x2f7   : > { %v5297_v47 = vpop.f32.mrb[43].mxu1 }
 0x2fc   : > { %v5301_v28 = vpop.f32.mrb[44].mxu1 }
 0x2fd   : > { %6201 = vst [vmem:[#allocation5_spill] sm:$0xff] %v5301_v28  ;;  %v5303_v31 = vpop.f32.mrb[45].mxu1 }
 0x2fe   : > { %6202 = vst [vmem:[#allocation6_spill] sm:$0xff] %v5303_v31  ;;  %v5305_v19 = vpop.f32.mrb[46].mxu1 }
 0x2ff   : > { %6203 = vst [vmem:[#allocation7_spill] sm:$0xff] %v5305_v19  ;;  %v5309_v23 = vpop.f32.mrb[47].mxu1 }
 0x300   : > { %6204 = vst [vmem:[#allocation8_spill] sm:$0xff] %v5309_v23 }
 0x30e   : > { %v5313_v63 = vpop.f32.mrb[48].mxu1 }
 0x30f   : > { %6205 = vst [vmem:[#allocation9_spill] sm:$0xff] %v5313_v63  ;;  %v5315_v11 = vpop.f32.mrb[49].mxu1 }
 0x310   : > { %6206 = vst [vmem:[#allocation10_spill] sm:$0xff] %v5315_v11  ;;  %v5317_v13 = vpop.f32.mrb[50].mxu1 }
 0x311   : > { %6207 = vst [vmem:[#allocation11_spill] sm:$0xff] %v5317_v13  ;;  %v5321_v53 = vpop.f32.mrb[51].mxu1 }
 0x312   : > { %6208 = vst [vmem:[#allocation12_spill] sm:$0xff] %v5321_v53 }
 0x316   : > { %v5325_v39 = vpop.f32.mrb[52].mxu1 }
 0x317   : > { %6209 = vst [vmem:[#allocation13_spill] sm:$0xff] %v5325_v39  ;;  %v5327_v15 = vpop.f32.mrb[53].mxu1 }
 0x318   : > { %6210 = vst [vmem:[#allocation14_spill] sm:$0xff] %v5327_v15  ;;  %v5329_v58 = vpop.f32.mrb[54].mxu1 }
 0x319   : > { %6211 = vst [vmem:[#allocation15_spill] sm:$0xff] %v5329_v58  ;;  %v5333_v17 = vpop.f32.mrb[55].mxu1  ;;  %v896_v58 = vld [vmem:[%s6155_s7] sm:$0x3] }
 0x31a   : > { %6212 = vst [vmem:[#allocation16_spill] sm:$0xff] %v5333_v17  ;;  %v5377_v31 = vrot.slane %v896_v58, %v4866_v34 }
 0x31e   : > { %v5337_v13 = vpop.f32.mrb[56].mxu1 }
 0x31f   : > { %6213 = vst [vmem:[#allocation17_spill] sm:$0xff] %v5337_v13  ;;  %v5339_v11 = vpop.f32.mrb[57].mxu1 }
 0x320   : > { %6214 = vst [vmem:[#allocation18_spill] sm:$0xff] %v5339_v11  ;;  %v5341_v28 = vpop.f32.mrb[58].mxu1 }
 0x321   : > { %6215 = vst [vmem:[#allocation19_spill] sm:$0xff] %v5341_v28  ;;  %v5345_v39 = vpop.f32.mrb[59].mxu1 }
 0x322   : > { %6216 = vst [vmem:[#allocation20_spill] sm:$0xff] %v5345_v39  ;;  %v5370_v39 = vrot.slane %v896_v58, %v4861_v32 }
 0x326   : > { %v5355_v41 = vpop.f32.mrb[60].mxu1 }
 0x327   : > { %v1634_v62 = vpop.xlane.xlu0 %1633  ;;  %6217 = vst [vmem:[#allocation21_spill] sm:$0xff] %v5355_v41 }
 0x328   : > { %v1680_v4 = vmul.f32 0.00390625, %v1634_v62 }
 0x32a   : > { %v1696_v25 = vadd.f32 1e-05, %v1680_v4  ;;  %v5363_v4 = vpop.f32.mrb[61].mxu1 }
 0x32b   : > { %v1637_v63 = vpop.xlane.xlu1 %1636  ;;  %6218 = vst [vmem:[#allocation22_spill] sm:$0xff] %v5363_v4 }
 0x32c   : > { %4374 = vrsqrt.f32 %v1696_v25  ;;  %v1681_v57 = vmul.f32 0.00390625, %v1637_v63  ;;  %v895_v25 = vld [vmem:[%s6154_s6] sm:$0x3] }
 0x32e   : > { %v1697_v53 = vadd.f32 1e-05, %v1681_v57 }
 0x32f   : > { %v1640_v19 = vpop.xlane.xlu0 %1639 }
 0x330   : > { %4376 = vrsqrt.f32 %v1697_v53  ;;  %v1682_v62 = vmul.f32 0.00390625, %v1640_v19  ;;  %v5358_v53 = vrot.slane %v895_v25, %v4861_v32  ;;  %v5361_v19 = vrot.slane %v895_v25, %v4866_v34 }
 0x332   : > { %v1698_v63 = vadd.f32 1e-05, %v1682_v62  ;;  %v5365_v62 = vpop.f32.mrb[62].mxu1 }
 0x333   : > { %v1643_v29 = vpop.xlane.xlu1 %1642  ;;  %6219 = vst [vmem:[#allocation23_spill] sm:$0xff] %v5365_v62  ;;  %v5374_v17 = vpop.f32.mrb[63].mxu1 }
 0x334   : > { %4378 = vrsqrt.f32 %v1698_v63  ;;  %v1683_v57 = vmul.f32 0.00390625, %v1643_v29  ;;  %6220 = vst [vmem:[#allocation24_spill] sm:$0xff] %v5374_v17 }
 0x336   : > { %v4375_v13 = vpop.eup %4374  ;;  %v1699_v28 = vadd.f32 1e-05, %v1683_v57 }
 0x337   : > { %v1728_v29 = vmul.f32 %v4375_v13, %v5085_v16  ;;  %v1646_v63 = vpop.xlane.xlu0 %1645  ;;  %v1729_v11 = vmul.f32 %v4375_v13, %v5088_v18 }
 0x338   : > { %4380 = vrsqrt.f32 %v1699_v28  ;;  %v1684_v25 = vmul.f32 0.00390625, %v1646_v63 }
 0x339   : > { %v1771_v16 = vmul.f32 %v5358_v53, %v1728_v29  ;;  %v1649_v23 = vpop.xlane.xlu1 %1648  ;;  %v1772_v18 = vmul.f32 %v5361_v19, %v1729_v11 }
 0x33a   : > { %v4377_v13 = vpop.eup %4376  ;;  %v1700_v32 = vadd.f32 1e-05, %v1684_v25  ;;  %v1685_v20 = vmul.f32 0.00390625, %v1649_v23 }
 0x33b   : > { %v1730_v15 = vmul.f32 %v4377_v13, %v5095_v26  ;;  %v1731_v41 = vmul.f32 %v4377_v13, %v5098_v27  ;;  %v1815_v58 = vadd.f32 %v5377_v31, %v1772_v18  ;;  %v1814_v63 = vadd.f32 %v5370_v39, %v1771_v16 }
 0x33c   : > { %4382 = vrsqrt.f32 %v1700_v32  ;;  %v1701_v28 = vadd.f32 1e-05, %v1685_v20 }
 0x33d   : > { %v1773_v57 = vmul.f32 %v5358_v53, %v1730_v15  ;;  %v1774_v29 = vmul.f32 %v5361_v19, %v1731_v41  ;;  %v1847_v20 = vmax.f32 %v1815_v58, 0.0  ;;  %v1846_v18 = vmax.f32 %v1814_v63, 0.0  ;;  %v4315_v63 = vld [vmem:[%s6159_s11 + $0x14] ss:$8 sps:$4 sm:$0xff]  }
 0x33e   : > { %v4379_v34 = vpop.eup %4378  ;;  %4384 = vrsqrt.f32 %v1701_v28 }
 0x33f   : > { %v1652_v11 = vpop.xlane.xlu0 %1651  ;;  %v1817_v25 = vadd.f32 %v5377_v31, %v1774_v29  ;;  %v1816_v23 = vadd.f32 %v5370_v39, %v1773_v57  ;;  %v1733_v26 = vmul.f32 %v4379_v34, %v5108_v48  ;;  %v1732_v32 = vmul.f32 %v4379_v34, %v5105_v46  ;;  %v4310_v48 = vld [vmem:[%s6159_s11] ss:$8 sps:$4 sm:$0xff]  }
 0x340   : > { %v1686_v27 = vmul.f32 0.00390625, %v1652_v11 }
 0x341   : > { %v1655_v13 = vpop.xlane.xlu1 %1654  ;;  %v1849_v16 = vmax.f32 %v1817_v25, 0.0  ;;  %v1848_v62 = vmax.f32 %v1816_v23, 0.0  ;;  %v1776_v15 = vmul.f32 %v5361_v19, %v1733_v26  ;;  %v1775_v41 = vmul.f32 %v5358_v53, %v1732_v32 }
 0x342   : > { %v4381_v28 = vpop.eup %4380  ;;  %v1702_v4 = vadd.f32 1e-05, %v1686_v27  ;;  %v1687_v17 = vmul.f32 0.00390625, %v1655_v13  ;;  %v4318_v13 = vld [vmem:[%s6159_s11 + $0x24] ss:$8 sps:$4 sm:$0xff]  }
 0x343   : > { %v1879_v29 = vpack.c.bf16 %v1849_v16, %v1847_v20  ;;  %v1878_v57 = vpack.c.bf16 %v1848_v62, %v1846_v18  ;;  %v1735_v34 = vmul.f32 %v4381_v28, %v5118_v52  ;;  %v1819_v46 = vadd.f32 %v5377_v31, %v1776_v15 }
 0x344   : > { %4386 = vrsqrt.f32 %v1702_v4  ;;  %v1703_v58 = vadd.f32 1e-05, %v1687_v17  ;;  %v1734_v11 = vmul.f32 %v4381_v28, %v5115_v36  ;;  %v1818_v25 = vadd.f32 %v5370_v39, %v1775_v41  ;;  %v4313_v17 = vld [vmem:[%s6159_s11 + $0x10] ss:$8 sps:$4 sm:$0xff]  }
 0x345   : > { %2028 = vmatprep.mubr.bf16.mxu0 %v1879_v29  ;;  %v1778_v23 = vmul.f32 %v5361_v19, %v1735_v34  ;;  %v1851_v18 = vmax.f32 %v1819_v46, 0.0 }
 0x346   : > { %v4383_v26 = vpop.eup %4382  ;;  %4388 = vrsqrt.f32 %v1703_v58  ;;  %2029 = vmatmul.mubr.bf16.vlgmr.msra.gmra.mrb[32].mxu0 %v1878_v57  ;;  %v1777_v52 = vmul.f32 %v5358_v53, %v1734_v11  ;;  %v1850_v15 = vmax.f32 %v1818_v25, 0.0 }
 0x347   : > { %2734 = vmatpush1.bf16.msra.mxu0 %v4310_v48  ;;  %v1658_v62 = vpop.xlane.xlu0 %1657  ;;  %v1821_v4 = vadd.f32 %v5377_v31, %v1778_v23  ;;  %v1737_v36 = vmul.f32 %v4383_v26, %v5128_v55  ;;  %v1736_v32 = vmul.f32 %v4383_v26, %v5125_v8  ;;  %v4321_v26 = vld [vmem:[%s6159_s11 + $0x34] ss:$8 sps:$4 sm:$0xff]  }
 0x348   : > { %v4385_v27 = vpop.eup %4384  ;;  %v1688_v20 = vmul.f32 0.00390625, %v1658_v62  ;;  %2735 = vmatprep.subr.bf16.mxu0 %v4315_v63  ;;  %v1820_v16 = vadd.f32 %v5370_v39, %v1777_v52  ;;  %v4316_v63 = vld [vmem:[%s6159_s11 + $0x20] ss:$8 sps:$4 sm:$0xff]  }
 0x349   : > { %v1661_v41 = vpop.xlane.xlu1 %1660  ;;  %v1853_v28 = vmax.f32 %v1821_v4, 0.0  ;;  %v1739_v29 = vmul.f32 %v4385_v27, %v5134_v7  ;;  %v1780_v48 = vmul.f32 %v5361_v19, %v1737_v36  ;;  %v1738_v55 = vmul.f32 %v4385_v27, %v5131_v3 }
 0x34a   : > { %v1704_v8 = vadd.f32 1e-05, %v1688_v20  ;;  %v1689_v57 = vmul.f32 0.00390625, %v1661_v41  ;;  %v1852_v34 = vmax.f32 %v1820_v16, 0.0  ;;  %v1779_v46 = vmul.f32 %v5358_v53, %v1736_v32  ;;  %v4319_v32 = vld [vmem:[%s6159_s11 + $0x30] ss:$8 sps:$4 sm:$0xff]  }
 0x34b   : > { %2736 = vmatpush1.bf16.msra.mxu0 %v4313_v17  ;;  %v1881_v58 = vpack.c.bf16 %v1853_v28, %v1851_v18  ;;  %v1782_v11 = vmul.f32 %v5361_v19, %v1739_v29  ;;  %v1823_v25 = vadd.f32 %v5377_v31, %v1780_v48  ;;  %v1781_v7 = vmul.f32 %v5358_v53, %v1738_v55  ;;  %v4324_v41 = vld [vmem:[%s6159_s11 + $0x44] ss:$8 sps:$4 sm:$0xff]  }
 0x34c   : > { %4390 = vrsqrt.f32 %v1704_v8  ;;  %v1705_v23 = vadd.f32 1e-05, %v1689_v57  ;;  %2737 = vmatprep.subr.bf16.mxu0 %v4318_v13  ;;  %v1880_v3 = vpack.c.bf16 %v1852_v34, %v1850_v15  ;;  %v1822_v62 = vadd.f32 %v5370_v39, %v1779_v46 }
 0x34d   : > { %2036 = vmatprep.mubr.bf16.mxu0 %v1881_v58  ;;  %v1825_v52 = vadd.f32 %v5377_v31, %v1782_v11  ;;  %v1824_v17 = vadd.f32 %v5370_v39, %v1781_v7  ;;  %v1855_v27 = vmax.f32 %v1823_v25, 0.0  ;;  %v4322_v58 = vld [vmem:[%s6159_s11 + $0x40] ss:$8 sps:$4 sm:$0xff]  }
 0x34e   : > { %v4387_v4 = vpop.eup %4386  ;;  %4392 = vrsqrt.f32 %v1705_v23  ;;  %2037 = vmatmul.mubr.bf16.gmra.mrb[36].mxu0 %v1880_v3  ;;  %v1854_v55 = vmax.f32 %v1822_v62, 0.0 }
 0x34f   : > { %2738 = vmatpush1.bf16.msra.mxu0 %v4316_v63  ;;  %v1664_v36 = vpop.xlane.xlu0 %1663  ;;  %v1857_v20 = vmax.f32 %v1825_v52, 0.0  ;;  %v1741_v18 = vmul.f32 %v4387_v4, %v5148_v12  ;;  %v1740_v13 = vmul.f32 %v4387_v4, %v5145_v24  ;;  %v1856_v28 = vmax.f32 %v1824_v17, 0.0  ;;  %v4325_v17 = vld [vmem:[%s6159_s11 + $0x50] ss:$8 sps:$4 sm:$0xff]  }
 0x350   : > { %v4389_v16 = vpop.eup %4388  ;;  %v1690_v15 = vmul.f32 0.00390625, %v1664_v36  ;;  %2739 = vmatprep.subr.bf16.mxu0 %v4321_v26 }
 0x351   : > { %v1667_v29 = vpop.xlane.xlu1 %1666  ;;  %v1883_v48 = vpack.c.bf16 %v1857_v20, %v1855_v27  ;;  %v1743_v8 = vmul.f32 %v4389_v16, %v5154_v38  ;;  %v1784_v57 = vmul.f32 %v5361_v19, %v1741_v18  ;;  %v1742_v12 = vmul.f32 %v4389_v16, %v5151_v30  ;;  %v4327_v30 = vld [vmem:[%s6159_s11 + $0x54] ss:$8 sps:$4 sm:$0xff]  }
 0x352   : > { %v1706_v34 = vadd.f32 1e-05, %v1690_v15  ;;  %v1691_v46 = vmul.f32 0.00390625, %v1667_v29  ;;  %v1783_v24 = vmul.f32 %v5358_v53, %v1740_v13  ;;  %v1882_v25 = vpack.c.bf16 %v1856_v28, %v1854_v55  ;;  %v4330_v13 = vld [vmem:[%s6159_s11 + $0x64] ss:$8 sps:$4 sm:$0xff]  }
 0x353   : > { %2740 = vmatpush1.bf16.msra.mxu0 %v4319_v32  ;;  %2044 = vmatprep.mubr.bf16.mxu0 %v1883_v48  ;;  %v1786_v63 = vmul.f32 %v5361_v19, %v1743_v8  ;;  %v1827_v11 = vadd.f32 %v5377_v31, %v1784_v57  ;;  %v1785_v7 = vmul.f32 %v5358_v53, %v1742_v12  ;;  %v4328_v57 = vld [vmem:[%s6159_s11 + $0x60] ss:$8 sps:$4 sm:$0xff]  }
 0x354   : > { %4394 = vrsqrt.f32 %v1706_v34  ;;  %v1707_v38 = vadd.f32 1e-05, %v1691_v46  ;;  %2741 = vmatprep.subr.bf16.mxu0 %v4324_v41  ;;  %v1826_v26 = vadd.f32 %v5370_v39, %v1783_v24  ;;  %v4333_v24 = vld [vmem:[%s6159_s11 + $0x74] ss:$8 sps:$4 sm:$0xff]  }
 0x355   : > { %v1829_v23 = vadd.f32 %v5377_v31, %v1786_v63  ;;  %v1828_v52 = vadd.f32 %v5370_v39, %v1785_v7  ;;  %v1859_v4 = vmax.f32 %v1827_v11, 0.0 }
 0x356   : > { %v4391_v3 = vpop.eup %4390  ;;  %4396 = vrsqrt.f32 %v1707_v38  ;;  %2045 = vmatmul.mubr.bf16.gmra.mrb[40].mxu0 %v1882_v25  ;;  %v1858_v8 = vmax.f32 %v1826_v26, 0.0 }
 0x357   : > { %2742 = vmatpush1.bf16.msra.mxu0 %v4322_v58  ;;  %v1670_v62 = vpop.xlane.xlu0 %1669  ;;  %v1861_v36 = vmax.f32 %v1829_v23, 0.0  ;;  %v1745_v32 = vmul.f32 %v4391_v3, %v5168_v35  ;;  %v1744_v27 = vmul.f32 %v4391_v3, %v5165_v22  ;;  %v1860_v16 = vmax.f32 %v1828_v52, 0.0 }
 0x358   : > { %v4393_v20 = vpop.eup %4392  ;;  %v1692_v18 = vmul.f32 0.00390625, %v1670_v62  ;;  %2743 = vmatprep.subr.bf16.mxu0 %v4327_v30  ;;  %v4331_v30 = vld [vmem:[%s6159_s11 + $0x70] ss:$8 sps:$4 sm:$0xff]  }
 0x359   : > { %v1673_v15 = vpop.xlane.xlu1 %1672  ;;  %v1885_v41 = vpack.c.bf16 %v1861_v36, %v1859_v4  ;;  %v1747_v28 = vmul.f32 %v4393_v20, %v5174_v54  ;;  %v1788_v29 = vmul.f32 %v5361_v19, %v1745_v32  ;;  %v1746_v48 = vmul.f32 %v4393_v20, %v5171_v49 }
 0x35a   : > { %v1708_v55 = vadd.f32 1e-05, %v1692_v18  ;;  %v1693_v35 = vmul.f32 0.00390625, %v1673_v15  ;;  %v1787_v22 = vmul.f32 %v5358_v53, %v1744_v27  ;;  %v1884_v49 = vpack.c.bf16 %v1860_v16, %v1858_v8  ;;  %v4334_v15 = vld [vmem:[%s6159_s11 + $0x80] ss:$8 sps:$4 sm:$0xff]  }
 0x35b   : > { %2744 = vmatpush1.bf16.msra.mxu0 %v4325_v17  ;;  %2052 = vmatprep.mubr.bf16.mxu0 %v1885_v41  ;;  %v1790_v34 = vmul.f32 %v5361_v19, %v1747_v28  ;;  %v1831_v46 = vadd.f32 %v5377_v31, %v1788_v29  ;;  %v1789_v54 = vmul.f32 %v5358_v53, %v1746_v48  ;;  %v4336_v17 = vld [vmem:[%s6159_s11 + $0x84] ss:$8 sps:$4 sm:$0xff]  }
 0x35c   : > { %4398 = vrsqrt.f32 %v1708_v55  ;;  %v1709_v12 = vadd.f32 1e-05, %v1693_v35  ;;  %2745 = vmatprep.subr.bf16.mxu0 %v4330_v13  ;;  %v1830_v63 = vadd.f32 %v5370_v39, %v1787_v22 }
 0x35d   : > { %v1833_v58 = vadd.f32 %v5377_v31, %v1790_v34  ;;  %v1832_v11 = vadd.f32 %v5370_v39, %v1789_v54  ;;  %v1863_v7 = vmax.f32 %v1831_v46, 0.0 }
 0x35e   : > { %v4395_v38 = vpop.eup %4394  ;;  %4400 = vrsqrt.f32 %v1709_v12  ;;  %2053 = vmatmul.mubr.bf16.gmra.mrb[44].mxu0 %v1884_v49  ;;  %v1862_v27 = vmax.f32 %v1830_v63, 0.0 }
 0x35f   : > { %2746 = vmatpush1.bf16.msra.mxu0 %v4328_v57  ;;  %v1676_v25 = vpop.xlane.xlu0 %1675  ;;  %v1865_v23 = vmax.f32 %v1833_v58, 0.0  ;;  %v1749_v3 = vmul.f32 %v4395_v38, %v5194_v61  ;;  %v1748_v26 = vmul.f32 %v4395_v38, %v5191_v9  ;;  %v1864_v4 = vmax.f32 %v1832_v11, 0.0  ;;  %v4337_v57 = vld [vmem:[%s6159_s11 + $0x90] ss:$8 sps:$4 sm:$0xff]  }
 0x360   : > { %v4397_v52 = vpop.eup %4396  ;;  %v1694_v62 = vmul.f32 0.00390625, %v1676_v25  ;;  %2747 = vmatprep.subr.bf16.mxu0 %v4333_v24  ;;  %v4342_v24 = vld [vmem:[%s6159_s11 + $0xa4] ss:$8 sps:$4 sm:$0xff]  }
 0x361   : > { %v1679_v36 = vpop.xlane.xlu1 %1678  ;;  %v1887_v32 = vpack.c.bf16 %v1865_v23, %v1863_v7  ;;  %v1751_v20 = vmul.f32 %v4397_v52, %v5206_v21  ;;  %v1792_v18 = vmul.f32 %v5361_v19, %v1749_v3  ;;  %v1750_v61 = vmul.f32 %v4397_v52, %v5203_v2  ;;  %v4339_v2 = vld [vmem:[%s6159_s11 + $0x94] ss:$8 sps:$4 sm:$0xff]  }
 0x362   : > { %v1710_v13 = vadd.f32 1e-05, %v1694_v62  ;;  %v1695_v16 = vmul.f32 0.00390625, %v1679_v36  ;;  %v1791_v9 = vmul.f32 %v5358_v53, %v1748_v26  ;;  %v1886_v29 = vpack.c.bf16 %v1864_v4, %v1862_v27  ;;  %v4343_v4 = vld [vmem:[%s6159_s11 + $0xb0] ss:$8 sps:$4 sm:$0xff]  }
 0x363   : > { %2748 = vmatpush1.bf16.msra.mxu0 %v4331_v30  ;;  %2060 = vmatprep.mubr.bf16.mxu0 %v1887_v32  ;;  %v1794_v41 = vmul.f32 %v5361_v19, %v1751_v20  ;;  %v1835_v28 = vadd.f32 %v5377_v31, %v1792_v18  ;;  %v1793_v48 = vmul.f32 %v5358_v53, %v1750_v61 }
 0x364   : > { %4402 = vrsqrt.f32 %v1710_v13  ;;  %v1711_v21 = vadd.f32 1e-05, %v1695_v16  ;;  %2749 = vmatprep.subr.bf16.mxu0 %v4336_v17  ;;  %v1834_v8 = vadd.f32 %v5370_v39, %v1791_v9  ;;  %v4348_v13 = vld [vmem:[%s6159_s11 + $0xc4] ss:$8 sps:$4 sm:$0xff]  }
 0x365   : > { %v1837_v55 = vadd.f32 %v5377_v31, %v1794_v41  ;;  %v1836_v22 = vadd.f32 %v5370_v39, %v1793_v48  ;;  %v1867_v34 = vmax.f32 %v1835_v28, 0.0 }
 0x366   : > { %v4399_v35 = vpop.eup %4398  ;;  %4404 = vrsqrt.f32 %v1711_v21  ;;  %2061 = vmatmul.mubr.bf16.gmra.mrb[48].mxu0 %v1886_v29  ;;  %v1866_v30 = vmax.f32 %v1834_v8, 0.0 }
 0x367   : > { %2750 = vmatpush1.bf16.msra.mxu0 %v4334_v15  ;;  %v1869_v46 = vmax.f32 %v1837_v55, 0.0  ;;  %v1753_v54 = vmul.f32 %v4399_v35, %v5226_v50  ;;  %v1752_v12 = vmul.f32 %v4399_v35, %v5223_v43  ;;  %v1868_v58 = vmax.f32 %v1836_v22, 0.0  ;;  %v4340_v43 = vld [vmem:[%s6159_s11 + $0xa0] ss:$8 sps:$4 sm:$0xff]  }
 0x368   : > { %v4401_v49 = vpop.eup %4400  ;;  %2751 = vmatprep.subr.bf16.mxu0 %v4339_v2 }
 0x369   : > { %v1889_v63 = vpack.c.bf16 %v1869_v46, %v1867_v34  ;;  %v1755_v11 = vmul.f32 %v4401_v49, %v5235_v51  ;;  %v1796_v38 = vmul.f32 %v5361_v19, %v1753_v54  ;;  %v1754_v25 = vmul.f32 %v4401_v49, %v5232_v59  ;;  %v4345_v59 = vld [vmem:[%s6159_s11 + $0xb4] ss:$8 sps:$4 sm:$0xff]  }
 0x36a   : > { %v1795_v7 = vmul.f32 %v5358_v53, %v1752_v12  ;;  %v1888_v51 = vpack.c.bf16 %v1868_v58, %v1866_v30  ;;  %v4357_v54 = vld [vmem:[%s6159_s11 + $0xf4] ss:$8 sps:$4 sm:$0xff]   ;;  %v4355_v12 = vld [vmem:[%s6159_s11 + $0xf0] ss:$8 sps:$4 sm:$0xff]   ;;  %v6221_v49 = vpack.c.bf16 %v5273_v0, %v5267_v45  ;;  %v6223_v58 = vpack.c.bf16 %v5285_v14, %v5279_v33 }
 0x36b   : > { %2752 = vmatpush1.bf16.msra.mxu0 %v4337_v57  ;;  %2068 = vmatprep.mubr.bf16.mxu0 %v1889_v63  ;;  %v1798_v50 = vmul.f32 %v5361_v19, %v1755_v11  ;;  %v1839_v23 = vadd.f32 %v5377_v31, %v1796_v38  ;;  %v1797_v3 = vmul.f32 %v5358_v53, %v1754_v25  ;;  %v4354_v57 = vld [vmem:[%s6159_s11 + $0xe4] ss:$8 sps:$4 sm:$0xff]   ;;  %v6226_v45 = vld [vmem:[#allocation4_spill] sm:$0xff]  ;;  %v6232_v30 = vld [vmem:[#allocation5_spill] sm:$0xff] }
 0x36c   : > { %2753 = vmatprep.subr.bf16.mxu0 %v4342_v24  ;;  %v1838_v17 = vadd.f32 %v5370_v39, %v1795_v7  ;;  %v6222_v24 = vpack.c.bf16 %v5269_v60, %v5265_v37  ;;  %v6224_v63 = vpack.c.bf16 %v5281_v40, %v5277_v5  ;;  %v6225_v11 = vpack.c.bf16 %v5297_v47, %v5291_v44  ;;  %v6228_v38 = vld [vmem:[#allocation8_spill] sm:$0xff]  ;;  %v6229_v25 = vld [vmem:[#allocation6_spill] sm:$0xff]  ;;  %v6231_v60 = vld [vmem:[#allocation7_spill] sm:$0xff] }
 0x36d   : > { %v1841_v26 = vadd.f32 %v5377_v31, %v1798_v50  ;;  %v1840_v52 = vadd.f32 %v5370_v39, %v1797_v3  ;;  %v1871_v36 = vmax.f32 %v1839_v23, 0.0  ;;  %v6227_v0 = vpack.c.bf16 %v5293_v1, %v6226_v45  ;;  %v6234_v14 = vld [vmem:[#allocation12_spill] sm:$0xff]  ;;  %v6235_v7 = vld [vmem:[#allocation10_spill] sm:$0xff]  ;;  %v6237_v40 = vld [vmem:[#allocation11_spill] sm:$0xff] }
 0x36e   : > { %v4403_v62 = vpop.eup %4402  ;;  %2069 = vmatmul.mubr.bf16.gmra.mrb[52].mxu0 %v1888_v51  ;;  %v1870_v41 = vmax.f32 %v1838_v17, 0.0  ;;  %v6230_v37 = vpack.c.bf16 %v6228_v38, %v6229_v25  ;;  %v6233_v33 = vpack.c.bf16 %v6231_v60, %v6232_v30  ;;  %v6236_v5 = vpack.c.bf16 %v6234_v14, %v6235_v7  ;;  %v6240_v47 = vld [vmem:[#allocation16_spill] sm:$0xff]  ;;  %v6241_v50 = vld [vmem:[#allocation14_spill] sm:$0xff]  ;;  %v6243_v23 = vld [vmem:[#allocation15_spill] sm:$0xff] }
 0x36f   : > { %2754 = vmatpush1.bf16.msra.mxu0 %v4340_v43  ;;  %v1873_v32 = vmax.f32 %v1841_v26, 0.0  ;;  %v1757_v27 = vmul.f32 %v4403_v62, %v5249_v42  ;;  %v1756_v20 = vmul.f32 %v4403_v62, %v5246_v6  ;;  %v1872_v16 = vmax.f32 %v1840_v52, 0.0  ;;  %v4346_v6 = vld [vmem:[%s6159_s11 + $0xc0] ss:$8 sps:$4 sm:$0xff]   ;;  %v6238_v43 = vld [vmem:[#allocation9_spill] sm:$0xff] }
 0x370   : > { %v4405_v18 = vpop.eup %4404  ;;  %2755 = vmatprep.subr.bf16.mxu0 %v4345_v59  ;;  %v6239_v44 = vpack.c.bf16 %v6237_v40, %v6238_v43  ;;  %v6242_v1 = vpack.c.bf16 %v6240_v47, %v6241_v50  ;;  %v6244_v3 = vld [vmem:[#allocation13_spill] sm:$0xff]  ;;  %v6246_v59 = vld [vmem:[#allocation20_spill] sm:$0xff]  ;;  %v6247_v26 = vld [vmem:[#allocation18_spill] sm:$0xff] }
 0x371   : > { %v1891_v61 = vpack.c.bf16 %v1873_v32, %v1871_v36  ;;  %v1759_v9 = vmul.f32 %v4405_v18, %v5255_v10  ;;  %v1800_v15 = vmul.f32 %v5361_v19, %v1757_v27  ;;  %v1758_v28 = vmul.f32 %v4405_v18, %v5252_v56  ;;  %v4351_v10 = vld [vmem:[%s6159_s11 + $0xd4] ss:$8 sps:$4 sm:$0xff]   ;;  %v6249_v62 = vld [vmem:[#allocation19_spill] sm:$0xff]  ;;  %v6253_v32 = vld [vmem:[#allocation22_spill] sm:$0xff] }
 0x372   : > { %v1799_v21 = vmul.f32 %v5358_v53, %v1756_v20  ;;  %v1890_v2 = vpack.c.bf16 %v1872_v16, %v1870_v41  ;;  %v6245_v51 = vpack.c.bf16 %v6243_v23, %v6244_v3  ;;  %v6248_v52 = vpack.c.bf16 %v6246_v59, %v6247_v26  ;;  %v6250_v17 = vld [vmem:[#allocation17_spill] sm:$0xff]  ;;  %v6252_v36 = vld [vmem:[#allocation24_spill] sm:$0xff]  ;;  %v6255_v20 = vld [vmem:[#allocation23_spill] sm:$0xff] }
 0x373   : > { %2756 = vmatpush1.bf16.msra.mxu0 %v4343_v4  ;;  %2076 = vmatprep.mubr.bf16.mxu0 %v1891_v61  ;;  %v1802_v42 = vmul.f32 %v5361_v19, %v1759_v9  ;;  %v1843_v29 = vadd.f32 %v5377_v31, %v1800_v15  ;;  %v1801_v56 = vmul.f32 %v5358_v53, %v1758_v28  ;;  %v4349_v19 = vld [vmem:[%s6159_s11 + $0xd0] ss:$8 sps:$4 sm:$0xff]   ;;  %v5619_v41 = vld [vmem:[%s6157_s9] ss:$0 sm:$0xff] }
 0x374   : > { %2757 = vmatprep.subr.bf16.mxu0 %v4348_v13  ;;  %v1842_v55 = vadd.f32 %v5370_v39, %v1799_v21  ;;  %v6251_v4 = vpack.c.bf16 %v6249_v62, %v6250_v17  ;;  %v6254_v27 = vpack.c.bf16 %v6252_v36, %v6253_v32  ;;  %v6256_v18 = vld [vmem:[#allocation21_spill] sm:$0xff] }
 0x375   : > { %v1845_v48 = vadd.f32 %v5377_v31, %v1802_v42  ;;  %v1844_v35 = vadd.f32 %v5370_v39, %v1801_v56  ;;  %v1875_v8 = vmax.f32 %v1843_v29, 0.0  ;;  %v4352_v39 = vld [vmem:[%s6159_s11 + $0xe0] ss:$8 sps:$4 sm:$0xff]   ;;  %v6257_v13 = vpack.c.bf16 %v6255_v20, %v6256_v18 }
 0x376   : > { %2077 = vmatmul.mubr.bf16.gmra.mrb[56].mxu0 %v1890_v2  ;;  %v1874_v31 = vmax.f32 %v1842_v55, 0.0 }
 0x377   : > { %2758 = vmatpush1.bf16.msra.mxu0 %v4346_v6  ;;  %v1877_v22 = vmax.f32 %v1845_v48, 0.0  ;;  %v1876_v53 = vmax.f32 %v1844_v35, 0.0 }
 0x378   : > { %2759 = vmatprep.subr.bf16.mxu0 %v4351_v10 }
 0x379   : > { %v1893_v34 = vpack.c.bf16 %v1877_v22, %v1875_v8  ;;  %v1892_v46 = vpack.c.bf16 %v1876_v53, %v1874_v31 }
 0x37b   : > { %2760 = vmatpush1.bf16.msra.mxu0 %v4349_v19  ;;  %2084 = vmatprep.mubr.bf16.mxu0 %v1893_v34 }
 0x37c   : > { %2761 = vmatprep.subr.bf16.mxu0 %v4354_v57 }
 0x37e   : > { %2085 = vmatmul.mubr.bf16.gmra.mrb[60].mxu0 %v1892_v46 }
 0x37f   : > { %2762 = vmatpush1.bf16.msra.mxu0 %v4352_v39  ;;  %2765 = vmatprep.mubr.bf16.mxu0 %v6221_v49 }
 0x380   : > { %2763 = vmatprep.subr.bf16.mxu0 %v4357_v54 }
 0x383   : > { %2764 = vmatpush1.bf16.msra.mxu0 %v4355_v12 }
 0x386   : > { %2766 = vmatmul.mubr.bf16.vlgmr.msra.gmra.mrb[64].mxu0 %v6222_v24 }
 0x387   : > { %2775 = vmatprep.mubr.bf16.mxu0 %v6223_v58 }
 0x38e   : > { %2776 = vmatmul.mubr.bf16.gmra.mrb[68].mxu0 %v6224_v63 }
 0x38f   : > { %2785 = vmatprep.mubr.bf16.mxu0 %v6225_v11 }
 0x396   : > { %2786 = vmatmul.mubr.bf16.gmra.mrb[72].mxu0 %v6227_v0 }
 0x397   : > { %2795 = vmatprep.mubr.bf16.mxu0 %v6230_v37 }
 0x39e   : > { %2796 = vmatmul.mubr.bf16.gmra.mrb[76].mxu0 %v6233_v33 }
 0x39f   : > { %2805 = vmatprep.mubr.bf16.mxu0 %v6236_v5 }
 0x3a6   : > { %2806 = vmatmul.mubr.bf16.gmra.mrb[80].mxu0 %v6239_v44 }
 0x3a7   : > { %2815 = vmatprep.mubr.bf16.mxu0 %v6242_v1 }
 0x3ae   : > { %2816 = vmatmul.mubr.bf16.gmra.mrb[84].mxu0 %v6245_v51 }
 0x3af   : > { %2825 = vmatprep.mubr.bf16.mxu0 %v6248_v52 }
 0x3b6   : > { %2826 = vmatmul.mubr.bf16.gmra.mrb[88].mxu0 %v6251_v4 }
 0x3b7   : > { %2835 = vmatprep.mubr.bf16.mxu0 %v6254_v27 }
 0x3be   : > { %2836 = vmatmul.mubr.bf16.gmra.mrb[92].mxu0 %v6257_v13 }
 0x419   : > { %v4006_v16 = vpop.f32.mrb[32].mxu0 }
 0x41a   : > { %v4007_v61 = vpop.f32.mrb[33].mxu0 }
 0x41b   : > { %v4008_v9 = vadd.f32 %v4007_v61, %v4006_v16  ;;  %v4009_v15 = vpop.f32.mrb[34].mxu0 }
 0x41c   : > { %v4010_v28 = vpop.f32.mrb[35].mxu0 }
 0x41d   : > { %v4011_v21 = vadd.f32 %v4010_v28, %v4009_v15  ;;  %v2031_v6 = vadd.f32 %v4008_v9, %v5619_v41  ;;  %v2237_v28 = vld [vmem:[%s6160_s12] sm:$0x3] }
 0x41f   : > { %v2034_v42 = vadd.f32 %v4011_v21, %v5619_v41 }
 0x421   : > { %v3899_v29 = vpack.c.bf16 %v2034_v42, %v2031_v6  ;;  %v4012_v2 = vpop.f32.mrb[36].mxu0  ;;  %v6258_v42 = vld [vmem:[#allocation2_spill] sm:$0xff] }
 0x422   : > { %v4013_v10 = vpop.f32.mrb[37].mxu0 }
 0x423   : > { %3900 = vst [vmem:[%s5627_s1] sm:$0xff] %v3899_v29   ;;  %v4014_v56 = vadd.f32 %v4013_v10, %v4012_v2  ;;  %v4015_v48 = vpop.f32.mrb[38].mxu0  ;;  %v5652_v29 = vrot.slane %v2237_v28, %v6258_v42 }
 0x424   : > { %v4016_v55 = vpop.f32.mrb[39].mxu0 }
 0x425   : > { %v4017_v35 = vadd.f32 %v4016_v55, %v4015_v48  ;;  %v2039_v19 = vadd.f32 %v4014_v56, %v5619_v41  ;;  %v6259_v56 = vld [vmem:[#allocation3_spill] sm:$0xff] }
 0x426   : > { %v5657_v48 = vrot.slane %v2237_v28, %v6259_v56 }
 0x427   : > { %v2042_v8 = vadd.f32 %v4017_v35, %v5619_v41 }
 0x429   : > { %v3904_v22 = vpack.c.bf16 %v2042_v8, %v2039_v19  ;;  %v4018_v57 = vpop.f32.mrb[40].mxu0 }
 0x42a   : > { %v4019_v53 = vpop.f32.mrb[41].mxu0 }
 0x42b   : > { %3976 = vst [vmem:[%s5627_s1 + $0x8] sm:$0xff] %v3904_v22   ;;  %v4020_v34 = vadd.f32 %v4019_v53, %v4018_v57  ;;  %v4021_v31 = vpop.f32.mrb[42].mxu0 }
 0x42c   : > { %v4022_v39 = vpop.f32.mrb[43].mxu0 }
 0x42d   : > { %v4023_v46 = vadd.f32 %v4022_v39, %v4021_v31  ;;  %v2047_v54 = vadd.f32 %v4020_v34, %v5619_v41 }
 0x42f   : > { %v2050_v12 = vadd.f32 %v4023_v46, %v5619_v41 }
 0x431   : > { %v3909_v49 = vpack.c.bf16 %v2050_v12, %v2047_v54  ;;  %v4024_v24 = vpop.f32.mrb[44].mxu0 }
 0x432   : > { %v4025_v58 = vpop.f32.mrb[45].mxu0 }
 0x433   : > { %3977 = vst [vmem:[%s5627_s1 + $0x10] sm:$0xff] %v3909_v49   ;;  %v4026_v63 = vadd.f32 %v4025_v58, %v4024_v24  ;;  %v4027_v11 = vpop.f32.mrb[46].mxu0 }
 0x434   : > { %v4028_v45 = vpop.f32.mrb[47].mxu0 }
 0x435   : > { %v4029_v0 = vadd.f32 %v4028_v45, %v4027_v11  ;;  %v2055_v38 = vadd.f32 %v4026_v63, %v5619_v41 }
 0x437   : > { %v2058_v25 = vadd.f32 %v4029_v0, %v5619_v41 }
 0x439   : > { %v3914_v37 = vpack.c.bf16 %v2058_v25, %v2055_v38  ;;  %v4030_v60 = vpop.f32.mrb[48].mxu0 }
 0x43a   : > { %v4031_v30 = vpop.f32.mrb[49].mxu0 }
 0x43b   : > { %3978 = vst [vmem:[%s5627_s1 + $0x18] sm:$0xff] %v3914_v37   ;;  %v4032_v33 = vadd.f32 %v4031_v30, %v4030_v60  ;;  %v4033_v14 = vpop.f32.mrb[50].mxu0 }
 0x43c   : > { %v4034_v7 = vpop.f32.mrb[51].mxu0 }
 0x43d   : > { %v4035_v5 = vadd.f32 %v4034_v7, %v4033_v14  ;;  %v2063_v40 = vadd.f32 %v4032_v33, %v5619_v41 }
 0x43f   : > { %v2066_v43 = vadd.f32 %v4035_v5, %v5619_v41 }
 0x441   : > { %v3919_v44 = vpack.c.bf16 %v2066_v43, %v2063_v40  ;;  %v4036_v47 = vpop.f32.mrb[52].mxu0 }
 0x442   : > { %v4037_v50 = vpop.f32.mrb[53].mxu0 }
 0x443   : > { %3979 = vst [vmem:[%s5627_s1 + $0x20] sm:$0xff] %v3919_v44   ;;  %v4038_v1 = vadd.f32 %v4037_v50, %v4036_v47  ;;  %v4039_v23 = vpop.f32.mrb[54].mxu0 }
 0x444   : > { %v4040_v3 = vpop.f32.mrb[55].mxu0 }
 0x445   : > { %v4041_v51 = vadd.f32 %v4040_v3, %v4039_v23  ;;  %v2071_v59 = vadd.f32 %v4038_v1, %v5619_v41 }
 0x447   : > { %v2074_v26 = vadd.f32 %v4041_v51, %v5619_v41 }
 0x449   : > { %v3924_v52 = vpack.c.bf16 %v2074_v26, %v2071_v59  ;;  %v4042_v62 = vpop.f32.mrb[56].mxu0 }
 0x44a   : > { %v4043_v17 = vpop.f32.mrb[57].mxu0 }
 0x44b   : > { %3980 = vst [vmem:[%s5627_s1 + $0x28] sm:$0xff] %v3924_v52   ;;  %v4044_v4 = vadd.f32 %v4043_v17, %v4042_v62  ;;  %v4045_v36 = vpop.f32.mrb[58].mxu0 }
 0x44c   : > { %v4046_v32 = vpop.f32.mrb[59].mxu0 }
 0x44d   : > { %v4047_v27 = vadd.f32 %v4046_v32, %v4045_v36  ;;  %v2079_v20 = vadd.f32 %v4044_v4, %v5619_v41 }
 0x44f   : > { %v2082_v18 = vadd.f32 %v4047_v27, %v5619_v41 }
 0x451   : > { %v3929_v13 = vpack.c.bf16 %v2082_v18, %v2079_v20  ;;  %v4048_v16 = vpop.f32.mrb[60].mxu0 }
 0x452   : > { %v4049_v61 = vpop.f32.mrb[61].mxu0 }
 0x453   : > { %3981 = vst [vmem:[%s5627_s1 + $0x30] sm:$0xff] %v3929_v13   ;;  %v4050_v9 = vadd.f32 %v4049_v61, %v4048_v16  ;;  %v4051_v15 = vpop.f32.mrb[62].mxu0 }
 0x454   : > { %v4052_v21 = vpop.f32.mrb[63].mxu0 }
 0x455   : > { %v4053_v6 = vadd.f32 %v4052_v21, %v4051_v15  ;;  %v2087_v2 = vadd.f32 %v4050_v9, %v5619_v41 }
 0x457   : > { %v2090_v10 = vadd.f32 %v4053_v6, %v5619_v41 }
 0x459   : > { %v3934_v55 = vpack.c.bf16 %v2090_v10, %v2087_v2  ;;  %v2767_v35 = vpop.f32.mrb[64].mxu0 }
 0x45a   : > { %v5660_v19 = vadd.f32 %v2767_v35, %v5652_v29  ;;  %v2769_v8 = vpop.f32.mrb[65].mxu0 }
 0x45b   : > { %3982 = vst [vmem:[%s5627_s1 + $0x38] sm:$0xff] %v3934_v55   ;;  %v5664_v22 = vadd.f32 %v2769_v8, %v5657_v48  ;;  %v2771_v57 = vpop.f32.mrb[66].mxu0 }
 0x45c   : > { %v5667_v53 = vadd.f32 %v2771_v57, %v5652_v29  ;;  %v2773_v34 = vpop.f32.mrb[67].mxu0 }
 0x45d   : > { %v5670_v41 = vadd.f32 %v2773_v34, %v5657_v48  ;;  %v2846_v31 = vadd.f32 %v5664_v22, %v5660_v19 }
 0x45f   : > { %2847 = vadd.xlane.f32.xlu0 %v2846_v31  ;;  %v2849_v39 = vadd.f32 %v5670_v41, %v5667_v53 }
 0x461   : > { %v2777_v46 = vpop.f32.mrb[68].mxu0  ;;  %2850 = vadd.xlane.f32.xlu1 %v2849_v39 }
 0x462   : > { %v5677_v54 = vadd.f32 %v2777_v46, %v5652_v29  ;;  %v2779_v12 = vpop.f32.mrb[69].mxu0 }
 0x463   : > { %v5680_v49 = vadd.f32 %v2779_v12, %v5657_v48  ;;  %v2781_v24 = vpop.f32.mrb[70].mxu0 }
 0x464   : > { %v5683_v58 = vadd.f32 %v2781_v24, %v5652_v29  ;;  %v2783_v63 = vpop.f32.mrb[71].mxu0 }
 0x465   : > { %v5686_v11 = vadd.f32 %v2783_v63, %v5657_v48  ;;  %v2852_v45 = vadd.f32 %v5680_v49, %v5677_v54 }
 0x467   : > { %2853 = vadd.xlane.f32.xlu0 %v2852_v45  ;;  %v2855_v0 = vadd.f32 %v5686_v11, %v5683_v58 }
 0x469   : > { %v2787_v38 = vpop.f32.mrb[72].mxu0  ;;  %2856 = vadd.xlane.f32.xlu1 %v2855_v0 }
 0x46a   : > { %v5693_v25 = vadd.f32 %v2787_v38, %v5652_v29  ;;  %v2789_v37 = vpop.f32.mrb[73].mxu0 }
 0x46b   : > { %v5696_v60 = vadd.f32 %v2789_v37, %v5657_v48  ;;  %v2791_v30 = vpop.f32.mrb[74].mxu0 }
 0x46c   : > { %v5699_v33 = vadd.f32 %v2791_v30, %v5652_v29  ;;  %v2793_v14 = vpop.f32.mrb[75].mxu0 }
 0x46d   : > { %v5702_v7 = vadd.f32 %v2793_v14, %v5657_v48  ;;  %v2858_v5 = vadd.f32 %v5696_v60, %v5693_v25 }
 0x46f   : > { %2859 = vadd.xlane.f32.xlu0 %v2858_v5  ;;  %v2861_v40 = vadd.f32 %v5702_v7, %v5699_v33 }
 0x471   : > { %v2797_v43 = vpop.f32.mrb[76].mxu0  ;;  %2862 = vadd.xlane.f32.xlu1 %v2861_v40 }
 0x472   : > { %v5709_v44 = vadd.f32 %v2797_v43, %v5652_v29  ;;  %v2799_v47 = vpop.f32.mrb[77].mxu0 }
 0x473   : > { %v5712_v50 = vadd.f32 %v2799_v47, %v5657_v48  ;;  %v2801_v1 = vpop.f32.mrb[78].mxu0 }
 0x474   : > { %v5715_v23 = vadd.f32 %v2801_v1, %v5652_v29  ;;  %v2803_v3 = vpop.f32.mrb[79].mxu0  ;;  %v4358_v1 = vld [vmem:[%s6163_s15 + $0x40] sm:$0xff]  }
 0x475   : > { %v5718_v51 = vadd.f32 %v2803_v3, %v5657_v48  ;;  %v2864_v59 = vadd.f32 %v5712_v50, %v5709_v44  ;;  %4054 = vmatprep.subr.bf16.mxu1 %v4358_v1  ;;  %v4361_v3 = vld [vmem:[%s6163_s15 + $0x8] sm:$0xff]  }
 0x477   : > { %2865 = vadd.xlane.f32.xlu0 %v2864_v59  ;;  %v2867_v26 = vadd.f32 %v5718_v51, %v5715_v23  ;;  %v4362_v59 = vld [vmem:[%s6163_s15 + $0x50] sm:$0xff]  }
 0x479   : > { %v2807_v52 = vpop.f32.mrb[80].mxu0  ;;  %2868 = vadd.xlane.f32.xlu1 %v2867_v26  ;;  %v4363_v26 = vld [vmem:[%s6163_s15 + $0x10] sm:$0xff]  }
 0x47a   : > { %v5725_v62 = vadd.f32 %v2807_v52, %v5652_v29  ;;  %v2809_v17 = vpop.f32.mrb[81].mxu0  ;;  %v4364_v52 = vld [vmem:[%s6163_s15 + $0x58] sm:$0xff]  }
 0x47b   : > { %v5728_v4 = vadd.f32 %v2809_v17, %v5657_v48  ;;  %v2811_v36 = vpop.f32.mrb[82].mxu0  ;;  %v4365_v17 = vld [vmem:[%s6163_s15 + $0x18] sm:$0xff]  }
 0x47c   : > { %v5731_v32 = vadd.f32 %v2811_v36, %v5652_v29  ;;  %v2813_v27 = vpop.f32.mrb[83].mxu0  ;;  %v4366_v36 = vld [vmem:[%s6163_s15 + $0x60] sm:$0xff]  }
 0x47d   : > { %v5734_v20 = vadd.f32 %v2813_v27, %v5657_v48  ;;  %v2870_v18 = vadd.f32 %v5728_v4, %v5725_v62  ;;  %v4367_v27 = vld [vmem:[%s6163_s15 + $0x20] sm:$0xff]  }
 0x47f   : > { %2871 = vadd.xlane.f32.xlu0 %v2870_v18  ;;  %v2873_v13 = vadd.f32 %v5734_v20, %v5731_v32 }
 0x481   : > { %v2817_v16 = vpop.f32.mrb[84].mxu0  ;;  %2874 = vadd.xlane.f32.xlu1 %v2873_v13 }
 0x482   : > { %v5741_v61 = vadd.f32 %v2817_v16, %v5652_v29  ;;  %v2819_v9 = vpop.f32.mrb[85].mxu0 }
 0x483   : > { %v5744_v15 = vadd.f32 %v2819_v9, %v5657_v48  ;;  %v2821_v28 = vpop.f32.mrb[86].mxu0 }
 0x484   : > { %v5747_v21 = vadd.f32 %v2821_v28, %v5652_v29  ;;  %v2823_v6 = vpop.f32.mrb[87].mxu0 }
 0x485   : > { %v5750_v2 = vadd.f32 %v2823_v6, %v5657_v48  ;;  %v2876_v10 = vadd.f32 %v5744_v15, %v5741_v61 }
 0x487   : > { %2877 = vadd.xlane.f32.xlu0 %v2876_v10  ;;  %v2879_v55 = vadd.f32 %v5750_v2, %v5747_v21 }
 0x489   : > { %v2827_v35 = vpop.f32.mrb[88].mxu0  ;;  %2880 = vadd.xlane.f32.xlu1 %v2879_v55 }
 0x48a   : > { %v5757_v8 = vadd.f32 %v2827_v35, %v5652_v29  ;;  %v2829_v57 = vpop.f32.mrb[89].mxu0 }
 0x48b   : > { %v5760_v34 = vadd.f32 %v2829_v57, %v5657_v48  ;;  %v2831_v31 = vpop.f32.mrb[90].mxu0 }
 0x48c   : > { %v5763_v39 = vadd.f32 %v2831_v31, %v5652_v29  ;;  %v2833_v46 = vpop.f32.mrb[91].mxu0 }
 0x48d   : > { %v5766_v12 = vadd.f32 %v2833_v46, %v5657_v48  ;;  %v2882_v24 = vadd.f32 %v5760_v34, %v5757_v8 }
 0x48f   : > { %2883 = vadd.xlane.f32.xlu0 %v2882_v24  ;;  %v2885_v63 = vadd.f32 %v5766_v12, %v5763_v39 }
 0x491   : > { %v2837_v45 = vpop.f32.mrb[92].mxu0  ;;  %2886 = vadd.xlane.f32.xlu1 %v2885_v63 }
 0x492   : > { %v5773_v0 = vadd.f32 %v2837_v45, %v5652_v29  ;;  %v2839_v38 = vpop.f32.mrb[93].mxu0 }
 0x493   : > { %v5776_v37 = vadd.f32 %v2839_v38, %v5657_v48  ;;  %v2841_v30 = vpop.f32.mrb[94].mxu0 }
 0x494   : > { %v5779_v14 = vadd.f32 %v2841_v30, %v5652_v29  ;;  %v2843_v5 = vpop.f32.mrb[95].mxu0  ;;  %v4359_v29 = vld [vmem:[%s6163_s15] sm:$0xff]  }
 0x495   : > { %v5782_v40 = vadd.f32 %v2843_v5, %v5657_v48  ;;  %v2888_v43 = vadd.f32 %v5776_v37, %v5773_v0  ;;  %v4360_v48 = vld [vmem:[%s6163_s15 + $0x48] sm:$0xff]   ;;  %4055 = vmatpush3.bf16.msra.mxu1 %v4359_v29 }
 0x496   : > { %4056 = vmatprep.subr.bf16.mxu1 %v4360_v48 }
 0x497   : > { %2889 = vadd.xlane.f32.xlu0 %v2888_v43  ;;  %v2891_v47 = vadd.f32 %v5782_v40, %v5779_v14 }
 0x499   : > { %2892 = vadd.xlane.f32.xlu1 %v2891_v47  ;;  %4057 = vmatpush3.bf16.msra.mxu1 %v4361_v3 }
 0x49a   : > { %4058 = vmatprep.subr.bf16.mxu1 %v4362_v59 }
 0x49d   : > { %4059 = vmatpush3.bf16.msra.mxu1 %v4363_v26 }
 0x49e   : > { %4060 = vmatprep.subr.bf16.mxu1 %v4364_v52 }
 0x4a1   : > { %4061 = vmatpush3.bf16.msra.mxu1 %v4365_v17 }
 0x4a2   : > { %4062 = vmatprep.subr.bf16.mxu1 %v4366_v36 }
 0x4a5   : > { %4063 = vmatpush3.bf16.msra.mxu1 %v4367_v27 }
 0x4ec   : > { %v2848_v18 = vpop.xlane.xlu0 %2847 }
 0x4ed   : > { %v2894_v13 = vmul.f32 0.00390625, %v2848_v18 }
 0x4ee   : > { %v2851_v16 = vpop.xlane.xlu1 %2850 }
 0x4ef   : > { %v5819_v9 = vsub.f32 %v5660_v19, %v2894_v13  ;;  %v5822_v28 = vsub.f32 %v5664_v22, %v2894_v13  ;;  %v2895_v6 = vmul.f32 0.00390625, %v2851_v16 }
 0x4f1   : > { %v5825_v10 = vsub.f32 %v5667_v53, %v2895_v6  ;;  %v5828_v55 = vsub.f32 %v5670_v41, %v2895_v6  ;;  %v2942_v35 = vmul.f32 %v5819_v9, %v5819_v9  ;;  %v2943_v57 = vmul.f32 %v5822_v28, %v5822_v28 }
 0x4f3   : > { %v2974_v31 = vadd.f32 %v2943_v57, %v2942_v35  ;;  %v2944_v19 = vmul.f32 %v5825_v10, %v5825_v10  ;;  %v2945_v22 = vmul.f32 %v5828_v55, %v5828_v55 }
 0x4f4   : > { %v2854_v46 = vpop.xlane.xlu0 %2853 }
 0x4f5   : > { %v2896_v24 = vmul.f32 0.00390625, %v2854_v46  ;;  %2975 = vadd.xlane.f32.xlu0 %v2974_v31  ;;  %v2977_v53 = vadd.f32 %v2945_v22, %v2944_v19 }
 0x4f6   : > { %v2857_v63 = vpop.xlane.xlu1 %2856 }
 0x4f7   : > { %v5839_v41 = vsub.f32 %v5677_v54, %v2896_v24  ;;  %v5842_v45 = vsub.f32 %v5680_v49, %v2896_v24  ;;  %v2897_v38 = vmul.f32 0.00390625, %v2857_v63  ;;  %2978 = vadd.xlane.f32.xlu1 %v2977_v53 }
 0x4f9   : > { %v5845_v30 = vsub.f32 %v5683_v58, %v2897_v38  ;;  %v5848_v5 = vsub.f32 %v5686_v11, %v2897_v38  ;;  %v2946_v43 = vmul.f32 %v5839_v41, %v5839_v41  ;;  %v2947_v47 = vmul.f32 %v5842_v45, %v5842_v45 }
 0x4fb   : > { %v2980_v1 = vadd.f32 %v2947_v47, %v2946_v43  ;;  %v2948_v54 = vmul.f32 %v5845_v30, %v5845_v30  ;;  %v2949_v49 = vmul.f32 %v5848_v5, %v5848_v5 }
 0x4fc   : > { %v2860_v29 = vpop.xlane.xlu0 %2859 }
 0x4fd   : > { %v2898_v48 = vmul.f32 0.00390625, %v2860_v29  ;;  %2981 = vadd.xlane.f32.xlu0 %v2980_v1  ;;  %v2983_v58 = vadd.f32 %v2949_v49, %v2948_v54 }
 0x4fe   : > { %v2863_v3 = vpop.xlane.xlu1 %2862 }
 0x4ff   : > { %v5859_v11 = vsub.f32 %v5693_v25, %v2898_v48  ;;  %v5862_v59 = vsub.f32 %v5696_v60, %v2898_v48  ;;  %v2899_v26 = vmul.f32 0.00390625, %v2863_v3  ;;  %2984 = vadd.xlane.f32.xlu1 %v2983_v58 }
 0x501   : > { %v5865_v52 = vsub.f32 %v5699_v33, %v2899_v26  ;;  %v5868_v17 = vsub.f32 %v5702_v7, %v2899_v26  ;;  %v2950_v36 = vmul.f32 %v5859_v11, %v5859_v11  ;;  %v2951_v27 = vmul.f32 %v5862_v59, %v5862_v59 }
 0x503   : > { %v2986_v18 = vadd.f32 %v2951_v27, %v2950_v36  ;;  %v2952_v25 = vmul.f32 %v5865_v52, %v5865_v52  ;;  %v2953_v60 = vmul.f32 %v5868_v17, %v5868_v17  ;;  %v4370_v27 = vld [vmem:[%s6163_s15 + $0x70] sm:$0xff]  }
 0x504   : > { %v2866_v13 = vpop.xlane.xlu0 %2865 }
 0x505   : > { %v2900_v16 = vmul.f32 0.00390625, %v2866_v13  ;;  %2987 = vadd.xlane.f32.xlu0 %v2986_v18  ;;  %v2989_v33 = vadd.f32 %v2953_v60, %v2952_v25  ;;  %v4371_v18 = vld [vmem:[%s6163_s15 + $0x30] sm:$0xff]  }
 0x506   : > { %v2869_v6 = vpop.xlane.xlu1 %2868 }
 0x507   : > { %v5879_v7 = vsub.f32 %v5709_v44, %v2900_v16  ;;  %v5882_v35 = vsub.f32 %v5712_v50, %v2900_v16  ;;  %v2901_v57 = vmul.f32 0.00390625, %v2869_v6  ;;  %2990 = vadd.xlane.f32.xlu1 %v2989_v33 }
 0x509   : > { %v5885_v31 = vsub.f32 %v5715_v23, %v2901_v57  ;;  %v5888_v19 = vsub.f32 %v5718_v51, %v2901_v57  ;;  %v2954_v22 = vmul.f32 %v5879_v7, %v5879_v7  ;;  %v2955_v46 = vmul.f32 %v5882_v35, %v5882_v35 }
 0x50b   : > { %v2992_v24 = vadd.f32 %v2955_v46, %v2954_v22  ;;  %v2956_v44 = vmul.f32 %v5885_v31, %v5885_v31  ;;  %v2957_v50 = vmul.f32 %v5888_v19, %v5888_v19 }
 0x50c   : > { %v2872_v53 = vpop.xlane.xlu0 %2871 }
 0x50d   : > { %v2902_v63 = vmul.f32 0.00390625, %v2872_v53  ;;  %2993 = vadd.xlane.f32.xlu0 %v2992_v24  ;;  %v2995_v23 = vadd.f32 %v2957_v50, %v2956_v44 }
 0x50e   : > { %v2875_v38 = vpop.xlane.xlu1 %2874 }
 0x50f   : > { %v5899_v51 = vsub.f32 %v5725_v62, %v2902_v63  ;;  %v5902_v43 = vsub.f32 %v5728_v4, %v2902_v63  ;;  %v2903_v47 = vmul.f32 0.00390625, %v2875_v38  ;;  %2996 = vadd.xlane.f32.xlu1 %v2995_v23  ;;  %v4368_v62 = vld [vmem:[%s6163_s15 + $0x68] sm:$0xff]  }
 0x510   : > { %4064 = vmatprep.subr.bf16.mxu1 %v4368_v62 }
 0x511   : > { %v5905_v1 = vsub.f32 %v5731_v32, %v2903_v47  ;;  %v5908_v54 = vsub.f32 %v5734_v20, %v2903_v47  ;;  %v2958_v49 = vmul.f32 %v5899_v51, %v5899_v51  ;;  %v2959_v29 = vmul.f32 %v5902_v43, %v5902_v43  ;;  %v4369_v20 = vld [vmem:[%s6163_s15 + $0x28] sm:$0xff]  }
 0x512   : > { %4065 = vmatpush3.bf16.msra.mxu1 %v4369_v20 }
 0x513   : > { %v2998_v4 = vadd.f32 %v2959_v29, %v2958_v49  ;;  %v2960_v48 = vmul.f32 %v5905_v1, %v5905_v1  ;;  %v2961_v32 = vmul.f32 %v5908_v54, %v5908_v54  ;;  %4066 = vmatprep.subr.bf16.mxu1 %v4370_v27 }
 0x514   : > { %v2878_v58 = vpop.xlane.xlu0 %2877 }
 0x515   : > { %v2904_v3 = vmul.f32 0.00390625, %v2878_v58  ;;  %2999 = vadd.xlane.f32.xlu0 %v2998_v4  ;;  %v3001_v26 = vadd.f32 %v2961_v32, %v2960_v48 }
 0x516   : > { %v2881_v36 = vpop.xlane.xlu1 %2880  ;;  %4067 = vmatpush3.bf16.msra.mxu1 %v4371_v18 }
 0x517   : > { %v5931_v25 = vsub.f32 %v5741_v61, %v2904_v3  ;;  %v5934_v60 = vsub.f32 %v5744_v15, %v2904_v3  ;;  %v2905_v13 = vmul.f32 0.00390625, %v2881_v36  ;;  %3002 = vadd.xlane.f32.xlu1 %v3001_v26  ;;  %v4372_v61 = vld [vmem:[%s6163_s15 + $0x78] sm:$0xff]  }
 0x518   : > { %v4373_v15 = vld [vmem:[%s6163_s15 + $0x38] sm:$0xff]   ;;  %4068 = vmatprep.subr.bf16.mxu1 %v4372_v61 }
 0x519   : > { %v5937_v16 = vsub.f32 %v5747_v21, %v2905_v13  ;;  %v5940_v33 = vsub.f32 %v5750_v2, %v2905_v13  ;;  %v2962_v6 = vmul.f32 %v5931_v25, %v5931_v25  ;;  %v2963_v57 = vmul.f32 %v5934_v60, %v5934_v60 }
 0x51a   : > { %4069 = vmatpush3.bf16.msra.mxu1 %v4373_v15 }
 0x51b   : > { %v3004_v21 = vadd.f32 %v2963_v57, %v2962_v6  ;;  %v2964_v2 = vmul.f32 %v5937_v16, %v5937_v16  ;;  %v2965_v22 = vmul.f32 %v5940_v33, %v5940_v33 }
 0x51c   : > { %v2884_v46 = vpop.xlane.xlu0 %2883 }
 0x51d   : > { %v2906_v24 = vmul.f32 0.00390625, %v2884_v46  ;;  %3005 = vadd.xlane.f32.xlu0 %v3004_v21  ;;  %v3007_v44 = vadd.f32 %v2965_v22, %v2964_v2  ;;  %v2238_v46 = vld [vmem:[%s6161_s13] sm:$0x3] }
 0x51e   : > { %v2887_v50 = vpop.xlane.xlu1 %2886 }
 0x51f   : > { %v5957_v53 = vsub.f32 %v5757_v8, %v2906_v24  ;;  %v5960_v63 = vsub.f32 %v5760_v34, %v2906_v24  ;;  %v2907_v23 = vmul.f32 0.00390625, %v2887_v50  ;;  %3008 = vadd.xlane.f32.xlu1 %v3007_v44 }
 0x521   : > { %v5963_v38 = vsub.f32 %v5763_v39, %v2907_v23  ;;  %v5966_v47 = vsub.f32 %v5766_v12, %v2907_v23  ;;  %v2966_v49 = vmul.f32 %v5957_v53, %v5957_v53  ;;  %v2967_v29 = vmul.f32 %v5960_v63, %v5960_v63  ;;  %v2239_v23 = vld [vmem:[%s6162_s14] sm:$0x3] }
 0x523   : > { %v3010_v62 = vadd.f32 %v2967_v29, %v2966_v49  ;;  %v2968_v8 = vmul.f32 %v5963_v38, %v5963_v38  ;;  %v2969_v34 = vmul.f32 %v5966_v47, %v5966_v47  ;;  %v6003_v49 = vrot.slane %v2238_v46, %v6258_v42 }
 0x524   : > { %v2890_v4 = vpop.xlane.xlu0 %2889  ;;  %v6006_v29 = vrot.slane %v2238_v46, %v6259_v56 }
 0x525   : > { %v2908_v48 = vmul.f32 0.00390625, %v2890_v4  ;;  %3011 = vadd.xlane.f32.xlu0 %v3010_v62  ;;  %v3013_v39 = vadd.f32 %v2969_v34, %v2968_v8 }
 0x526   : > { %v2893_v32 = vpop.xlane.xlu1 %2892 }
 0x527   : > { %v5977_v12 = vsub.f32 %v5773_v0, %v2908_v48  ;;  %v5980_v20 = vsub.f32 %v5776_v37, %v2908_v48  ;;  %v2909_v58 = vmul.f32 0.00390625, %v2893_v32  ;;  %3014 = vadd.xlane.f32.xlu1 %v3013_v39  ;;  %v6011_v48 = vrot.slane %v2239_v23, %v6258_v42 }
 0x528   : > { %v6014_v39 = vrot.slane %v2239_v23, %v6259_v56 }
 0x529   : > { %v5983_v3 = vsub.f32 %v5779_v14, %v2909_v58  ;;  %v5986_v26 = vsub.f32 %v5782_v40, %v2909_v58  ;;  %v2970_v36 = vmul.f32 %v5977_v12, %v5977_v12  ;;  %v2971_v27 = vmul.f32 %v5980_v20, %v5980_v20 }
 0x52b   : > { %v3016_v18 = vadd.f32 %v2971_v27, %v2970_v36  ;;  %v2972_v0 = vmul.f32 %v5983_v3, %v5983_v3  ;;  %v2973_v37 = vmul.f32 %v5986_v26, %v5986_v26 }
 0x52d   : > { %3017 = vadd.xlane.f32.xlu0 %v3016_v18  ;;  %v3019_v13 = vadd.f32 %v2973_v37, %v2972_v0 }
 0x52f   : > { %3020 = vadd.xlane.f32.xlu1 %v3019_v13 }
 0x582   : > { %v2976_v14 = vpop.xlane.xlu0 %2975 }
 0x583   : > { %v3022_v6 = vmul.f32 0.00390625, %v2976_v14 }
 0x584   : > { %v2979_v40 = vpop.xlane.xlu1 %2978 }
 0x585   : > { %v3038_v57 = vadd.f32 1e-05, %v3022_v6  ;;  %v3023_v61 = vmul.f32 0.00390625, %v2979_v40 }
 0x587   : > { %4406 = vrsqrt.f32 %v3038_v57  ;;  %v3039_v15 = vadd.f32 1e-05, %v3023_v61 }
 0x589   : > { %4408 = vrsqrt.f32 %v3039_v15 }
 0x58a   : > { %v2982_v21 = vpop.xlane.xlu0 %2981 }
 0x58b   : > { %v3024_v2 = vmul.f32 0.00390625, %v2982_v21 }
 0x58c   : > { %v2985_v22 = vpop.xlane.xlu1 %2984 }
 0x58d   : > { %v3040_v24 = vadd.f32 1e-05, %v3024_v2  ;;  %v3025_v44 = vmul.f32 0.00390625, %v2985_v22 }
 0x58f   : > { %4410 = vrsqrt.f32 %v3040_v24  ;;  %v3041_v50 = vadd.f32 1e-05, %v3025_v44 }
 0x591   : > { %v4407_v62 = vpop.eup %4406  ;;  %4412 = vrsqrt.f32 %v3041_v50 }
 0x592   : > { %v3070_v8 = vmul.f32 %v4407_v62, %v5819_v9  ;;  %v2988_v34 = vpop.xlane.xlu0 %2987  ;;  %v3071_v4 = vmul.f32 %v4407_v62, %v5822_v28 }
 0x593   : > { %v4409_v32 = vpop.eup %4408  ;;  %v3026_v58 = vmul.f32 0.00390625, %v2988_v34 }
 0x594   : > { %v3113_v36 = vmul.f32 %v6003_v49, %v3070_v8  ;;  %v3072_v27 = vmul.f32 %v4409_v32, %v5825_v10  ;;  %v2991_v18 = vpop.xlane.xlu1 %2990  ;;  %v3073_v0 = vmul.f32 %v4409_v32, %v5828_v55  ;;  %v3114_v9 = vmul.f32 %v6006_v29, %v3071_v4 }
 0x595   : > { %v3042_v37 = vadd.f32 1e-05, %v3026_v58  ;;  %v3027_v13 = vmul.f32 0.00390625, %v2991_v18 }
 0x596   : > { %v3115_v28 = vmul.f32 %v6003_v49, %v3072_v27  ;;  %v3116_v42 = vmul.f32 %v6006_v29, %v3073_v0  ;;  %v3157_v56 = vadd.f32 %v6014_v39, %v3114_v9  ;;  %v3156_v14 = vadd.f32 %v6011_v48, %v3113_v36 }
 0x597   : > { %4414 = vrsqrt.f32 %v3042_v37  ;;  %v3043_v6 = vadd.f32 1e-05, %v3027_v13 }
 0x598   : > { %v3159_v40 = vadd.f32 %v6014_v39, %v3116_v42  ;;  %v3158_v10 = vadd.f32 %v6011_v48, %v3115_v28  ;;  %v3189_v55 = vmax.f32 %v3157_v56, 0.0  ;;  %v3188_v61 = vmax.f32 %v3156_v14, 0.0 }
 0x599   : > { %v4411_v57 = vpop.eup %4410  ;;  %4416 = vrsqrt.f32 %v3043_v6 }
 0x59a   : > { %v2994_v15 = vpop.xlane.xlu0 %2993  ;;  %v3191_v21 = vmax.f32 %v3159_v40, 0.0  ;;  %v3190_v2 = vmax.f32 %v3158_v10, 0.0  ;;  %v3075_v22 = vmul.f32 %v4411_v57, %v5842_v45  ;;  %v3074_v46 = vmul.f32 %v4411_v57, %v5839_v41 }
 0x59b   : > { %v4413_v24 = vpop.eup %4412  ;;  %v3028_v44 = vmul.f32 0.00390625, %v2994_v15 }
 0x59c   : > { %v2997_v50 = vpop.xlane.xlu1 %2996  ;;  %v3221_v23 = vpack.c.bf16 %v3191_v21, %v3189_v55  ;;  %v3220_v62 = vpack.c.bf16 %v3190_v2, %v3188_v61  ;;  %v3077_v8 = vmul.f32 %v4413_v24, %v5848_v5  ;;  %v3118_v34 = vmul.f32 %v6006_v29, %v3075_v22 }
 0x59d   : > { %v3044_v4 = vadd.f32 1e-05, %v3028_v44  ;;  %v3029_v32 = vmul.f32 0.00390625, %v2997_v50  ;;  %v3076_v58 = vmul.f32 %v4413_v24, %v5845_v30  ;;  %v3117_v36 = vmul.f32 %v6003_v49, %v3074_v46 }
 0x59e   : > { %3370 = vmatprep.mubr.bf16.mxu1 %v3221_v23  ;;  %v3120_v45 = vmul.f32 %v6006_v29, %v3077_v8  ;;  %v3161_v41 = vadd.f32 %v6014_v39, %v3118_v34 }
 0x59f   : > { %4418 = vrsqrt.f32 %v3044_v4  ;;  %v3045_v27 = vadd.f32 1e-05, %v3029_v32  ;;  %3371 = vmatmul.mubr.bf16.vlgmr.msra.gmra.mrb[64].mxu1 %v3220_v62  ;;  %v3119_v18 = vmul.f32 %v6003_v49, %v3076_v58  ;;  %v3160_v5 = vadd.f32 %v6011_v48, %v3117_v36 }
 0x5a0   : > { %v3163_v0 = vadd.f32 %v6014_v39, %v3120_v45  ;;  %v3193_v13 = vmax.f32 %v3161_v41, 0.0 }
 0x5a1   : > { %v4415_v9 = vpop.eup %4414  ;;  %4420 = vrsqrt.f32 %v3045_v27  ;;  %v3162_v30 = vadd.f32 %v6011_v48, %v3119_v18  ;;  %v3192_v40 = vmax.f32 %v3160_v5, 0.0 }
 0x5a2   : > { %v3000_v37 = vpop.xlane.xlu0 %2999  ;;  %v3195_v28 = vmax.f32 %v3163_v0, 0.0  ;;  %v3079_v42 = vmul.f32 %v4415_v9, %v5862_v59  ;;  %v3078_v56 = vmul.f32 %v4415_v9, %v5859_v11 }
 0x5a3   : > { %v4417_v14 = vpop.eup %4416  ;;  %v3030_v6 = vmul.f32 0.00390625, %v3000_v37  ;;  %v3194_v10 = vmax.f32 %v3162_v30, 0.0 }
 0x5a4   : > { %v3003_v57 = vpop.xlane.xlu1 %3002  ;;  %v3223_v55 = vpack.c.bf16 %v3195_v28, %v3193_v13  ;;  %v3081_v61 = vmul.f32 %v4417_v14, %v5868_v17  ;;  %v3122_v15 = vmul.f32 %v6006_v29, %v3079_v42  ;;  %v3080_v21 = vmul.f32 %v4417_v14, %v5865_v52 }
 0x5a5   : > { %v3046_v2 = vadd.f32 1e-05, %v3030_v6  ;;  %v3031_v22 = vmul.f32 0.00390625, %v3003_v57  ;;  %v3222_v46 = vpack.c.bf16 %v3194_v10, %v3192_v40  ;;  %v3121_v24 = vmul.f32 %v6003_v49, %v3078_v56 }
 0x5a6   : > { %3378 = vmatprep.mubr.bf16.mxu1 %v3223_v55  ;;  %v3124_v11 = vmul.f32 %v6006_v29, %v3081_v61  ;;  %v3165_v59 = vadd.f32 %v6014_v39, %v3122_v15  ;;  %v3123_v44 = vmul.f32 %v6003_v49, %v3080_v21 }
 0x5a7   : > { %4422 = vrsqrt.f32 %v3046_v2  ;;  %v3047_v50 = vadd.f32 1e-05, %v3031_v22  ;;  %3379 = vmatmul.mubr.bf16.gmra.mrb[68].mxu1 %v3222_v46  ;;  %v3164_v17 = vadd.f32 %v6011_v48, %v3121_v24 }
 0x5a8   : > { %v3167_v23 = vadd.f32 %v6014_v39, %v3124_v11  ;;  %v3166_v52 = vadd.f32 %v6011_v48, %v3123_v44  ;;  %v3197_v8 = vmax.f32 %v3165_v59, 0.0 }
 0x5a9   : > { %v4419_v62 = vpop.eup %4418  ;;  %4424 = vrsqrt.f32 %v3047_v50  ;;  %v3196_v34 = vmax.f32 %v3164_v17, 0.0 }
 0x5aa   : > { %v3006_v4 = vpop.xlane.xlu0 %3005  ;;  %v3199_v32 = vmax.f32 %v3167_v23, 0.0  ;;  %v3198_v58 = vmax.f32 %v3166_v52, 0.0  ;;  %v3083_v36 = vmul.f32 %v4419_v62, %v5882_v35  ;;  %v3082_v45 = vmul.f32 %v4419_v62, %v5879_v7 }
 0x5ab   : > { %v4421_v41 = vpop.eup %4420  ;;  %v3032_v27 = vmul.f32 0.00390625, %v3006_v4 }
 0x5ac   : > { %v3009_v18 = vpop.xlane.xlu1 %3008  ;;  %v3225_v5 = vpack.c.bf16 %v3199_v32, %v3197_v8  ;;  %v3224_v0 = vpack.c.bf16 %v3198_v58, %v3196_v34  ;;  %v3085_v9 = vmul.f32 %v4421_v41, %v5888_v19  ;;  %v3126_v30 = vmul.f32 %v6006_v29, %v3083_v36 }
 0x5ad   : > { %v3048_v37 = vadd.f32 1e-05, %v3032_v27  ;;  %v3033_v13 = vmul.f32 0.00390625, %v3009_v18  ;;  %v3084_v28 = vmul.f32 %v4421_v41, %v5885_v31  ;;  %v3125_v42 = vmul.f32 %v6003_v49, %v3082_v45 }
 0x5ae   : > { %3386 = vmatprep.mubr.bf16.mxu1 %v3225_v5  ;;  %v3128_v35 = vmul.f32 %v6006_v29, %v3085_v9  ;;  %v3169_v7 = vadd.f32 %v6014_v39, %v3126_v30 }
 0x5af   : > { %4426 = vrsqrt.f32 %v3048_v37  ;;  %v3049_v56 = vadd.f32 1e-05, %v3033_v13  ;;  %3387 = vmatmul.mubr.bf16.gmra.mrb[72].mxu1 %v3224_v0  ;;  %v3127_v14 = vmul.f32 %v6003_v49, %v3084_v28  ;;  %v3168_v19 = vadd.f32 %v6011_v48, %v3125_v42 }
 0x5b0   : > { %v3171_v6 = vadd.f32 %v6014_v39, %v3128_v35  ;;  %v3201_v57 = vmax.f32 %v3169_v7, 0.0 }
 0x5b1   : > { %v4423_v40 = vpop.eup %4422  ;;  %4428 = vrsqrt.f32 %v3049_v56  ;;  %v3170_v31 = vadd.f32 %v6011_v48, %v3127_v14  ;;  %v3200_v22 = vmax.f32 %v3168_v19, 0.0 }
 0x5b2   : > { %v3012_v10 = vpop.xlane.xlu0 %3011  ;;  %v3203_v55 = vmax.f32 %v3171_v6, 0.0  ;;  %v3087_v61 = vmul.f32 %v4423_v40, %v5902_v43  ;;  %v3086_v15 = vmul.f32 %v4423_v40, %v5899_v51 }
 0x5b3   : > { %v4425_v21 = vpop.eup %4424  ;;  %v3034_v2 = vmul.f32 0.00390625, %v3012_v10  ;;  %v3202_v46 = vmax.f32 %v3170_v31, 0.0 }
 0x5b4   : > { %v3015_v24 = vpop.xlane.xlu1 %3014  ;;  %v3227_v11 = vpack.c.bf16 %v3203_v55, %v3201_v57  ;;  %v3089_v59 = vmul.f32 %v4425_v21, %v5908_v54  ;;  %v3130_v44 = vmul.f32 %v6006_v29, %v3087_v61  ;;  %v3088_v50 = vmul.f32 %v4425_v21, %v5905_v1 }
 0x5b5   : > { %v3050_v17 = vadd.f32 1e-05, %v3034_v2  ;;  %v3035_v23 = vmul.f32 0.00390625, %v3015_v24  ;;  %v3226_v52 = vpack.c.bf16 %v3202_v46, %v3200_v22  ;;  %v3129_v62 = vmul.f32 %v6003_v49, %v3086_v15 }
 0x5b6   : > { %3394 = vmatprep.mubr.bf16.mxu1 %v3227_v11  ;;  %v3132_v51 = vmul.f32 %v6006_v29, %v3089_v59  ;;  %v3173_v43 = vadd.f32 %v6014_v39, %v3130_v44  ;;  %v3131_v8 = vmul.f32 %v6003_v49, %v3088_v50 }
 0x5b7   : > { %4430 = vrsqrt.f32 %v3050_v17  ;;  %v3051_v34 = vadd.f32 1e-05, %v3035_v23  ;;  %3395 = vmatmul.mubr.bf16.gmra.mrb[76].mxu1 %v3226_v52  ;;  %v3172_v54 = vadd.f32 %v6011_v48, %v3129_v62 }
 0x5b8   : > { %v3175_v4 = vadd.f32 %v6014_v39, %v3132_v51  ;;  %v3174_v1 = vadd.f32 %v6011_v48, %v3131_v8  ;;  %v3205_v58 = vmax.f32 %v3173_v43, 0.0 }
 0x5b9   : > { %v4427_v32 = vpop.eup %4426  ;;  %4432 = vrsqrt.f32 %v3051_v34  ;;  %v3204_v36 = vmax.f32 %v3172_v54, 0.0 }
 0x5ba   : > { %v3018_v45 = vpop.xlane.xlu0 %3017  ;;  %v3207_v41 = vmax.f32 %v3175_v4, 0.0  ;;  %v3206_v27 = vmax.f32 %v3174_v1, 0.0  ;;  %v3091_v18 = vmul.f32 %v4427_v32, %v5934_v60  ;;  %v3090_v5 = vmul.f32 %v4427_v32, %v5931_v25 }
 0x5bb   : > { %v4429_v0 = vpop.eup %4428  ;;  %v3036_v9 = vmul.f32 0.00390625, %v3018_v45 }
 0x5bc   : > { %v3021_v30 = vpop.xlane.xlu1 %3020  ;;  %v3229_v37 = vpack.c.bf16 %v3207_v41, %v3205_v58  ;;  %v3228_v13 = vpack.c.bf16 %v3206_v27, %v3204_v36  ;;  %v3093_v28 = vmul.f32 %v4429_v0, %v5940_v33  ;;  %v3134_v42 = vmul.f32 %v6006_v29, %v3091_v18 }
 0x5bd   : > { %v3052_v35 = vadd.f32 1e-05, %v3036_v9  ;;  %v3037_v7 = vmul.f32 0.00390625, %v3021_v30  ;;  %v3092_v56 = vmul.f32 %v4429_v0, %v5937_v16  ;;  %v3133_v14 = vmul.f32 %v6003_v49, %v3090_v5 }
 0x5be   : > { %3402 = vmatprep.mubr.bf16.mxu1 %v3229_v37  ;;  %v3136_v60 = vmul.f32 %v6006_v29, %v3093_v28  ;;  %v3177_v25 = vadd.f32 %v6014_v39, %v3134_v42 }
 0x5bf   : > { %4434 = vrsqrt.f32 %v3052_v35  ;;  %v3053_v19 = vadd.f32 1e-05, %v3037_v7  ;;  %3403 = vmatmul.mubr.bf16.gmra.mrb[80].mxu1 %v3228_v13  ;;  %v3135_v6 = vmul.f32 %v6003_v49, %v3092_v56  ;;  %v3176_v33 = vadd.f32 %v6011_v48, %v3133_v14 }
 0x5c0   : > { %v3179_v40 = vadd.f32 %v6014_v39, %v3136_v60  ;;  %v3209_v10 = vmax.f32 %v3177_v25, 0.0 }
 0x5c1   : > { %v4431_v31 = vpop.eup %4430  ;;  %4436 = vrsqrt.f32 %v3053_v19  ;;  %v3178_v16 = vadd.f32 %v6011_v48, %v3135_v6  ;;  %v3208_v21 = vmax.f32 %v3176_v33, 0.0 }
 0x5c2   : > { %v3211_v57 = vmax.f32 %v3179_v40, 0.0  ;;  %v3095_v55 = vmul.f32 %v4431_v31, %v5960_v63  ;;  %v3094_v61 = vmul.f32 %v4431_v31, %v5957_v53 }
 0x5c3   : > { %v4433_v15 = vpop.eup %4432  ;;  %v3210_v2 = vmax.f32 %v3178_v16, 0.0 }
 0x5c4   : > { %v3231_v22 = vpack.c.bf16 %v3211_v57, %v3209_v10  ;;  %v3097_v46 = vmul.f32 %v4433_v15, %v5966_v47  ;;  %v3138_v24 = vmul.f32 %v6006_v29, %v3095_v55  ;;  %v3096_v11 = vmul.f32 %v4433_v15, %v5963_v38 }
 0x5c5   : > { %v3230_v59 = vpack.c.bf16 %v3210_v2, %v3208_v21  ;;  %v3137_v44 = vmul.f32 %v6003_v49, %v3094_v61 }
 0x5c6   : > { %3410 = vmatprep.mubr.bf16.mxu1 %v3231_v22  ;;  %v3140_v50 = vmul.f32 %v6006_v29, %v3097_v46  ;;  %v3181_v63 = vadd.f32 %v6014_v39, %v3138_v24  ;;  %v3139_v53 = vmul.f32 %v6003_v49, %v3096_v11 }
 0x5c7   : > { %3411 = vmatmul.mubr.bf16.gmra.mrb[84].mxu1 %v3230_v59  ;;  %v3180_v17 = vadd.f32 %v6011_v48, %v3137_v44 }
 0x5c8   : > { %v3183_v23 = vadd.f32 %v6014_v39, %v3140_v50  ;;  %v3182_v47 = vadd.f32 %v6011_v48, %v3139_v53  ;;  %v3213_v62 = vmax.f32 %v3181_v63, 0.0 }
 0x5c9   : > { %v4435_v52 = vpop.eup %4434  ;;  %v3212_v38 = vmax.f32 %v3180_v17, 0.0 }
 0x5ca   : > { %v3215_v51 = vmax.f32 %v3183_v23, 0.0  ;;  %v3214_v43 = vmax.f32 %v3182_v47, 0.0  ;;  %v3099_v8 = vmul.f32 %v4435_v52, %v5980_v20  ;;  %v3098_v34 = vmul.f32 %v4435_v52, %v5977_v12 }
 0x5cb   : > { %v4437_v54 = vpop.eup %4436 }
 0x5cc   : > { %v3233_v4 = vpack.c.bf16 %v3215_v51, %v3213_v62  ;;  %v3232_v1 = vpack.c.bf16 %v3214_v43, %v3212_v38  ;;  %v3101_v32 = vmul.f32 %v4437_v54, %v5986_v26  ;;  %v3142_v58 = vmul.f32 %v6006_v29, %v3099_v8 }
 0x5cd   : > { %v3100_v36 = vmul.f32 %v4437_v54, %v5983_v3  ;;  %v3141_v45 = vmul.f32 %v6003_v49, %v3098_v34 }
 0x5ce   : > { %3418 = vmatprep.mubr.bf16.mxu1 %v3233_v4  ;;  %v3144_v41 = vmul.f32 %v6006_v29, %v3101_v32  ;;  %v3185_v27 = vadd.f32 %v6014_v39, %v3142_v58 }
 0x5cf   : > { %3419 = vmatmul.mubr.bf16.gmra.mrb[88].mxu1 %v3232_v1  ;;  %v3143_v20 = vmul.f32 %v6003_v49, %v3100_v36  ;;  %v3184_v12 = vadd.f32 %v6011_v48, %v3141_v45  ;;  %v6113_v49 = vld [vmem:[%s6164_s16] ss:$0 sm:$0xff] }
 0x5d0   : > { %v3187_v18 = vadd.f32 %v6014_v39, %v3144_v41  ;;  %v3217_v5 = vmax.f32 %v3185_v27, 0.0 }
 0x5d1   : > { %v3186_v26 = vadd.f32 %v6011_v48, %v3143_v20  ;;  %v3216_v3 = vmax.f32 %v3184_v12, 0.0 }
 0x5d2   : > { %v3219_v0 = vmax.f32 %v3187_v18, 0.0 }
 0x5d3   : > { %v3218_v9 = vmax.f32 %v3186_v26, 0.0 }
 0x5d4   : > { %v3235_v30 = vpack.c.bf16 %v3219_v0, %v3217_v5 }
 0x5d5   : > { %v3234_v37 = vpack.c.bf16 %v3218_v9, %v3216_v3 }
 0x5d6   : > { %3426 = vmatprep.mubr.bf16.mxu1 %v3235_v30 }
 0x5d7   : > { %3427 = vmatmul.mubr.bf16.gmra.mrb[92].mxu1 %v3234_v37 }
 0x672   : > { %v4070_v29 = vpop.f32.mrb[64].mxu1 }
 0x673   : > { %v4071_v13 = vpop.f32.mrb[65].mxu1 }
 0x674   : > { %v4072_v28 = vadd.f32 %v4071_v13, %v4070_v29  ;;  %v4073_v42 = vpop.f32.mrb[66].mxu1 }
 0x675   : > { %v4074_v39 = vpop.f32.mrb[67].mxu1 }
 0x676   : > { %v4075_v48 = vadd.f32 %v4074_v39, %v4073_v42  ;;  %v3373_v35 = vadd.f32 %v4072_v28, %v6113_v49 }
 0x678   : > { %v3376_v7 = vadd.f32 %v4075_v48, %v6113_v49 }
 0x67a   : > { %v3939_v56 = vpack.c.bf16 %v3376_v7, %v3373_v35  ;;  %v4076_v14 = vpop.f32.mrb[68].mxu1 }
 0x67b   : > { %v4077_v60 = vpop.f32.mrb[69].mxu1 }
 0x67c   : > { %3940 = vst [vmem:[%s6121_s21] sm:$0xff] %v3939_v56   ;;  %v4078_v25 = vadd.f32 %v4077_v60, %v4076_v14  ;;  %v4079_v19 = vpop.f32.mrb[70].mxu1 }
 0x67d   : > { %v4080_v6 = vpop.f32.mrb[71].mxu1 }
 0x67e   : > { %v4081_v33 = vadd.f32 %v4080_v6, %v4079_v19  ;;  %v3381_v40 = vadd.f32 %v4078_v25, %v6113_v49 }
 0x680   : > { %v3384_v31 = vadd.f32 %v4081_v33, %v6113_v49 }
 0x682   : > { %v3944_v16 = vpack.c.bf16 %v3384_v31, %v3381_v40  ;;  %v4082_v10 = vpop.f32.mrb[72].mxu1 }
 0x683   : > { %v4083_v57 = vpop.f32.mrb[73].mxu1 }
 0x684   : > { %3983 = vst [vmem:[%s6121_s21 + $0x8] sm:$0xff] %v3944_v16   ;;  %v4084_v55 = vadd.f32 %v4083_v57, %v4082_v10  ;;  %v4085_v61 = vpop.f32.mrb[74].mxu1 }
 0x685   : > { %v4086_v15 = vpop.f32.mrb[75].mxu1 }
 0x686   : > { %v4087_v21 = vadd.f32 %v4086_v15, %v4085_v61  ;;  %v3389_v2 = vadd.f32 %v4084_v55, %v6113_v49 }
 0x688   : > { %v3392_v22 = vadd.f32 %v4087_v21, %v6113_v49 }
 0x68a   : > { %v3949_v46 = vpack.c.bf16 %v3392_v22, %v3389_v2  ;;  %v4088_v24 = vpop.f32.mrb[76].mxu1 }
 0x68b   : > { %v4089_v11 = vpop.f32.mrb[77].mxu1 }
 0x68c   : > { %3984 = vst [vmem:[%s6121_s21 + $0x10] sm:$0xff] %v3949_v46   ;;  %v4090_v59 = vadd.f32 %v4089_v11, %v4088_v24  ;;  %v4091_v44 = vpop.f32.mrb[78].mxu1 }
 0x68d   : > { %v4092_v50 = vpop.f32.mrb[79].mxu1 }
 0x68e   : > { %v4093_v63 = vadd.f32 %v4092_v50, %v4091_v44  ;;  %v3397_v53 = vadd.f32 %v4090_v59, %v6113_v49 }
 0x690   : > { %v3400_v17 = vadd.f32 %v4093_v63, %v6113_v49 }
 0x692   : > { %v3954_v23 = vpack.c.bf16 %v3400_v17, %v3397_v53  ;;  %v4094_v47 = vpop.f32.mrb[80].mxu1 }
 0x693   : > { %v4095_v52 = vpop.f32.mrb[81].mxu1 }
 0x694   : > { %3985 = vst [vmem:[%s6121_s21 + $0x18] sm:$0xff] %v3954_v23   ;;  %v4096_v62 = vadd.f32 %v4095_v52, %v4094_v47  ;;  %v4097_v38 = vpop.f32.mrb[82].mxu1 }
 0x695   : > { %v4098_v51 = vpop.f32.mrb[83].mxu1 }
 0x696   : > { %v4099_v43 = vadd.f32 %v4098_v51, %v4097_v38  ;;  %v3405_v8 = vadd.f32 %v4096_v62, %v6113_v49 }
 0x698   : > { %v3408_v34 = vadd.f32 %v4099_v43, %v6113_v49 }
 0x69a   : > { %v3959_v54 = vpack.c.bf16 %v3408_v34, %v3405_v8  ;;  %v4100_v4 = vpop.f32.mrb[84].mxu1 }
 0x69b   : > { %v4101_v1 = vpop.f32.mrb[85].mxu1 }
 0x69c   : > { %3986 = vst [vmem:[%s6121_s21 + $0x20] sm:$0xff] %v3959_v54   ;;  %v4102_v32 = vadd.f32 %v4101_v1, %v4100_v4  ;;  %v4103_v58 = vpop.f32.mrb[86].mxu1 }
 0x69d   : > { %v4104_v36 = vpop.f32.mrb[87].mxu1 }
 0x69e   : > { %v4105_v45 = vadd.f32 %v4104_v36, %v4103_v58  ;;  %v3413_v41 = vadd.f32 %v4102_v32, %v6113_v49 }
 0x6a0   : > { %v3416_v27 = vadd.f32 %v4105_v45, %v6113_v49 }
 0x6a2   : > { %v3964_v20 = vpack.c.bf16 %v3416_v27, %v3413_v41  ;;  %v4106_v12 = vpop.f32.mrb[88].mxu1 }
 0x6a3   : > { %v4107_v18 = vpop.f32.mrb[89].mxu1 }
 0x6a4   : > { %3987 = vst [vmem:[%s6121_s21 + $0x28] sm:$0xff] %v3964_v20   ;;  %v4108_v26 = vadd.f32 %v4107_v18, %v4106_v12  ;;  %v4109_v5 = vpop.f32.mrb[90].mxu1 }
 0x6a5   : > { %v4110_v0 = vpop.f32.mrb[91].mxu1 }
 0x6a6   : > { %v4111_v3 = vadd.f32 %v4110_v0, %v4109_v5  ;;  %v3421_v9 = vadd.f32 %v4108_v26, %v6113_v49 }
 0x6a8   : > { %v3424_v30 = vadd.f32 %v4111_v3, %v6113_v49 }
 0x6aa   : > { %v3969_v37 = vpack.c.bf16 %v3424_v30, %v3421_v9  ;;  %v4112_v29 = vpop.f32.mrb[92].mxu1 }
 0x6ab   : > { %v4113_v13 = vpop.f32.mrb[93].mxu1 }
 0x6ac   : > { %3988 = vst [vmem:[%s6121_s21 + $0x30] sm:$0xff] %v3969_v37   ;;  %v4114_v28 = vadd.f32 %v4113_v13, %v4112_v29  ;;  %v4115_v42 = vpop.f32.mrb[94].mxu1 }
 0x6ad   : > { %v4116_v39 = vpop.f32.mrb[95].mxu1 }
 0x6ae   : > { %v4117_v48 = vadd.f32 %v4116_v39, %v4115_v42  ;;  %v3429_v35 = vadd.f32 %v4114_v28, %v6113_v49 }
 0x6b0   : > { %v3432_v7 = vadd.f32 %v4117_v48, %v6113_v49 }
 0x6b2   : > { %v3974_v56 = vpack.c.bf16 %v3432_v7, %v3429_v35 }
 0x6b4   : > { %3989 = vst [vmem:[%s6121_s21 + $0x38] sm:$0xff] %v3974_v56  }
 0x6b5 PF: > { %s29_s27 = sadd.s32 1, %s4444_s27  }
 0x6b6   : > { %p26_p4 = scmp.ge.s32.totalorder %s29_s27, 4  }
 0x6b8   :  { %28 = sbr.rel (!%p26_p4) target bundleno = 4 (0x4), region = 136 }

// kernel: edge_block_forward.5
= control target key start
LH: loop header
LB: loop body
LE: loop exit
PB: predicated region body
PF: predicated region fallthrough
CT: control target
= control target key end

     0   :  { %s3486_s18 = smov 0   ;;  %s4346_s0 = inlined_call_operand.vmem [shape: s32[256,1], index: 0, kind: input, shape index: {}]   ;;  %s4347_s1 = inlined_call_operand.vmem [shape: s32[256,1], index: 1, kind: input, shape index: {}]   ;;  %s4348_s2 = inlined_call_operand.vmem [shape: f32[256,128], index: 2, kind: input, shape index: {}]   ;;  %s4349_s3 = inlined_call_operand.vmem [shape: bf16[128,256], index: 3, kind: input, shape index: {}]   ;;  %s4350_s4 = inlined_call_operand.vmem [shape: bf16[128,256], index: 4, kind: input, shape index: {}]   ;;  %s4351_s5 = inlined_call_operand.vmem [shape: bf16[640,128], index: 5, kind: input, shape index: {}]   ;;  %s4352_s6 = inlined_call_operand.vmem [shape: f32[1,128], index: 6, kind: input, shape index: {}]   ;;  %s4353_s7 = inlined_call_operand.vmem [shape: bf16[128,128], index: 7, kind: input, shape index: {}]   ;;  %s4354_s8 = inlined_call_operand.vmem [shape: f32[1,128], index: 8, kind: input, shape index: {}]   ;;  %s4355_s9 = inlined_call_operand.vmem [shape: f32[1,128], index: 9, kind: input, shape index: {}]   ;;  %s4356_s10 = inlined_call_operand.vmem [shape: f32[1,128], index: 10, kind: input, shape index: {}]   ;;  %s4357_s11 = inlined_call_operand.vmem [shape: bf16[128,128], index: 11, kind: input, shape index: {}]   ;;  %s4358_s12 = inlined_call_operand.vmem [shape: f32[1,128], index: 12, kind: input, shape index: {}]   ;;  %s4359_s13 = inlined_call_operand.vmem [shape: f32[1,128], index: 13, kind: input, shape index: {}]   ;;  %s4360_s14 = inlined_call_operand.vmem [shape: f32[1,128], index: 14, kind: input, shape index: {}]   ;;  %s4361_s15 = inlined_call_operand.vmem [shape: f32[256,128], index: 15, kind: output, shape index: {}]  }
   0x1 LB: > { %s2770_s19 = sadd.s32 4294967295, %s3402_s18   ;;  %p2774_p0 = scmp.ge.s32.totalorder %s3402_s18, 1  ;;  %s3402_s18 = sphi %s3486_s18, %s25_s18  }
   0x2   : > { %p460_p1 = scmp.lt.s32.totalorder %s3402_s18, 3 }
   0x4   : > { %p461_p2 = pnand %p2774_p0, %p460_p1 }
   0x5   : > { %s2775_s20 = sshll.u32 (!%p461_p2), %s2770_s19, 4  ;;  %v3212_v0 = vld [vmem:[%s4349_s3 + $0x4] ss:$8 sps:$4 sm:$0xff] (!%p461_p2)   ;;  %v3404_v1 = vmov (!%p461_p2), 0   ;;  %v3214_v2 = vld [vmem:[%s4349_s3] ss:$8 sps:$4 sm:$0xff] (!%p461_p2)  }
   0x6   : > { %464 = sbr.rel (%p461_p2) target bundleno = 1761 (0x6e1), region = 80  ;;  %3211 = vset.pattern.permute.xlu1 (!%p461_p2), %v3404_v1  ;;  %3210 = vset.pattern.permute.xlu0 (!%p461_p2), %v3404_v1  ;;  %p519_p3 = scmp.lt.s32.totalorder (!%p461_p2), %s2775_s20, 31  ;;  %v3215_v3 = vld [vmem:[%s4349_s3 + $0x14] ss:$8 sps:$4 sm:$0xff] (!%p461_p2)   ;;  %v3217_v4 = vld [vmem:[%s4349_s3 + $0x10] ss:$8 sps:$4 sm:$0xff] (!%p461_p2)  }
   0x7   : > { %849 = vmatprep.subr.bf16.mxu0 (!%p461_p2), %v3212_v0  ;;  %881 = vmatprep.mubr.bf16.mxu0 (!%p461_p2), %v3404_v1  ;;  %v3218_v5 = vld [vmem:[%s4349_s3 + $0x24] ss:$8 sps:$4 sm:$0xff] (!%p461_p2)   ;;  %v3226_v7 = vld [vmem:[%s4350_s4] ss:$8 sps:$4 sm:$0xff] (!%p461_p2)   ;;  %v3221_v13 = vld [vmem:[%s4349_s3 + $0x34] ss:$8 sps:$4 sm:$0xff] (!%p461_p2)  }
   0x8   : > { %850 = vmatpush1.bf16.msra.mxu0 (!%p461_p2), %v3214_v2  ;;  %1090 = vmatprep.mubr.bf16.mxu1 (!%p461_p2), %v3404_v1  ;;  %v3223_v6 = vld [vmem:[%s4350_s4 + $0x4] ss:$8 sps:$4 sm:$0xff] (!%p461_p2)   ;;  %v3220_v10 = vld [vmem:[%s4349_s3 + $0x20] ss:$8 sps:$4 sm:$0xff] (!%p461_p2)   ;;  %v3225_v14 = vld [vmem:[%s4349_s3 + $0x30] ss:$8 sps:$4 sm:$0xff] (!%p461_p2)  }
   0x9   : > { %851 = vmatprep.subr.bf16.mxu0 (!%p461_p2), %v3215_v3  ;;  %1058 = vmatprep.subr.bf16.mxu1 (!%p461_p2), %v3223_v6  ;;  %v3227_v19 = vld [vmem:[%s4349_s3 + $0x44] ss:$8 sps:$4 sm:$0xff] (!%p461_p2)   ;;  %v3229_v22 = vld [vmem:[%s4350_s4 + $0x14] ss:$8 sps:$4 sm:$0xff] (!%p461_p2)   ;;  %v3231_v23 = vld [vmem:[%s4349_s3 + $0x40] ss:$8 sps:$4 sm:$0xff] (!%p461_p2)  }
   0xa   : > { %1059 = vmatpush1.bf16.msra.mxu1 (!%p461_p2), %v3226_v7  ;;  %v3232_v24 = vld [vmem:[%s4350_s4 + $0x10] ss:$8 sps:$4 sm:$0xff] (!%p461_p2)   ;;  %v3233_v25 = vld [vmem:[%s4349_s3 + $0x54] ss:$8 sps:$4 sm:$0xff] (!%p461_p2)   ;;  %v3235_v26 = vld [vmem:[%s4350_s4 + $0x24] ss:$8 sps:$4 sm:$0xff] (!%p461_p2)  }
   0xb   : > { %1060 = vmatprep.subr.bf16.mxu1 (!%p461_p2), %v3229_v22  ;;  %v3237_v27 = vld [vmem:[%s4349_s3 + $0x50] ss:$8 sps:$4 sm:$0xff] (!%p461_p2)   ;;  %v3238_v28 = vld [vmem:[%s4350_s4 + $0x20] ss:$8 sps:$4 sm:$0xff] (!%p461_p2)   ;;  %v3239_v30 = vld [vmem:[%s4349_s3 + $0x64] ss:$8 sps:$4 sm:$0xff] (!%p461_p2)  }
   0xc   : > { %852 = vmatpush1.bf16.msra.mxu0 (!%p461_p2), %v3217_v4  ;;  %v3241_v32 = vld [vmem:[%s4350_s4 + $0x34] ss:$8 sps:$4 sm:$0xff] (!%p461_p2)   ;;  %v3243_v33 = vld [vmem:[%s4349_s3 + $0x60] ss:$8 sps:$4 sm:$0xff] (!%p461_p2)   ;;  %v3244_v34 = vld [vmem:[%s4350_s4 + $0x30] ss:$8 sps:$4 sm:$0xff] (!%p461_p2)   ;;  %v543_v4 = vlaneseq (!%p461_p2) }
   0xd   : > { %s4363_s20 = smov (!%p519_p3, %s2775_s20), 31  ;;  %853 = vmatprep.subr.bf16.mxu0 %v3218_v5  ;;  %v3245_v35 = vld [vmem:[%s4349_s3 + $0x74] ss:$8 sps:$4 sm:$0xff]   ;;  %v3247_v36 = vld [vmem:[%s4350_s4 + $0x44] ss:$8 sps:$4 sm:$0xff]  }
   0xe   : > { %s3513_s16 = sshll.u32 %s4363_s20, 3  ;;  %1061 = vmatpush1.bf16.msra.mxu1 %v3232_v24  ;;  %v3249_v39 = vld [vmem:[%s4349_s3 + $0x70] ss:$8 sps:$4 sm:$0xff]   ;;  %v3250_v40 = vld [vmem:[%s4350_s4 + $0x40] ss:$8 sps:$4 sm:$0xff]   ;;  %v3646_v7 = vand.u32 127, %v543_v4 }
   0xf   : > { %s3522_s23 = scalar_lea.vmem %s4346_s0, %s3513_s16  ;;  %s3546_s21 = scalar_lea.vmem %s4347_s1, %s3513_s16  ;;  %1062 = vmatprep.subr.bf16.mxu1 %v3235_v26  ;;  %v3251_v43 = vld [vmem:[%s4350_s4 + $0x54] ss:$8 sps:$4 sm:$0xff]   ;;  %v3253_v44 = vld [vmem:[%s4350_s4 + $0x50] ss:$8 sps:$4 sm:$0xff]   ;;  %v3254_v45 = vld [vmem:[%s4350_s4 + $0x64] ss:$8 sps:$4 sm:$0xff]  }
  0x10   : > { %v547_v8 = vld [vmem:[%s3522_s23 + $0x10] sm:$0xff]  ;;  %v545_v9 = vld [vmem:[%s3522_s23] sm:$0xff]  ;;  %v548_v11 = vld [vmem:[%s3522_s23 + $0x18] sm:$0xff]  ;;  %854 = vmatpush1.bf16.msra.mxu0 %v3220_v10  ;;  %s4280_s25 = scalar_lea.vmem %s4361_s15, %s3513_s16 }
  0x11   : > { %568 = vperm.xlu1 %3211, %v547_v8   ;;  %562 = vperm.xlu0 %3210, %v545_v9   ;;  %v546_v12 = vld [vmem:[%s3522_s23 + $0x8] sm:$0xff]  ;;  %v549_v16 = vld [vmem:[%s3522_s23 + $0x20] sm:$0xff]  ;;  %v552_v17 = vld [vmem:[%s3522_s23 + $0x38] sm:$0xff] }
  0x12   : > { %v550_v15 = vld [vmem:[%s3522_s23 + $0x28] sm:$0xff]  ;;  %855 = vmatprep.subr.bf16.mxu0 %v3221_v13  ;;  %v551_v18 = vld [vmem:[%s3522_s23 + $0x30] sm:$0xff]  ;;  %v649_v21 = vld [vmem:[%s3546_s21] sm:$0xff]  ;;  %1063 = vmatpush1.bf16.msra.mxu1 %v3238_v28 }
  0x13   : > { %v650_v20 = vld [vmem:[%s3546_s21 + $0x8] sm:$0xff]  ;;  %v553_v31 = vld [vmem:[%s3522_s23 + $0x40] sm:$0xff]  ;;  %1064 = vmatprep.subr.bf16.mxu1 %v3241_v32  ;;  %v652_v37 = vld [vmem:[%s3546_s21 + $0x18] sm:$0xff] }
  0x14   : > { %856 = vmatpush1.bf16.msra.mxu0 %v3225_v14  ;;  %v554_v29 = vld [vmem:[%s3522_s23 + $0x48] sm:$0xff]  ;;  %v651_v38 = vld [vmem:[%s3546_s21 + $0x10] sm:$0xff]  ;;  %v556_v41 = vld [vmem:[%s3522_s23 + $0x58] sm:$0xff] }
  0x15   : > { %571 = vperm.xlu1 %3211, %v548_v11   ;;  %565 = vperm.xlu0 %3210, %v546_v12   ;;  %v555_v42 = vld [vmem:[%s3522_s23 + $0x50] sm:$0xff]  ;;  %v654_v46 = vld [vmem:[%s3546_s21 + $0x28] sm:$0xff]  ;;  %v653_v47 = vld [vmem:[%s3546_s21 + $0x20] sm:$0xff]  ;;  %v3405_v12 = vmov 1.0|1.0  }
  0x16   : > { %857 = vmatprep.subr.bf16.mxu0 %v3227_v19  ;;  %1065 = vmatpush1.bf16.msra.mxu1 %v3244_v34  ;;  %v3256_v48 = vld [vmem:[%s4350_s4 + $0x60] ss:$8 sps:$4 sm:$0xff]   ;;  %v3257_v49 = vld [vmem:[%s4350_s4 + $0x74] ss:$8 sps:$4 sm:$0xff]   ;;  %v3259_v52 = vld [vmem:[%s4350_s4 + $0x70] ss:$8 sps:$4 sm:$0xff]  }
  0x17   : > { %1066 = vmatprep.subr.bf16.mxu1 %v3247_v36  ;;  %v558_v50 = vld [vmem:[%s3522_s23 + $0x68] sm:$0xff]  ;;  %v557_v51 = vld [vmem:[%s3522_s23 + $0x60] sm:$0xff]  ;;  %v656_v53 = vld [vmem:[%s3546_s21 + $0x38] sm:$0xff] }
  0x18   : > { %858 = vmatpush1.bf16.msra.mxu0 %v3231_v23  ;;  %v655_v54 = vld [vmem:[%s3546_s21 + $0x30] sm:$0xff]  ;;  %v560_v55 = vld [vmem:[%s3522_s23 + $0x78] sm:$0xff]  ;;  %v658_v57 = vld [vmem:[%s3546_s21 + $0x48] sm:$0xff] }
  0x19   : > { %577 = vperm.xlu1 %3211, %v550_v15   ;;  %574 = vperm.xlu0 %3210, %v549_v16   ;;  %v559_v56 = vld [vmem:[%s3522_s23 + $0x70] sm:$0xff]  ;;  %v657_v58 = vld [vmem:[%s3546_s21 + $0x40] sm:$0xff]  ;;  %v660_v59 = vld [vmem:[%s3546_s21 + $0x58] sm:$0xff] }
  0x1a   : > { %859 = vmatprep.subr.bf16.mxu0 %v3233_v25  ;;  %1067 = vmatpush1.bf16.msra.mxu1 %v3250_v40  ;;  %v659_v60 = vld [vmem:[%s3546_s21 + $0x50] sm:$0xff]  ;;  %v662_v61 = vld [vmem:[%s3546_s21 + $0x68] sm:$0xff]  ;;  %v661_v62 = vld [vmem:[%s3546_s21 + $0x60] sm:$0xff] }
  0x1b   : > { %1068 = vmatprep.subr.bf16.mxu1 %v3251_v43  ;;  %v664_v63 = vld [vmem:[%s3546_s21 + $0x78] sm:$0xff]  ;;  %v663_v0 = vld [vmem:[%s3546_s21 + $0x70] sm:$0xff]  ;;  %v3260_v2 = vld [vmem:[%s4351_s5 + $0x40] sm:$0xff]   ;;  %s3828_s21 = scalar_lea.vmem %s4348_s2, %s3513_s16 }
  0x1c   : > { %860 = vmatpush1.bf16.msra.mxu0 %v3237_v27  ;;  %v3270_v3 = vld [vmem:[%s4351_s5 + $0xc0] sm:$0xff]   ;;  %v3262_v11 = vld [vmem:[%s4351_s5 + $0x48] sm:$0xff]   ;;  %v3264_v16 = vld [vmem:[%s4351_s5 + $0x50] sm:$0xff]  }
  0x1d   : > { %583 = vperm.xlu1 %3211, %v552_v17   ;;  %580 = vperm.xlu0 %3210, %v551_v18   ;;  %v3261_v10 = vld [vmem:[%s4351_s5] sm:$0xff]   ;;  %v3263_v15 = vld [vmem:[%s4351_s5 + $0x8] sm:$0xff]   ;;  %v3265_v19 = vld [vmem:[%s4351_s5 + $0x10] sm:$0xff]  }
  0x1e   : > { %861 = vmatprep.subr.bf16.mxu0 %v3239_v30  ;;  %1069 = vmatpush1.bf16.msra.mxu1 %v3253_v44  ;;  %v3271_v23 = vld [vmem:[%s4351_s5 + $0x80] sm:$0xff]   ;;  %v3267_v24 = vld [vmem:[%s4351_s5 + $0x18] sm:$0xff]   ;;  %v3274_v25 = vld [vmem:[%s4351_s5 + $0xc8] sm:$0xff]  }
  0x1f   : > { %1070 = vmatprep.subr.bf16.mxu1 %v3254_v45  ;;  %v3268_v26 = vld [vmem:[%s4351_s5 + $0x60] sm:$0xff]   ;;  %v3278_v32 = vld [vmem:[%s4351_s5 + $0xd0] sm:$0xff]   ;;  %v3273_v36 = vld [vmem:[%s4351_s5 + $0x28] sm:$0xff]  }
  0x20   : > { %862 = vmatpush1.bf16.msra.mxu0 %v3243_v33  ;;  %v3269_v30 = vld [vmem:[%s4351_s5 + $0x20] sm:$0xff]   ;;  %v3281_v45 = vld [vmem:[%s4351_s5 + $0x38] sm:$0xff]  }
  0x21   : > { %669 = vperm.xlu1 %3211, %v650_v20   ;;  %666 = vperm.xlu0 %3210, %v649_v21   ;;  %v3266_v20 = vld [vmem:[%s4351_s5 + $0x58] sm:$0xff]  }
  0x22   : > { %863 = vmatprep.subr.bf16.mxu0 %v3245_v35  ;;  %1071 = vmatpush1.bf16.msra.mxu1 %v3256_v48  ;;  %v3279_v35 = vld [vmem:[%s4351_s5 + $0x90] sm:$0xff]   ;;  %v3292_v4 = vld [vmem:[%s4351_s5 + $0xf8] sm:$0xff]  }
  0x23   : > { %1072 = vmatprep.subr.bf16.mxu1 %v3257_v49 }
  0x24   : > { %864 = vmatpush1.bf16.msra.mxu0 %v3249_v39 }
  0x25   : > { %589 = vperm.xlu1 %3211, %v554_v29   ;;  %586 = vperm.xlu0 %3210, %v553_v31   ;;  %v3275_v29 = vld [vmem:[%s4351_s5 + $0x88] sm:$0xff]  }
  0x26   : > { %1073 = vmatpush1.bf16.msra.mxu1 %v3259_v52  ;;  %2912 = vmatprep.subr.bf16.mxu0 %v3260_v2  ;;  %v3272_v31 = vld [vmem:[%s4351_s5 + $0x68] sm:$0xff]   ;;  %v3289_v2 = vld [vmem:[%s4351_s5 + $0xf0] sm:$0xff]  }
  0x27   : > { %2976 = vmatprep.subr.bf16.mxu1 %v3270_v3  ;;  %v3290_v3 = vld [vmem:[%s4351_s5 + $0xb0] sm:$0xff]  }
  0x29   : > { %675 = vperm.xlu1 %3211, %v652_v37   ;;  %672 = vperm.xlu0 %3210, %v651_v38   ;;  %v3282_v37 = vld [vmem:[%s4351_s5 + $0xd8] sm:$0xff]   ;;  %v3276_v38 = vld [vmem:[%s4351_s5 + $0x70] sm:$0xff]  }
  0x2d   : > { %595 = vperm.xlu1 %3211, %v556_v41   ;;  %592 = vperm.xlu0 %3210, %v555_v42   ;;  %v3277_v41 = vld [vmem:[%s4351_s5 + $0x30] sm:$0xff]   ;;  %v3280_v42 = vld [vmem:[%s4351_s5 + $0x78] sm:$0xff]  }
  0x31   : > { %681 = vperm.xlu1 %3211, %v654_v46   ;;  %678 = vperm.xlu0 %3210, %v653_v47  }
  0x35   : > { %601 = vperm.xlu1 %3211, %v558_v50   ;;  %598 = vperm.xlu0 %3210, %v557_v51  }
  0x39   : > { %687 = vperm.xlu1 %3211, %v656_v53   ;;  %684 = vperm.xlu0 %3210, %v655_v54  }
  0x3d   : > { %607 = vperm.xlu1 %3211, %v560_v55   ;;  %604 = vperm.xlu0 %3210, %v559_v56  }
  0x41   : > { %693 = vperm.xlu1 %3211, %v658_v57   ;;  %690 = vperm.xlu0 %3210, %v657_v58  }
  0x45   : > { %699 = vperm.xlu1 %3211, %v660_v59   ;;  %696 = vperm.xlu0 %3210, %v659_v60   ;;  %v3283_v60 = vld [vmem:[%s4351_s5 + $0x98] sm:$0xff]  }
  0x49   : > { %705 = vperm.xlu1 %3211, %v662_v61   ;;  %702 = vperm.xlu0 %3210, %v661_v62   ;;  %v3284_v61 = vld [vmem:[%s4351_s5 + $0xe0] sm:$0xff]   ;;  %v3287_v62 = vld [vmem:[%s4351_s5 + $0xe8] sm:$0xff]  }
  0x4d   : > { %711 = vperm.xlu1 %3211, %v664_v63   ;;  %708 = vperm.xlu0 %3210, %v663_v0   ;;  %v3286_v63 = vld [vmem:[%s4351_s5 + $0x100] sm:$0xff]   ;;  %v3288_v0 = vld [vmem:[%s4351_s5 + $0xa8] sm:$0xff]  }
  0x90   : > { %v569_v5 = vpop.permute.xlu1 %568  ;;  %v563_v6 = vpop.permute.xlu0 %562 }
  0x91   : > { %vm609_vm1 = vcmp.eq.s32.totalorder %v3646_v7, %v563_v6  ;;  %vm611_vm3 = vcmp.eq.s32.totalorder %v3646_v7, %v569_v5  ;;  %v3293_v5 = vld [vmem:[%s4351_s5 + $0xb8] sm:$0xff]  }
  0x94   : > { %v572_v8 = vpop.permute.xlu1 %571  ;;  %v566_v9 = vpop.permute.xlu0 %565 }
  0x95   : > { %vm610_vm0 = vcmp.eq.s32.totalorder %v3646_v7, %v566_v9  ;;  %vm612_vm4 = vcmp.eq.s32.totalorder %v3646_v7, %v572_v8 }
  0x96   : > { %vm2799_vm2 = vmpackc.low %vm610_vm0, %vm609_vm1 }
  0x97   : > { %2800 = vmatmul.mubr.msk.bf16.vlgmr.msra.gmra.mrb[0].mxu0 %vm2799_vm2, %v3405_v12  ;;  %vm2801_vm5 = vmpackc.low %vm612_vm4, %vm611_vm3 }
  0x98   : > { %v578_v13 = vpop.permute.xlu1 %577  ;;  %v575_v14 = vpop.permute.xlu0 %574  ;;  %891 = vmatprep.mubr.bf16.mxu0 %v3404_v1  ;;  %2913 = vmatpush3.bf16.msra.mxu0 %v3261_v10 }
  0x99   : > { %2914 = vmatprep.subr.bf16.mxu0 %v3262_v11  ;;  %vm614_vm9 = vcmp.eq.s32.totalorder %v3646_v7, %v578_v13  ;;  %vm613_vm10 = vcmp.eq.s32.totalorder %v3646_v7, %v575_v14 }
  0x9a   : > { %vm2803_vm11 = vmpackc.low %vm614_vm9, %vm613_vm10 }
  0x9c   : > { %v584_v17 = vpop.permute.xlu1 %583  ;;  %v581_v18 = vpop.permute.xlu0 %580  ;;  %2915 = vmatpush3.bf16.msra.mxu0 %v3263_v15  ;;  %v3294_v15 = vld [vmem:[%s4351_s5 + $0x110] sm:$0xff]  }
  0x9d   : > { %2916 = vmatprep.subr.bf16.mxu0 %v3264_v16  ;;  %vm616_vm15 = vcmp.eq.s32.totalorder %v3646_v7, %v584_v17  ;;  %vm615_vm0 = vcmp.eq.s32.totalorder %v3646_v7, %v581_v18 }
  0x9e   : > { %vm2805_vm1 = vmpackc.low %vm616_vm15, %vm615_vm0 }
  0x9f   : > { %2802 = vmatmul.mubr.msk.bf16.gmra.mrb[4].mxu0 %vm2801_vm5, %v3405_v12 }
  0xa0   : > { %v670_v21 = vpop.permute.xlu1 %669  ;;  %v667_v22 = vpop.permute.xlu0 %666  ;;  %901 = vmatprep.mubr.bf16.mxu0 %v3404_v1  ;;  %2917 = vmatpush3.bf16.msra.mxu0 %v3265_v19 }
  0xa1   : > { %vm714_vm6 = vcmp.eq.s32.totalorder %v3646_v7, %v670_v21  ;;  %vm713_vm7 = vcmp.eq.s32.totalorder %v3646_v7, %v667_v22  ;;  %2918 = vmatprep.subr.bf16.mxu0 %v3266_v20 }
  0xa2   : > { %vm2831_vm8 = vmpackc.low %vm714_vm6, %vm713_vm7 }
  0xa3   : > { %2832 = vmatmul.mubr.msk.bf16.vlgmr.msra.gmra.mrb[0].mxu1 %vm2831_vm8, %v3405_v12 }
  0xa4   : > { %v590_v27 = vpop.permute.xlu1 %589  ;;  %v587_v28 = vpop.permute.xlu0 %586  ;;  %1100 = vmatprep.mubr.bf16.mxu1 %v3404_v1  ;;  %2977 = vmatpush3.bf16.msra.mxu1 %v3271_v23  ;;  %v3295_v23 = vld [vmem:[%s4351_s5 + $0x118] sm:$0xff]  }
  0xa5   : > { %2919 = vmatpush3.bf16.msra.mxu0 %v3267_v24  ;;  %2978 = vmatprep.subr.bf16.mxu1 %v3274_v25  ;;  %vm618_vm5 = vcmp.eq.s32.totalorder %v3646_v7, %v590_v27  ;;  %vm617_vm6 = vcmp.eq.s32.totalorder %v3646_v7, %v587_v28 }
  0xa6   : > { %2920 = vmatprep.subr.bf16.mxu0 %v3268_v26  ;;  %vm2807_vm7 = vmpackc.low %vm618_vm5, %vm617_vm6 }
  0xa7   : > { %2804 = vmatmul.mubr.msk.bf16.gmra.mrb[8].mxu0 %vm2803_vm11, %v3405_v12 }
  0xa8   : > { %v676_v33 = vpop.permute.xlu1 %675  ;;  %v673_v34 = vpop.permute.xlu0 %672  ;;  %2979 = vmatpush3.bf16.msra.mxu1 %v3275_v29  ;;  %911 = vmatprep.mubr.bf16.mxu0 %v3404_v1  ;;  %v3296_v29 = vld [vmem:[%s4351_s5 + $0x120] sm:$0xff]  }
  0xa9   : > { %vm716_vm12 = vcmp.eq.s32.totalorder %v3646_v7, %v676_v33  ;;  %vm715_vm13 = vcmp.eq.s32.totalorder %v3646_v7, %v673_v34  ;;  %2921 = vmatpush3.bf16.msra.mxu0 %v3269_v30  ;;  %2980 = vmatprep.subr.bf16.mxu1 %v3278_v32 }
  0xaa   : > { %vm2833_vm14 = vmpackc.low %vm716_vm12, %vm715_vm13  ;;  %2922 = vmatprep.subr.bf16.mxu0 %v3272_v31 }
  0xab   : > { %2834 = vmatmul.mubr.msk.bf16.gmra.mrb[4].mxu1 %vm2833_vm14, %v3405_v12 }
  0xac   : > { %v596_v39 = vpop.permute.xlu1 %595  ;;  %v593_v40 = vpop.permute.xlu0 %592  ;;  %1110 = vmatprep.mubr.bf16.mxu1 %v3404_v1  ;;  %2981 = vmatpush3.bf16.msra.mxu1 %v3279_v35 }
  0xad   : > { %2923 = vmatpush3.bf16.msra.mxu0 %v3273_v36  ;;  %2982 = vmatprep.subr.bf16.mxu1 %v3282_v37  ;;  %vm620_vm11 = vcmp.eq.s32.totalorder %v3646_v7, %v596_v39  ;;  %vm619_vm12 = vcmp.eq.s32.totalorder %v3646_v7, %v593_v40  ;;  %v3297_v37 = vld [vmem:[%s4351_s5 + $0x128] sm:$0xff]  }
  0xae   : > { %2924 = vmatprep.subr.bf16.mxu0 %v3276_v38  ;;  %vm2809_vm13 = vmpackc.low %vm620_vm11, %vm619_vm12 }
  0xaf   : > { %2806 = vmatmul.mubr.msk.bf16.gmra.mrb[12].mxu0 %vm2805_vm1, %v3405_v12 }
  0xb0   : > { %v682_v43 = vpop.permute.xlu1 %681  ;;  %v679_v44 = vpop.permute.xlu0 %678  ;;  %921 = vmatprep.mubr.bf16.mxu0 %v3404_v1  ;;  %2983 = vmatpush3.bf16.msra.mxu1 %v3283_v60 }
  0xb1   : > { %vm718_vm2 = vcmp.eq.s32.totalorder %v3646_v7, %v682_v43  ;;  %vm717_vm3 = vcmp.eq.s32.totalorder %v3646_v7, %v679_v44  ;;  %2925 = vmatpush3.bf16.msra.mxu0 %v3277_v41  ;;  %2984 = vmatprep.subr.bf16.mxu1 %v3284_v61  ;;  %v3298_v43 = vld [vmem:[%s4351_s5 + $0x130] sm:$0xff]  }
  0xb2   : > { %vm2835_vm4 = vmpackc.low %vm718_vm2, %vm717_vm3  ;;  %2926 = vmatprep.subr.bf16.mxu0 %v3280_v42 }
  0xb3   : > { %2836 = vmatmul.mubr.msk.bf16.gmra.mrb[8].mxu1 %vm2835_vm4, %v3405_v12 }
  0xb4   : > { %v602_v46 = vpop.permute.xlu1 %601  ;;  %v599_v47 = vpop.permute.xlu0 %598  ;;  %1120 = vmatprep.mubr.bf16.mxu1 %v3404_v1 }
  0xb5   : > { %2927 = vmatpush3.bf16.msra.mxu0 %v3281_v45  ;;  %vm622_vm1 = vcmp.eq.s32.totalorder %v3646_v7, %v602_v46  ;;  %vm621_vm2 = vcmp.eq.s32.totalorder %v3646_v7, %v599_v47 }
  0xb6   : > { %vm2811_vm3 = vmpackc.low %vm622_vm1, %vm621_vm2  ;;  %3088 = vmatprep.subr.bf16.mxu0 %v3286_v63 }
  0xb7   : > { %2808 = vmatmul.mubr.msk.bf16.gmra.mrb[16].mxu0 %vm2807_vm7, %v3405_v12 }
  0xb8   : > { %v688_v48 = vpop.permute.xlu1 %687  ;;  %v685_v49 = vpop.permute.xlu0 %684  ;;  %931 = vmatprep.mubr.bf16.mxu0 %v3404_v1 }
  0xb9   : > { %vm720_vm8 = vcmp.eq.s32.totalorder %v3646_v7, %v688_v48  ;;  %vm719_vm9 = vcmp.eq.s32.totalorder %v3646_v7, %v685_v49 }
  0xba   : > { %vm2837_vm10 = vmpackc.low %vm720_vm8, %vm719_vm9 }
  0xbb   : > { %2838 = vmatmul.mubr.msk.bf16.gmra.mrb[12].mxu1 %vm2837_vm10, %v3405_v12 }
  0xbc   : > { %v608_v50 = vpop.permute.xlu1 %607  ;;  %v605_v51 = vpop.permute.xlu0 %604  ;;  %1130 = vmatprep.mubr.bf16.mxu1 %v3404_v1 }
  0xbd   : > { %vm624_vm7 = vcmp.eq.s32.totalorder %v3646_v7, %v608_v50  ;;  %vm623_vm8 = vcmp.eq.s32.totalorder %v3646_v7, %v605_v51  ;;  %v3299_v51 = vld [vmem:[%s4351_s5 + $0x138] sm:$0xff]  }
  0xbe   : > { %vm2813_vm9 = vmpackc.low %vm624_vm7, %vm623_vm8 }
  0xbf   : > { %2810 = vmatmul.mubr.msk.bf16.gmra.mrb[20].mxu0 %vm2809_vm13, %v3405_v12 }
  0xc0   : > { %v694_v52 = vpop.permute.xlu1 %693  ;;  %v691_v53 = vpop.permute.xlu0 %690  ;;  %941 = vmatprep.mubr.bf16.mxu0 %v3404_v1 }
  0xc1   : > { %vm722_vm14 = vcmp.eq.s32.totalorder %v3646_v7, %v694_v52  ;;  %vm721_vm15 = vcmp.eq.s32.totalorder %v3646_v7, %v691_v53 }
  0xc2   : > { %vm2839_vm0 = vmpackc.low %vm722_vm14, %vm721_vm15 }
  0xc3   : > { %2840 = vmatmul.mubr.msk.bf16.gmra.mrb[16].mxu1 %vm2839_vm0, %v3405_v12 }
  0xc4   : > { %v700_v54 = vpop.permute.xlu1 %699  ;;  %v697_v55 = vpop.permute.xlu0 %696  ;;  %1140 = vmatprep.mubr.bf16.mxu1 %v3404_v1 }
  0xc5   : > { %vm724_vm4 = vcmp.eq.s32.totalorder %v3646_v7, %v700_v54  ;;  %vm723_vm5 = vcmp.eq.s32.totalorder %v3646_v7, %v697_v55 }
  0xc6   : > { %vm2841_vm6 = vmpackc.low %vm724_vm4, %vm723_vm5 }
  0xc7   : > { %2812 = vmatmul.mubr.msk.bf16.gmra.mrb[24].mxu0 %vm2811_vm3, %v3405_v12 }
  0xc8   : > { %951 = vmatprep.mubr.bf16.mxu0 %v3404_v1  ;;  %v706_v56 = vpop.permute.xlu1 %705  ;;  %v703_v57 = vpop.permute.xlu0 %702 }
  0xc9   : > { %vm726_vm10 = vcmp.eq.s32.totalorder %v3646_v7, %v706_v56  ;;  %vm725_vm11 = vcmp.eq.s32.totalorder %v3646_v7, %v703_v57 }
  0xca   : > { %vm2843_vm12 = vmpackc.low %vm726_vm10, %vm725_vm11 }
  0xcb   : > { %2842 = vmatmul.mubr.msk.bf16.gmra.mrb[20].mxu1 %vm2841_vm6, %v3405_v12 }
  0xcc   : > { %1150 = vmatprep.mubr.bf16.mxu1 %v3404_v1  ;;  %v712_v58 = vpop.permute.xlu1 %711  ;;  %v709_v59 = vpop.permute.xlu0 %708 }
  0xcd   : > { %vm728_vm13 = vcmp.eq.s32.totalorder %v3646_v7, %v712_v58  ;;  %vm727_vm14 = vcmp.eq.s32.totalorder %v3646_v7, %v709_v59 }
  0xce   : > { %vm2845_vm15 = vmpackc.low %vm728_vm13, %vm727_vm14 }
  0xcf   : > { %2814 = vmatmul.mubr.msk.bf16.gmra.mrb[28].mxu0 %vm2813_vm9, %v3405_v12 }
  0xd3   : > { %2844 = vmatmul.mubr.msk.bf16.gmra.mrb[24].mxu1 %vm2843_vm12, %v3405_v12 }
  0xd4   : > { %1160 = vmatprep.mubr.bf16.mxu1 %v3404_v1  ;;  %v3285_v1 = vld [vmem:[%s4351_s5 + $0xa0] sm:$0xff]  }
  0xd5   : > { %2985 = vmatpush3.bf16.msra.mxu1 %v3285_v1 }
  0xd6   : > { %2986 = vmatprep.subr.bf16.mxu1 %v3287_v62 }
  0xd9   : > { %2987 = vmatpush3.bf16.msra.mxu1 %v3288_v0 }
  0xda   : > { %2988 = vmatprep.subr.bf16.mxu1 %v3289_v2 }
  0xdb   : > { %2846 = vmatmul.mubr.msk.bf16.gmra.mrb[28].mxu1 %vm2845_vm15, %v3405_v12  ;;  %v3291_v12 = vld [vmem:[%s4351_s5 + $0x108] sm:$0xff]  }
  0xdd   : > { %2989 = vmatpush3.bf16.msra.mxu1 %v3290_v3 }
  0xde   : > { %2990 = vmatprep.subr.bf16.mxu1 %v3292_v4 }
  0xe1   : > { %2991 = vmatpush3.bf16.msra.mxu1 %v3293_v5 }
 0x16a   : > { %v883_v6 = vpop.f32.mrb[0].mxu0 }
 0x16b   : > { %v885_v7 = vpop.f32.mrb[1].mxu0 }
 0x16c   : > { %v887_v8 = vpop.f32.mrb[2].mxu0 }
 0x16d   : > { %v1187_v9 = vpack.c.bf16 %v887_v8, %v883_v6  ;;  %v889_v10 = vpop.f32.mrb[3].mxu0 }
 0x16e   : > { %v1188_v11 = vpack.c.bf16 %v889_v10, %v885_v7 }
 0x170   : > { %1586 = vmatprep.mubr.bf16.mxu0 %v1188_v11 }
 0x171   : > { %1587 = vmatmul.mubr.bf16.vlgmr.msra.gmra.mrb[32].mxu0 %v1187_v9 }
 0x172   : > { %3089 = vmatpush3.bf16.msra.mxu0 %v3286_v63  ;;  %v893_v13 = vpop.f32.mrb[4].mxu0 }
 0x173   : > { %v895_v14 = vpop.f32.mrb[5].mxu0  ;;  %3090 = vmatprep.subr.bf16.mxu0 %v3291_v12 }
 0x174   : > { %v897_v16 = vpop.f32.mrb[6].mxu0 }
 0x175   : > { %v1189_v17 = vpack.c.bf16 %v897_v16, %v893_v13  ;;  %v899_v18 = vpop.f32.mrb[7].mxu0 }
 0x176   : > { %v1092_v19 = vpop.f32.mrb[0].mxu1  ;;  %v1190_v20 = vpack.c.bf16 %v899_v18, %v895_v14  ;;  %3091 = vmatpush3.bf16.msra.mxu0 %v3291_v12 }
 0x177   : > { %v1094_v21 = vpop.f32.mrb[1].mxu1  ;;  %3092 = vmatprep.subr.bf16.mxu0 %v3294_v15 }
 0x178   : > { %v1096_v22 = vpop.f32.mrb[2].mxu1  ;;  %1594 = vmatprep.mubr.bf16.mxu0 %v1190_v20 }
 0x179   : > { %v1203_v24 = vpack.c.bf16 %v1096_v22, %v1092_v19  ;;  %v1098_v25 = vpop.f32.mrb[3].mxu1  ;;  %1595 = vmatmul.mubr.bf16.gmra.mrb[36].mxu0 %v1189_v17 }
 0x17a   : > { %v1204_v26 = vpack.c.bf16 %v1098_v25, %v1094_v21  ;;  %v903_v27 = vpop.f32.mrb[8].mxu0  ;;  %3093 = vmatpush3.bf16.msra.mxu0 %v3294_v15 }
 0x17b   : > { %v905_v28 = vpop.f32.mrb[9].mxu0  ;;  %3094 = vmatprep.subr.bf16.mxu0 %v3295_v23 }
 0x17c   : > { %1683 = vmatprep.mubr.bf16.mxu1 %v1204_v26  ;;  %v907_v30 = vpop.f32.mrb[10].mxu0 }
 0x17d   : > { %1684 = vmatmul.mubr.bf16.vlgmr.msra.gmra.mrb[32].mxu1 %v1203_v24  ;;  %v1191_v31 = vpack.c.bf16 %v907_v30, %v903_v27  ;;  %v909_v32 = vpop.f32.mrb[11].mxu0  ;;  %v1172_v30 = vld [vmem:[%s3828_s21 + $0x8] sm:$0xff] }
 0x17e   : > { %v1102_v33 = vpop.f32.mrb[4].mxu1  ;;  %v1192_v34 = vpack.c.bf16 %v909_v32, %v905_v28  ;;  %3095 = vmatpush3.bf16.msra.mxu0 %v3295_v23 }
 0x17f   : > { %v1104_v35 = vpop.f32.mrb[5].mxu1  ;;  %3096 = vmatprep.subr.bf16.mxu0 %v3296_v29 }
 0x180   : > { %v1106_v36 = vpop.f32.mrb[6].mxu1  ;;  %1602 = vmatprep.mubr.bf16.mxu0 %v1192_v34 }
 0x181   : > { %v1205_v38 = vpack.c.bf16 %v1106_v36, %v1102_v33  ;;  %v1108_v39 = vpop.f32.mrb[7].mxu1  ;;  %1603 = vmatmul.mubr.bf16.gmra.mrb[40].mxu0 %v1191_v31 }
 0x182   : > { %v1206_v40 = vpack.c.bf16 %v1108_v39, %v1104_v35  ;;  %v913_v41 = vpop.f32.mrb[12].mxu0  ;;  %3097 = vmatpush3.bf16.msra.mxu0 %v3296_v29  ;;  %v1171_v29 = vld [vmem:[%s3828_s21] sm:$0xff] }
 0x183   : > { %v915_v42 = vpop.f32.mrb[13].mxu0  ;;  %3098 = vmatprep.subr.bf16.mxu0 %v3297_v37 }
 0x184   : > { %1691 = vmatprep.mubr.bf16.mxu1 %v1206_v40  ;;  %v917_v44 = vpop.f32.mrb[14].mxu0 }
 0x185   : > { %1692 = vmatmul.mubr.bf16.gmra.mrb[36].mxu1 %v1205_v38  ;;  %v1193_v45 = vpack.c.bf16 %v917_v44, %v913_v41  ;;  %v919_v46 = vpop.f32.mrb[15].mxu0  ;;  %v1175_v44 = vld [vmem:[%s3828_s21 + $0x20] sm:$0xff] }
 0x186   : > { %v1112_v47 = vpop.f32.mrb[8].mxu1  ;;  %v1194_v48 = vpack.c.bf16 %v919_v46, %v915_v42  ;;  %3099 = vmatpush3.bf16.msra.mxu0 %v3297_v37  ;;  %v1219_v37 = vpack.c.bf16 %v1172_v30, %v1171_v29  ;;  %v1173_v42 = vld [vmem:[%s3828_s21 + $0x10] sm:$0xff] }
 0x187   : > { %v1114_v49 = vpop.f32.mrb[9].mxu1  ;;  %3100 = vmatprep.subr.bf16.mxu0 %v3298_v43 }
 0x188   : > { %v1116_v50 = vpop.f32.mrb[10].mxu1  ;;  %1610 = vmatprep.mubr.bf16.mxu0 %v1194_v48 }
 0x189   : > { %v1207_v52 = vpack.c.bf16 %v1116_v50, %v1112_v47  ;;  %v1118_v53 = vpop.f32.mrb[11].mxu1  ;;  %1611 = vmatmul.mubr.bf16.gmra.mrb[44].mxu0 %v1193_v45  ;;  %v1176_v45 = vld [vmem:[%s3828_s21 + $0x28] sm:$0xff] }
 0x18a   : > { %v1208_v54 = vpack.c.bf16 %v1118_v53, %v1114_v49  ;;  %v923_v55 = vpop.f32.mrb[16].mxu0  ;;  %3101 = vmatpush3.bf16.msra.mxu0 %v3298_v43  ;;  %v1174_v43 = vld [vmem:[%s3828_s21 + $0x18] sm:$0xff]  ;;  %v1221_v49 = vpack.c.bf16 %v1176_v45, %v1175_v44 }
 0x18b   : > { %v925_v56 = vpop.f32.mrb[17].mxu0  ;;  %3102 = vmatprep.subr.bf16.mxu0 %v3299_v51  ;;  %v1220_v47 = vpack.c.bf16 %v1174_v43, %v1173_v42 }
 0x18c   : > { %1699 = vmatprep.mubr.bf16.mxu1 %v1208_v54  ;;  %v927_v57 = vpop.f32.mrb[18].mxu0  ;;  %v1177_v54 = vld [vmem:[%s3828_s21 + $0x30] sm:$0xff] }
 0x18d   : > { %1700 = vmatmul.mubr.bf16.gmra.mrb[40].mxu1 %v1207_v52  ;;  %v1195_v58 = vpack.c.bf16 %v927_v57, %v923_v55  ;;  %v929_v59 = vpop.f32.mrb[19].mxu0  ;;  %v1178_v55 = vld [vmem:[%s3828_s21 + $0x38] sm:$0xff]  ;;  %v1180_v57 = vld [vmem:[%s3828_s21 + $0x48] sm:$0xff] }
 0x18e   : > { %v1122_v60 = vpop.f32.mrb[12].mxu1  ;;  %v1196_v61 = vpack.c.bf16 %v929_v59, %v925_v56  ;;  %3103 = vmatpush3.bf16.msra.mxu0 %v3299_v51  ;;  %v1179_v56 = vld [vmem:[%s3828_s21 + $0x40] sm:$0xff] }
 0x18f   : > { %v1124_v1 = vpop.f32.mrb[13].mxu1  ;;  %v1223_v59 = vpack.c.bf16 %v1180_v57, %v1179_v56 }
 0x190   : > { %v1126_v62 = vpop.f32.mrb[14].mxu1  ;;  %1618 = vmatprep.mubr.bf16.mxu0 %v1196_v61  ;;  %v1182_v61 = vld [vmem:[%s3828_s21 + $0x58] sm:$0xff] }
 0x191   : > { %v1209_v63 = vpack.c.bf16 %v1126_v62, %v1122_v60  ;;  %v1128_v0 = vpop.f32.mrb[15].mxu1  ;;  %1619 = vmatmul.mubr.bf16.gmra.mrb[48].mxu0 %v1195_v58  ;;  %v1222_v58 = vpack.c.bf16 %v1178_v55, %v1177_v54  ;;  %v1181_v60 = vld [vmem:[%s3828_s21 + $0x50] sm:$0xff]  ;;  %v1184_v62 = vld [vmem:[%s3828_s21 + $0x68] sm:$0xff] }
 0x192   : > { %v1210_v2 = vpack.c.bf16 %v1128_v0, %v1124_v1  ;;  %v933_v3 = vpop.f32.mrb[20].mxu0  ;;  %v1183_v1 = vld [vmem:[%s3828_s21 + $0x60] sm:$0xff] }
 0x193   : > { %v935_v4 = vpop.f32.mrb[21].mxu0  ;;  %v1225_v0 = vpack.c.bf16 %v1184_v62, %v1183_v1 }
 0x194   : > { %1707 = vmatprep.mubr.bf16.mxu1 %v1210_v2  ;;  %v937_v5 = vpop.f32.mrb[22].mxu0  ;;  %v1185_v2 = vld [vmem:[%s3828_s21 + $0x70] sm:$0xff] }
 0x195   : > { %1708 = vmatmul.mubr.bf16.gmra.mrb[44].mxu1 %v1209_v63  ;;  %v1197_v6 = vpack.c.bf16 %v937_v5, %v933_v3  ;;  %v939_v7 = vpop.f32.mrb[23].mxu0  ;;  %v1224_v63 = vpack.c.bf16 %v1182_v61, %v1181_v60  ;;  %v1186_v3 = vld [vmem:[%s3828_s21 + $0x78] sm:$0xff]  ;;  %v3300_v5 = vld [vmem:[%s4353_s7] sm:$0xff]  }
 0x196   : > { %v1132_v8 = vpop.f32.mrb[16].mxu1  ;;  %v1198_v9 = vpack.c.bf16 %v939_v7, %v935_v4  ;;  %v1226_v4 = vpack.c.bf16 %v1186_v3, %v1185_v2  ;;  %3120 = vmatprep.subr.bf16.mxu1 %v3300_v5  ;;  %v3302_v7 = vld [vmem:[%s4353_s7 + $0x10] sm:$0xff]  }
 0x197   : > { %v1134_v10 = vpop.f32.mrb[17].mxu1  ;;  %3121 = vmatpush3.bf16.msra.mxu1 %v3300_v5 }
 0x198   : > { %v1136_v11 = vpop.f32.mrb[18].mxu1  ;;  %1626 = vmatprep.mubr.bf16.mxu0 %v1198_v9  ;;  %v3304_v9 = vld [vmem:[%s4353_s7 + $0x20] sm:$0xff]  }
 0x199   : > { %v1211_v12 = vpack.c.bf16 %v1136_v11, %v1132_v8  ;;  %v1138_v13 = vpop.f32.mrb[19].mxu1  ;;  %1627 = vmatmul.mubr.bf16.gmra.mrb[52].mxu0 %v1197_v6  ;;  %v3301_v6 = vld [vmem:[%s4353_s7 + $0x8] sm:$0xff]   ;;  %v3303_v8 = vld [vmem:[%s4353_s7 + $0x18] sm:$0xff]   ;;  %v3306_v11 = vld [vmem:[%s4353_s7 + $0x30] sm:$0xff]  }
 0x19a   : > { %v1212_v14 = vpack.c.bf16 %v1138_v13, %v1134_v10  ;;  %v943_v15 = vpop.f32.mrb[24].mxu0  ;;  %3122 = vmatprep.subr.bf16.mxu1 %v3301_v6  ;;  %v3305_v10 = vld [vmem:[%s4353_s7 + $0x28] sm:$0xff]  }
 0x19b   : > { %v945_v16 = vpop.f32.mrb[25].mxu0  ;;  %3123 = vmatpush3.bf16.msra.mxu1 %v3301_v6 }
 0x19c   : > { %1715 = vmatprep.mubr.bf16.mxu1 %v1212_v14  ;;  %v947_v17 = vpop.f32.mrb[26].mxu0  ;;  %3124 = vmatprep.subr.bf16.mxu1 %v3302_v7 }
 0x19d   : > { %1716 = vmatmul.mubr.bf16.gmra.mrb[48].mxu1 %v1211_v12  ;;  %v1199_v18 = vpack.c.bf16 %v947_v17, %v943_v15  ;;  %v949_v19 = vpop.f32.mrb[27].mxu0  ;;  %v3307_v12 = vld [vmem:[%s4353_s7 + $0x38] sm:$0xff]  }
 0x19e   : > { %v1142_v20 = vpop.f32.mrb[20].mxu1  ;;  %v1200_v21 = vpack.c.bf16 %v949_v19, %v945_v16 }
 0x19f   : > { %v1144_v22 = vpop.f32.mrb[21].mxu1  ;;  %3125 = vmatpush3.bf16.msra.mxu1 %v3302_v7 }
 0x1a0   : > { %v1146_v23 = vpop.f32.mrb[22].mxu1  ;;  %1634 = vmatprep.mubr.bf16.mxu0 %v1200_v21  ;;  %3126 = vmatprep.subr.bf16.mxu1 %v3303_v8  ;;  %v3873_v21 = vld [vmem:[%s4352_s6] ss:$0 sm:$0xff] }
 0x1a1   : > { %v1213_v24 = vpack.c.bf16 %v1146_v23, %v1142_v20  ;;  %v1148_v25 = vpop.f32.mrb[23].mxu1  ;;  %1635 = vmatmul.mubr.bf16.gmra.mrb[56].mxu0 %v1199_v18 }
 0x1a2   : > { %v1214_v26 = vpack.c.bf16 %v1148_v25, %v1144_v22  ;;  %v953_v27 = vpop.f32.mrb[28].mxu0 }
 0x1a3   : > { %v955_v28 = vpop.f32.mrb[29].mxu0  ;;  %3127 = vmatpush3.bf16.msra.mxu1 %v3303_v8 }
 0x1a4   : > { %1723 = vmatprep.mubr.bf16.mxu1 %v1214_v26  ;;  %v957_v31 = vpop.f32.mrb[30].mxu0  ;;  %3128 = vmatprep.subr.bf16.mxu1 %v3304_v9 }
 0x1a5   : > { %1724 = vmatmul.mubr.bf16.gmra.mrb[52].mxu1 %v1213_v24  ;;  %v1201_v32 = vpack.c.bf16 %v957_v31, %v953_v27  ;;  %v959_v33 = vpop.f32.mrb[31].mxu0 }
 0x1a6   : > { %v1152_v34 = vpop.f32.mrb[24].mxu1  ;;  %v1202_v35 = vpack.c.bf16 %v959_v33, %v955_v28 }
 0x1a7   : > { %v1154_v36 = vpop.f32.mrb[25].mxu1  ;;  %3129 = vmatpush3.bf16.msra.mxu1 %v3304_v9 }
 0x1a8   : > { %v1156_v38 = vpop.f32.mrb[26].mxu1  ;;  %1642 = vmatprep.mubr.bf16.mxu0 %v1202_v35  ;;  %3130 = vmatprep.subr.bf16.mxu1 %v3305_v10 }
 0x1a9   : > { %v1215_v39 = vpack.c.bf16 %v1156_v38, %v1152_v34  ;;  %v1158_v40 = vpop.f32.mrb[27].mxu1  ;;  %1643 = vmatmul.mubr.bf16.gmra.mrb[60].mxu0 %v1201_v32 }
 0x1aa   : > { %v1216_v41 = vpack.c.bf16 %v1158_v40, %v1154_v36  ;;  %3104 = vmatprep.mubr.bf16.mxu0 %v1219_v37 }
 0x1ab   : > { %3131 = vmatpush3.bf16.msra.mxu1 %v3305_v10 }
 0x1ac   : > { %1731 = vmatprep.mubr.bf16.mxu1 %v1216_v41  ;;  %3132 = vmatprep.subr.bf16.mxu1 %v3306_v11 }
 0x1ad   : > { %1732 = vmatmul.mubr.bf16.gmra.mrb[56].mxu1 %v1215_v39 }
 0x1ae   : > { %v1162_v46 = vpop.f32.mrb[28].mxu1 }
 0x1af   : > { %v1164_v48 = vpop.f32.mrb[29].mxu1  ;;  %3133 = vmatpush3.bf16.msra.mxu1 %v3306_v11 }
 0x1b0   : > { %v1166_v50 = vpop.f32.mrb[30].mxu1  ;;  %3134 = vmatprep.subr.bf16.mxu1 %v3307_v12 }
 0x1b1   : > { %v1217_v51 = vpack.c.bf16 %v1166_v50, %v1162_v46  ;;  %v1168_v52 = vpop.f32.mrb[31].mxu1  ;;  %3105 = vmatmul.mubr.bf16.vlgmr.msra.gmra.mrb[64].mxu0 %v1220_v47 }
 0x1b2   : > { %v1218_v53 = vpack.c.bf16 %v1168_v52, %v1164_v48  ;;  %3108 = vmatprep.mubr.bf16.mxu0 %v1221_v49 }
 0x1b3   : > { %3135 = vmatpush3.bf16.msra.mxu1 %v3307_v12 }
 0x1b4   : > { %1739 = vmatprep.mubr.bf16.mxu1 %v1218_v53 }
 0x1b5   : > { %1740 = vmatmul.mubr.bf16.gmra.mrb[60].mxu1 %v1217_v51 }
 0x1b9   : > { %3109 = vmatmul.mubr.bf16.gmra.mrb[68].mxu0 %v1222_v58 }
 0x1ba   : > { %3112 = vmatprep.mubr.bf16.mxu0 %v1223_v59 }
 0x1c1   : > { %3113 = vmatmul.mubr.bf16.gmra.mrb[72].mxu0 %v1224_v63 }
 0x1c2   : > { %3116 = vmatprep.mubr.bf16.mxu0 %v1225_v0 }
 0x1c9   : > { %3117 = vmatmul.mubr.bf16.gmra.mrb[76].mxu0 %v1226_v4 }
 0x244   : > { %v2928_v13 = vpop.f32.mrb[32].mxu0 }
 0x245   : > { %v2929_v14 = vpop.f32.mrb[33].mxu0 }
 0x246   : > { %v2930_v15 = vadd.f32 %v2929_v14, %v2928_v13  ;;  %v2931_v16 = vpop.f32.mrb[34].mxu0 }
 0x247   : > { %v2932_v17 = vpop.f32.mrb[35].mxu0 }
 0x248   : > { %v2933_v18 = vadd.f32 %v2932_v17, %v2931_v16  ;;  %v1589_v28 = vadd.f32 %v2930_v15, %v3873_v21 }
 0x24a   : > { %v1592_v32 = vadd.f32 %v2933_v18, %v3873_v21 }
 0x24c   : > { %v2934_v19 = vpop.f32.mrb[36].mxu0 }
 0x24d   : > { %v2935_v20 = vpop.f32.mrb[37].mxu0 }
 0x24e   : > { %v2936_v22 = vadd.f32 %v2935_v20, %v2934_v19  ;;  %v2937_v23 = vpop.f32.mrb[38].mxu0 }
 0x24f   : > { %v2938_v24 = vpop.f32.mrb[39].mxu0 }
 0x250   : > { %v2992_v25 = vpop.f32.mrb[32].mxu1  ;;  %v2939_v26 = vadd.f32 %v2938_v24, %v2937_v23  ;;  %v1597_v44 = vadd.f32 %v2936_v22, %v3873_v21 }
 0x251   : > { %v2993_v27 = vpop.f32.mrb[33].mxu1 }
 0x252   : > { %v2994_v29 = vadd.f32 %v2993_v27, %v2992_v25  ;;  %v2995_v30 = vpop.f32.mrb[34].mxu1  ;;  %v1600_v48 = vadd.f32 %v2939_v26, %v3873_v21 }
 0x253   : > { %v2996_v31 = vpop.f32.mrb[35].mxu1 }
 0x254   : > { %v2997_v33 = vadd.f32 %v2996_v31, %v2995_v30  ;;  %v3877_v34 = vadd.f32 %v2994_v29, %v1589_v28  ;;  %v2940_v35 = vpop.f32.mrb[40].mxu0 }
 0x255   : > { %v2941_v36 = vpop.f32.mrb[41].mxu0 }
 0x256   : > { %v3879_v37 = vadd.f32 %v2997_v33, %v1592_v32  ;;  %v2942_v38 = vadd.f32 %v2941_v36, %v2940_v35  ;;  %v2943_v39 = vpop.f32.mrb[42].mxu0 }
 0x257   : > { %v2944_v40 = vpop.f32.mrb[43].mxu0 }
 0x258   : > { %v2998_v41 = vpop.f32.mrb[36].mxu1  ;;  %v2945_v42 = vadd.f32 %v2944_v40, %v2943_v39  ;;  %v1605_v60 = vadd.f32 %v2942_v38, %v3873_v21 }
 0x259   : > { %v2999_v43 = vpop.f32.mrb[37].mxu1 }
 0x25a   : > { %v3000_v45 = vadd.f32 %v2999_v43, %v2998_v41  ;;  %v3001_v46 = vpop.f32.mrb[38].mxu1  ;;  %v1608_v63 = vadd.f32 %v2945_v42, %v3873_v21 }
 0x25b   : > { %v3002_v47 = vpop.f32.mrb[39].mxu1 }
 0x25c   : > { %v3003_v49 = vadd.f32 %v3002_v47, %v3001_v46  ;;  %v3883_v50 = vadd.f32 %v3000_v45, %v1597_v44  ;;  %v2946_v51 = vpop.f32.mrb[44].mxu0 }
 0x25d   : > { %v2947_v52 = vpop.f32.mrb[45].mxu0 }
 0x25e   : > { %v3885_v53 = vadd.f32 %v3003_v49, %v1600_v48  ;;  %v2948_v54 = vadd.f32 %v2947_v52, %v2946_v51  ;;  %v2949_v55 = vpop.f32.mrb[46].mxu0 }
 0x25f   : > { %v2950_v56 = vpop.f32.mrb[47].mxu0 }
 0x260   : > { %v3004_v57 = vpop.f32.mrb[40].mxu1  ;;  %v2951_v58 = vadd.f32 %v2950_v56, %v2949_v55  ;;  %v1613_v12 = vadd.f32 %v2948_v54, %v3873_v21 }
 0x261   : > { %v3005_v59 = vpop.f32.mrb[41].mxu1 }
 0x262   : > { %v3006_v61 = vadd.f32 %v3005_v59, %v3004_v57  ;;  %v3007_v1 = vpop.f32.mrb[42].mxu1  ;;  %v1616_v16 = vadd.f32 %v2951_v58, %v3873_v21 }
 0x263   : > { %v3008_v62 = vpop.f32.mrb[43].mxu1 }
 0x264   : > { %v3009_v0 = vadd.f32 %v3008_v62, %v3007_v1  ;;  %v3889_v2 = vadd.f32 %v3006_v61, %v1605_v60  ;;  %v2952_v3 = vpop.f32.mrb[48].mxu0 }
 0x265   : > { %v2953_v4 = vpop.f32.mrb[49].mxu0 }
 0x266   : > { %v3891_v5 = vadd.f32 %v3009_v0, %v1608_v63  ;;  %v2954_v6 = vadd.f32 %v2953_v4, %v2952_v3  ;;  %v2955_v7 = vpop.f32.mrb[50].mxu0 }
 0x267   : > { %v2956_v8 = vpop.f32.mrb[51].mxu0 }
 0x268   : > { %v3010_v9 = vpop.f32.mrb[44].mxu1  ;;  %v2957_v10 = vadd.f32 %v2956_v8, %v2955_v7  ;;  %v1621_v29 = vadd.f32 %v2954_v6, %v3873_v21 }
 0x269   : > { %v3011_v11 = vpop.f32.mrb[45].mxu1 }
 0x26a   : > { %v3012_v13 = vadd.f32 %v3011_v11, %v3010_v9  ;;  %v3013_v14 = vpop.f32.mrb[46].mxu1  ;;  %v1624_v33 = vadd.f32 %v2957_v10, %v3873_v21 }
 0x26b   : > { %v3014_v15 = vpop.f32.mrb[47].mxu1 }
 0x26c   : > { %v3015_v17 = vadd.f32 %v3014_v15, %v3013_v14  ;;  %v3895_v18 = vadd.f32 %v3012_v13, %v1613_v12  ;;  %v2958_v19 = vpop.f32.mrb[52].mxu0 }
 0x26d   : > { %v2959_v20 = vpop.f32.mrb[53].mxu0 }
 0x26e   : > { %v3897_v22 = vadd.f32 %v3015_v17, %v1616_v16  ;;  %v2960_v23 = vadd.f32 %v2959_v20, %v2958_v19  ;;  %v2961_v24 = vpop.f32.mrb[54].mxu0 }
 0x26f   : > { %v2962_v25 = vpop.f32.mrb[55].mxu0 }
 0x270   : > { %v3016_v26 = vpop.f32.mrb[48].mxu1  ;;  %v2963_v27 = vadd.f32 %v2962_v25, %v2961_v24  ;;  %v1629_v47 = vadd.f32 %v2960_v23, %v3873_v21 }
 0x271   : > { %v3017_v28 = vpop.f32.mrb[49].mxu1 }
 0x272   : > { %v3018_v30 = vadd.f32 %v3017_v28, %v3016_v26  ;;  %v3019_v31 = vpop.f32.mrb[50].mxu1  ;;  %v1632_v52 = vadd.f32 %v2963_v27, %v3873_v21 }
 0x273   : > { %v3020_v32 = vpop.f32.mrb[51].mxu1 }
 0x274   : > { %v3021_v35 = vadd.f32 %v3020_v32, %v3019_v31  ;;  %v3901_v36 = vadd.f32 %v3018_v30, %v1621_v29  ;;  %v2964_v38 = vpop.f32.mrb[56].mxu0 }
 0x275   : > { %v2965_v39 = vpop.f32.mrb[57].mxu0 }
 0x276   : > { %v3903_v40 = vadd.f32 %v3021_v35, %v1624_v33  ;;  %v2966_v41 = vadd.f32 %v2965_v39, %v2964_v38  ;;  %v2967_v42 = vpop.f32.mrb[58].mxu0 }
 0x277   : > { %v2968_v43 = vpop.f32.mrb[59].mxu0 }
 0x278   : > { %v3022_v44 = vpop.f32.mrb[52].mxu1  ;;  %v2969_v45 = vadd.f32 %v2968_v43, %v2967_v42  ;;  %v1637_v0 = vadd.f32 %v2966_v41, %v3873_v21 }
 0x279   : > { %v3023_v46 = vpop.f32.mrb[53].mxu1 }
 0x27a   : > { %v3024_v48 = vadd.f32 %v3023_v46, %v3022_v44  ;;  %v3025_v49 = vpop.f32.mrb[54].mxu1  ;;  %v1640_v7 = vadd.f32 %v2969_v45, %v3873_v21 }
 0x27b   : > { %v3026_v51 = vpop.f32.mrb[55].mxu1 }
 0x27c   : > { %v3027_v54 = vadd.f32 %v3026_v51, %v3025_v49  ;;  %v1726_v55 = vadd.f32 %v3024_v48, %v1629_v47  ;;  %v2970_v56 = vpop.f32.mrb[60].mxu0 }
 0x27d   : > { %v2971_v57 = vpop.f32.mrb[61].mxu0 }
 0x27e   : > { %v1729_v58 = vadd.f32 %v3027_v54, %v1632_v52  ;;  %v2972_v59 = vadd.f32 %v2971_v57, %v2970_v56  ;;  %v2973_v60 = vpop.f32.mrb[62].mxu0 }
 0x27f   : > { %v2974_v61 = vpop.f32.mrb[63].mxu0 }
 0x280   : > { %v3028_v1 = vpop.f32.mrb[56].mxu1  ;;  %v2975_v62 = vadd.f32 %v2974_v61, %v2973_v60  ;;  %v1645_v24 = vadd.f32 %v2972_v59, %v3873_v21 }
 0x281   : > { %v3029_v63 = vpop.f32.mrb[57].mxu1 }
 0x282   : > { %v3030_v3 = vadd.f32 %v3029_v63, %v3028_v1  ;;  %v3031_v4 = vpop.f32.mrb[58].mxu1 }
 0x283   : > { %v3032_v6 = vpop.f32.mrb[59].mxu1 }
 0x284   : > { %v3033_v8 = vadd.f32 %v3032_v6, %v3031_v4  ;;  %v1734_v9 = vadd.f32 %v3030_v3, %v1637_v0  ;;  %v3106_v10 = vpop.f32.mrb[64].mxu0 }
 0x285   : > { %v1791_v11 = vadd.f32 %v3106_v10, %v3883_v50  ;;  %v1782_v12 = vpop.f32.mrb[65].mxu0  ;;  %v1648_v50 = vadd.f32 %v2975_v62, %v3873_v21 }
 0x286   : > { %v1737_v13 = vadd.f32 %v3033_v8, %v1640_v7  ;;  %v1783_v14 = vadd.f32 %v1782_v12, %v3877_v34  ;;  %v3107_v15 = vpop.f32.mrb[66].mxu0 }
 0x287   : > { %v1794_v16 = vadd.f32 %v3107_v15, %v3885_v53  ;;  %v1785_v17 = vpop.f32.mrb[67].mxu0 }
 0x288   : > { %v3034_v19 = vpop.f32.mrb[60].mxu1  ;;  %v1786_v20 = vadd.f32 %v1785_v17, %v3879_v37 }
 0x289   : > { %v3035_v23 = vpop.f32.mrb[61].mxu1  ;;  %v1862_v25 = vpack.c.bf16 %v1794_v16, %v1791_v11 }
 0x28a   : > { %v3036_v26 = vadd.f32 %v3035_v23, %v3034_v19  ;;  %v3037_v27 = vpop.f32.mrb[62].mxu1  ;;  %v1861_v28 = vpack.c.bf16 %v1786_v20, %v1783_v14 }
 0x28b   : > { %v3038_v29 = vpop.f32.mrb[63].mxu1 }
 0x28c   : > { %v3039_v30 = vadd.f32 %v3038_v29, %v3037_v27  ;;  %v1742_v31 = vadd.f32 %v3036_v26, %v1645_v24  ;;  %v3110_v34 = vpop.f32.mrb[68].mxu0  ;;  %3136 = vmatprep.mubr.bf16.mxu1 %v1861_v28 }
 0x28d   : > { %v1807_v53 = vadd.f32 %v3110_v34, %v3895_v18  ;;  %v1798_v32 = vpop.f32.mrb[69].mxu0  ;;  %3137 = vmatmul.mubr.bf16.vlgmr.msra.gmra.mrb[64].mxu1 %v1862_v25 }
 0x28e   : > { %v1745_v33 = vadd.f32 %v3039_v30, %v1648_v50  ;;  %v1799_v37 = vadd.f32 %v1798_v32, %v3889_v2  ;;  %v3111_v35 = vpop.f32.mrb[70].mxu0 }
 0x28f   : > { %v1810_v38 = vadd.f32 %v3111_v35, %v3897_v22  ;;  %v1801_v39 = vpop.f32.mrb[71].mxu0 }
 0x290   : > { %v1802_v41 = vadd.f32 %v1801_v39, %v3891_v5 }
 0x291   : > { %v1864_v42 = vpack.c.bf16 %v1810_v38, %v1807_v53 }
 0x292   : > { %v1863_v43 = vpack.c.bf16 %v1802_v41, %v1799_v37 }
 0x294   : > { %v3114_v21 = vpop.f32.mrb[72].mxu0  ;;  %3140 = vmatprep.mubr.bf16.mxu1 %v1863_v43 }
 0x295   : > { %v1823_v44 = vadd.f32 %v3114_v21, %v1726_v55  ;;  %v1814_v45 = vpop.f32.mrb[73].mxu0  ;;  %3141 = vmatmul.mubr.bf16.gmra.mrb[68].mxu1 %v1864_v42 }
 0x296   : > { %v1815_v18 = vadd.f32 %v1814_v45, %v3901_v36  ;;  %v3115_v46 = vpop.f32.mrb[74].mxu0  ;;  %v2888_v36 = vld [vmem:[%s4354_s8] ss:$0 sm:$0xff] }
 0x297   : > { %v1826_v47 = vadd.f32 %v3115_v46, %v1729_v58  ;;  %v1817_v48 = vpop.f32.mrb[75].mxu0 }
 0x298   : > { %v1818_v2 = vadd.f32 %v1817_v48, %v3903_v40 }
 0x299   : > { %v1866_v49 = vpack.c.bf16 %v1826_v47, %v1823_v44 }
 0x29a   : > { %v1865_v51 = vpack.c.bf16 %v1818_v2, %v1815_v18 }
 0x29c   : > { %v3118_v22 = vpop.f32.mrb[76].mxu0  ;;  %3144 = vmatprep.mubr.bf16.mxu1 %v1865_v51 }
 0x29d   : > { %v1839_v52 = vadd.f32 %v3118_v22, %v1742_v31  ;;  %v1830_v5 = vpop.f32.mrb[77].mxu0  ;;  %3145 = vmatmul.mubr.bf16.gmra.mrb[72].mxu1 %v1866_v49 }
 0x29e   : > { %v1831_v54 = vadd.f32 %v1830_v5, %v1734_v9  ;;  %v3119_v56 = vpop.f32.mrb[78].mxu0 }
 0x29f   : > { %v1842_v57 = vadd.f32 %v3119_v56, %v1745_v33  ;;  %v1833_v55 = vpop.f32.mrb[79].mxu0 }
 0x2a0   : > { %v1834_v59 = vadd.f32 %v1833_v55, %v1737_v13 }
 0x2a1   : > { %v1868_v60 = vpack.c.bf16 %v1842_v57, %v1839_v52 }
 0x2a2   : > { %v1867_v61 = vpack.c.bf16 %v1834_v59, %v1831_v54 }
 0x2a4   : > { %3148 = vmatprep.mubr.bf16.mxu1 %v1867_v61 }
 0x2a5   : > { %3149 = vmatmul.mubr.bf16.gmra.mrb[76].mxu1 %v1868_v60 }
 0x360   : > { %v3138_v40 = vpop.f32.mrb[64].mxu1 }
 0x361   : > { %v1967_v58 = vadd.f32 %v3138_v40, %v2888_v36  ;;  %v1958_v1 = vpop.f32.mrb[65].mxu1 }
 0x362   : > { %v1959_v62 = vadd.f32 %v2888_v36, %v1958_v1  ;;  %v3139_v63 = vpop.f32.mrb[66].mxu1 }
 0x363   : > { %2027 = vadd.xlane.f32.xlu1 %v1967_v58  ;;  %v1961_v0 = vpop.f32.mrb[67].mxu1  ;;  %v1970_v4 = vadd.f32 %v3139_v63, %v2888_v36 }
 0x364   : > { %v1962_v3 = vadd.f32 %v2888_v36, %v1961_v0  ;;  %2023 = vadd.xlane.f32.xlu0 %v1959_v62 }
 0x367   : > { %2025 = vadd.xlane.f32.xlu1 %v1962_v3 }
 0x368   : > { %v3142_v6 = vpop.f32.mrb[68].mxu1  ;;  %2029 = vadd.xlane.f32.xlu0 %v1970_v4 }
 0x369   : > { %v3924_v7 = vadd.f32 %v3142_v6, %v2888_v36  ;;  %v1974_v8 = vpop.f32.mrb[69].mxu1 }
 0x36a   : > { %v3143_v9 = vpop.f32.mrb[70].mxu1  ;;  %v1975_v12 = vadd.f32 %v2888_v36, %v1974_v8 }
 0x36b   : > { %v1977_v10 = vpop.f32.mrb[71].mxu1  ;;  %2035 = vadd.xlane.f32.xlu1 %v3924_v7  ;;  %v3933_v29 = vadd.f32 %v3143_v9, %v2888_v36 }
 0x36c   : > { %v1978_v11 = vadd.f32 %v2888_v36, %v1977_v10 }
 0x36e   : > { %2033 = vadd.xlane.f32.xlu0 %v1978_v11 }
 0x36f   : > { %2031 = vadd.xlane.f32.xlu1 %v1975_v12 }
 0x370   : > { %v3146_v13 = vpop.f32.mrb[72].mxu1 }
 0x371   : > { %v1999_v14 = vadd.f32 %v3146_v13, %v2888_v36  ;;  %v1990_v15 = vpop.f32.mrb[73].mxu1 }
 0x372   : > { %v1991_v16 = vadd.f32 %v2888_v36, %v1990_v15  ;;  %v3147_v17 = vpop.f32.mrb[74].mxu1 }
 0x373   : > { %v1993_v19 = vpop.f32.mrb[75].mxu1  ;;  %2043 = vadd.xlane.f32.xlu1 %v1999_v14  ;;  %v2002_v20 = vadd.f32 %v3147_v17, %v2888_v36 }
 0x374   : > { %2039 = vadd.xlane.f32.xlu0 %v1991_v16  ;;  %v3927_v25 = vadd.f32 %v2888_v36, %v1993_v19 }
 0x378   : > { %2045 = vadd.xlane.f32.xlu0 %v2002_v20  ;;  %v3150_v23 = vpop.f32.mrb[76].mxu1 }
 0x379   : > { %v2006_v24 = vpop.f32.mrb[77].mxu1  ;;  %v3935_v50 = vadd.f32 %v3150_v23, %v2888_v36 }
 0x37a   : > { %v3929_v26 = vadd.f32 %v2888_v36, %v2006_v24  ;;  %v3151_v27 = vpop.f32.mrb[78].mxu1 }
 0x37b   : > { %v2009_v28 = vpop.f32.mrb[79].mxu1  ;;  %v3942_v31 = vadd.f32 %v3151_v27, %v2888_v36 }
 0x37c   : > { %2041 = vadd.xlane.f32.xlu0 %v3927_v25  ;;  %2047 = vadd.xlane.f32.xlu1 %v3929_v26  ;;  %v3939_v30 = vadd.f32 %v2888_v36, %v2009_v28 }
 0x380   : > { %2037 = vadd.xlane.f32.xlu0 %v3933_v29  ;;  %2051 = vadd.xlane.f32.xlu1 %v3935_v50 }
 0x384   : > { %2049 = vadd.xlane.f32.xlu0 %v3939_v30 }
 0x388   : > { %2053 = vadd.xlane.f32.xlu0 %v3942_v31 }
 0x3f0   : > { %v2028_v34 = vpop.xlane.xlu1 %2027 }
 0x3f1   : > { %v2058_v53 = vmul.f32 0.0078125, %v2028_v34  ;;  %v2024_v32 = vpop.xlane.xlu0 %2023 }
 0x3f2   : > { %v2056_v33 = vmul.f32 0.0078125, %v2024_v32 }
 0x3f3   : > { %v3945_v37 = vsub.f32 %v1967_v58, %v2058_v53 }
 0x3f4   : > { %v2026_v35 = vpop.xlane.xlu1 %2025  ;;  %v3947_v38 = vsub.f32 %v1959_v62, %v2056_v33  ;;  %v3308_v62 = vld [vmem:[%s4357_s11] sm:$0xff]  }
 0x3f5   : > { %v2030_v39 = vpop.xlane.xlu0 %2029  ;;  %v2090_v41 = vmul.f32 %v3945_v37, %v3945_v37  ;;  %v2057_v42 = vmul.f32 0.0078125, %v2026_v35  ;;  %3152 = vmatprep.subr.bf16.mxu0 %v3308_v62  ;;  %3184 = vmatprep.subr.bf16.mxu1 %v3308_v62  ;;  %v3312_v35 = vld [vmem:[%s4357_s11 + $0x20] sm:$0xff]  }
 0x3f6   : > { %v2059_v43 = vmul.f32 0.0078125, %v2030_v39  ;;  %v2088_v45 = vmul.f32 %v3947_v38, %v3947_v38  ;;  %3153 = vmatpush3.bf16.msra.mxu0 %v3308_v62  ;;  %3192 = vmatpush3.bf16.msra.mxu1 %v3308_v62 }
 0x3f7   : > { %2108 = vadd.xlane.f32.xlu1 %v2090_v41  ;;  %v3955_v18 = vsub.f32 %v1962_v3, %v2057_v42  ;;  %v3313_v41 = vld [vmem:[%s4357_s11 + $0x28] sm:$0xff]   ;;  %v3315_v42 = vld [vmem:[%s4357_s11 + $0x38] sm:$0xff]  }
 0x3f8   : > { %v3951_v21 = vsub.f32 %v1970_v4, %v2059_v43  ;;  %v2036_v44 = vpop.xlane.xlu1 %2035 }
 0x3f9   : > { %v2089_v22 = vmul.f32 %v3955_v18, %v3955_v18  ;;  %v2062_v61 = vmul.f32 0.0078125, %v2036_v44 }
 0x3fa   : > { %v2091_v46 = vmul.f32 %v3951_v21, %v3951_v21 }
 0x3fb   : > { %v2034_v47 = vpop.xlane.xlu0 %2033  ;;  %2104 = vadd.xlane.f32.xlu1 %v2088_v45  ;;  %v3981_v0 = vsub.f32 %v3924_v7, %v2062_v61 }
 0x3fc   : > { %v2061_v48 = vmul.f32 0.0078125, %v2034_v47  ;;  %v2032_v2 = vpop.xlane.xlu1 %2031  ;;  %2110 = vadd.xlane.f32.xlu0 %v2091_v46 }
 0x3fd   : > { %v2060_v49 = vmul.f32 0.0078125, %v2032_v2  ;;  %v2094_v15 = vmul.f32 %v3981_v0, %v3981_v0 }
 0x3fe   : > { %v3959_v51 = vsub.f32 %v1978_v11, %v2061_v48  ;;  %v3309_v11 = vld [vmem:[%s4357_s11 + $0x8] sm:$0xff]  }
 0x3ff   : > { %v3963_v52 = vsub.f32 %v1975_v12, %v2060_v49  ;;  %3154 = vmatprep.subr.bf16.mxu0 %v3309_v11  ;;  %3185 = vmatprep.subr.bf16.mxu1 %v3309_v11 }
 0x400   : > { %v2044_v5 = vpop.xlane.xlu1 %2043  ;;  %2106 = vadd.xlane.f32.xlu0 %v2089_v22  ;;  %v2093_v59 = vmul.f32 %v3959_v51, %v3959_v51  ;;  %3155 = vmatpush3.bf16.msra.mxu0 %v3309_v11 }
 0x401   : > { %v2066_v54 = vmul.f32 0.0078125, %v2044_v5  ;;  %v2040_v56 = vpop.xlane.xlu0 %2039  ;;  %v2092_v57 = vmul.f32 %v3963_v52, %v3963_v52  ;;  %3193 = vmatpush3.bf16.msra.mxu1 %v3309_v11 }
 0x402   : > { %v2064_v55 = vmul.f32 0.0078125, %v2040_v56 }
 0x403   : > { %v3969_v60 = vsub.f32 %v1999_v14, %v2066_v54  ;;  %2112 = vadd.xlane.f32.xlu1 %v2092_v57 }
 0x404   : > { %2114 = vadd.xlane.f32.xlu0 %v2093_v59  ;;  %v3971_v36 = vsub.f32 %v1991_v16, %v2064_v55 }
 0x405   : > { %v2046_v40 = vpop.xlane.xlu0 %2045  ;;  %v2098_v58 = vmul.f32 %v3969_v60, %v3969_v60 }
 0x406   : > { %v2067_v1 = vmul.f32 0.0078125, %v2046_v40  ;;  %v2096_v6 = vmul.f32 %v3971_v36, %v3971_v36 }
 0x407   : > { %2124 = vadd.xlane.f32.xlu1 %v2098_v58 }
 0x408   : > { %v3978_v63 = vsub.f32 %v2002_v20, %v2067_v1  ;;  %v3310_v20 = vld [vmem:[%s4357_s11 + $0x10] sm:$0xff]  }
 0x409   : > { %v2042_v3 = vpop.xlane.xlu0 %2041  ;;  %v2048_v4 = vpop.xlane.xlu1 %2047  ;;  %3156 = vmatprep.subr.bf16.mxu0 %v3310_v20  ;;  %3186 = vmatprep.subr.bf16.mxu1 %v3310_v20 }
 0x40a   : > { %v2065_v8 = vmul.f32 0.0078125, %v2042_v3  ;;  %v2068_v9 = vmul.f32 0.0078125, %v2048_v4  ;;  %v2099_v10 = vmul.f32 %v3978_v63, %v3978_v63  ;;  %3157 = vmatpush3.bf16.msra.mxu0 %v3310_v20  ;;  %3194 = vmatpush3.bf16.msra.mxu1 %v3310_v20 }
 0x40b   : > { %2120 = vadd.xlane.f32.xlu1 %v2096_v6 }
 0x40c   : > { %v3991_v7 = vsub.f32 %v3927_v25, %v2065_v8  ;;  %2126 = vadd.xlane.f32.xlu0 %v2099_v10  ;;  %v3994_v12 = vsub.f32 %v3929_v26, %v2068_v9 }
 0x40d   : > { %v2038_v13 = vpop.xlane.xlu0 %2037  ;;  %v2052_v14 = vpop.xlane.xlu1 %2051 }
 0x40e   : > { %v2063_v16 = vmul.f32 0.0078125, %v2038_v13  ;;  %v2070_v17 = vmul.f32 0.0078125, %v2052_v14  ;;  %v2097_v19 = vmul.f32 %v3991_v7, %v3991_v7  ;;  %v2100_v26 = vmul.f32 %v3994_v12, %v3994_v12  ;;  %v4045_v13 = vld [vmem:[%s4355_s9] ss:$0 sm:$0xff] }
 0x40f   : > { %2116 = vadd.xlane.f32.xlu1 %v2094_v15 }
 0x410   : > { %v4004_v23 = vsub.f32 %v3933_v29, %v2063_v16  ;;  %2122 = vadd.xlane.f32.xlu0 %v2097_v19  ;;  %v4007_v24 = vsub.f32 %v3935_v50, %v2070_v17  ;;  %v3311_v29 = vld [vmem:[%s4357_s11 + $0x18] sm:$0xff]  }
 0x411   : > { %v2050_v25 = vpop.xlane.xlu0 %2049  ;;  %3158 = vmatprep.subr.bf16.mxu0 %v3311_v29  ;;  %3187 = vmatprep.subr.bf16.mxu1 %v3311_v29 }
 0x412   : > { %v2069_v27 = vmul.f32 0.0078125, %v2050_v25  ;;  %v2095_v28 = vmul.f32 %v4004_v23, %v4004_v23  ;;  %v2102_v53 = vmul.f32 %v4007_v24, %v4007_v24  ;;  %3159 = vmatpush3.bf16.msra.mxu0 %v3311_v29  ;;  %3195 = vmatpush3.bf16.msra.mxu1 %v3311_v29 }
 0x413   : > { %2128 = vadd.xlane.f32.xlu1 %v2100_v26  ;;  %3160 = vmatprep.subr.bf16.mxu0 %v3312_v35 }
 0x414   : > { %v4017_v34 = vsub.f32 %v3939_v30, %v2069_v27  ;;  %2118 = vadd.xlane.f32.xlu0 %v2095_v28  ;;  %3188 = vmatprep.subr.bf16.mxu1 %v3312_v35  ;;  %v4054_v28 = vld [vmem:[%s4356_s10] ss:$0 sm:$0xff] }
 0x415   : > { %v2054_v50 = vpop.xlane.xlu0 %2053 }
 0x416   : > { %v2071_v32 = vmul.f32 0.0078125, %v2054_v50  ;;  %v2101_v33 = vmul.f32 %v4017_v34, %v4017_v34  ;;  %3161 = vmatpush3.bf16.msra.mxu0 %v3312_v35  ;;  %3196 = vmatpush3.bf16.msra.mxu1 %v3312_v35 }
 0x417   : > { %2132 = vadd.xlane.f32.xlu1 %v2102_v53  ;;  %3162 = vmatprep.subr.bf16.mxu0 %v3313_v41 }
 0x418   : > { %v4027_v30 = vsub.f32 %v3942_v31, %v2071_v32  ;;  %2130 = vadd.xlane.f32.xlu0 %v2101_v33  ;;  %3189 = vmatprep.subr.bf16.mxu1 %v3313_v41  ;;  %v3314_v31 = vld [vmem:[%s4357_s11 + $0x30] sm:$0xff]  }
 0x41a   : > { %v2103_v39 = vmul.f32 %v4027_v30, %v4027_v30  ;;  %3163 = vmatpush3.bf16.msra.mxu0 %v3313_v41  ;;  %3197 = vmatpush3.bf16.msra.mxu1 %v3313_v41 }
 0x41b   : > { %3164 = vmatprep.subr.bf16.mxu0 %v3314_v31  ;;  %3190 = vmatprep.subr.bf16.mxu1 %v3314_v31 }
 0x41c   : > { %2134 = vadd.xlane.f32.xlu0 %v2103_v39 }
 0x41e   : > { %3165 = vmatpush3.bf16.msra.mxu0 %v3314_v31  ;;  %3198 = vmatpush3.bf16.msra.mxu1 %v3314_v31 }
 0x41f   : > { %3166 = vmatprep.subr.bf16.mxu0 %v3315_v42  ;;  %3191 = vmatprep.subr.bf16.mxu1 %v3315_v42 }
 0x422   : > { %3167 = vmatpush3.bf16.msra.mxu0 %v3315_v42  ;;  %3199 = vmatpush3.bf16.msra.mxu1 %v3315_v42 }
 0x484   : > { %v2109_v43 = vpop.xlane.xlu1 %2108 }
 0x485   : > { %v2138_v44 = vmul.f32 0.0078125, %v2109_v43 }
 0x487   : > { %v2154_v45 = vadd.f32 1e-05, %v2138_v44 }
 0x488   : > { %v2105_v46 = vpop.xlane.xlu1 %2104 }
 0x489   : > { %v2136_v47 = vmul.f32 0.0078125, %v2105_v46  ;;  %v2111_v48 = vpop.xlane.xlu0 %2110  ;;  %3316 = vrsqrt.f32 %v2154_v45 }
 0x48a   : > { %v2139_v2 = vmul.f32 0.0078125, %v2111_v48 }
 0x48b   : > { %v2152_v49 = vadd.f32 1e-05, %v2136_v47 }
 0x48c   : > { %v2155_v22 = vadd.f32 1e-05, %v2139_v2 }
 0x48d   : > { %3318 = vrsqrt.f32 %v2152_v49  ;;  %v2107_v5 = vpop.xlane.xlu0 %2106 }
 0x48e   : > { %3320 = vrsqrt.f32 %v2155_v22  ;;  %v2137_v54 = vmul.f32 0.0078125, %v2107_v5 }
 0x490   : > { %v2153_v56 = vadd.f32 1e-05, %v2137_v54  ;;  %v2113_v57 = vpop.xlane.xlu1 %2112 }
 0x491   : > { %v2140_v55 = vmul.f32 0.0078125, %v2113_v57  ;;  %v2115_v59 = vpop.xlane.xlu0 %2114 }
 0x492   : > { %3322 = vrsqrt.f32 %v2153_v56  ;;  %v2141_v61 = vmul.f32 0.0078125, %v2115_v59 }
 0x493   : > { %v2156_v40 = vadd.f32 1e-05, %v2140_v55  ;;  %v3317_v62 = vpop.eup %3316 }
 0x494   : > { %v2157_v58 = vadd.f32 1e-05, %v2141_v61  ;;  %v2125_v1 = vpop.xlane.xlu1 %2124  ;;  %v2186_v9 = vmul.f32 %v3317_v62, %v3945_v37 }
 0x495   : > { %3324 = vrsqrt.f32 %v2156_v40  ;;  %v2146_v3 = vmul.f32 0.0078125, %v2125_v1 }
 0x496   : > { %3326 = vrsqrt.f32 %v2157_v58  ;;  %v2208_v26 = vmul.f32 %v4045_v13, %v2186_v9 }
 0x497   : > { %v3319_v4 = vpop.eup %3318  ;;  %v2162_v6 = vadd.f32 1e-05, %v2146_v3 }
 0x498   : > { %v3321_v8 = vpop.eup %3320  ;;  %v2121_v10 = vpop.xlane.xlu1 %2120  ;;  %v2184_v11 = vmul.f32 %v3319_v4, %v3947_v38  ;;  %v2230_v44 = vadd.f32 %v4054_v28, %v2208_v26 }
 0x499   : > { %v2187_v14 = vmul.f32 %v3321_v8, %v3951_v21  ;;  %v2144_v15 = vmul.f32 0.0078125, %v2121_v10  ;;  %v2127_v16 = vpop.xlane.xlu0 %2126  ;;  %3328 = vrsqrt.f32 %v2162_v6 }
 0x49a   : > { %v2147_v17 = vmul.f32 0.0078125, %v2127_v16  ;;  %v2206_v25 = vmul.f32 %v4045_v13, %v2184_v11  ;;  %v2246_v59 = vmax.f32 %v2230_v44, 0.0 }
 0x49b   : > { %v2209_v19 = vmul.f32 %v4045_v13, %v2187_v14  ;;  %v2160_v20 = vadd.f32 1e-05, %v2144_v15 }
 0x49c   : > { %v3323_v37 = vpop.eup %3322  ;;  %v2163_v38 = vadd.f32 1e-05, %v2147_v17  ;;  %v2117_v27 = vpop.xlane.xlu1 %2116  ;;  %v2228_v41 = vadd.f32 %v4054_v28, %v2206_v25 }
 0x49d   : > { %3330 = vrsqrt.f32 %v2160_v20  ;;  %v2142_v21 = vmul.f32 0.0078125, %v2117_v27  ;;  %v2123_v29 = vpop.xlane.xlu0 %2122  ;;  %v2185_v50 = vmul.f32 %v3323_v37, %v3955_v18  ;;  %v2231_v53 = vadd.f32 %v4054_v28, %v2209_v19 }
 0x49e   : > { %3332 = vrsqrt.f32 %v2163_v38  ;;  %v2145_v32 = vmul.f32 0.0078125, %v2123_v29  ;;  %v2244_v54 = vmax.f32 %v2228_v41, 0.0 }
 0x49f   : > { %v3325_v33 = vpop.eup %3324  ;;  %v2158_v35 = vadd.f32 1e-05, %v2142_v21  ;;  %v2207_v39 = vmul.f32 %v4045_v13, %v2185_v50  ;;  %v2247_v48 = vmax.f32 %v2231_v53, 0.0 }
 0x4a0   : > { %v3327_v31 = vpop.eup %3326  ;;  %v2161_v42 = vadd.f32 1e-05, %v2145_v32  ;;  %v2129_v43 = vpop.xlane.xlu1 %2128  ;;  %v2188_v45 = vmul.f32 %v3325_v33, %v3963_v52 }
 0x4a1   : > { %3334 = vrsqrt.f32 %v2158_v35  ;;  %v2148_v46 = vmul.f32 0.0078125, %v2129_v43  ;;  %v2119_v18 = vpop.xlane.xlu0 %2118  ;;  %v2229_v47 = vadd.f32 %v4054_v28, %v2207_v39  ;;  %v2189_v49 = vmul.f32 %v3327_v31, %v3959_v51 }
 0x4a2   : > { %3336 = vrsqrt.f32 %v2161_v42  ;;  %v2143_v2 = vmul.f32 0.0078125, %v2119_v18  ;;  %v2210_v22 = vmul.f32 %v4045_v13, %v2188_v45  ;;  %v2277_v51 = vpack.c.bf16 %v2247_v48, %v2246_v59 }
 0x4a3   : > { %v2164_v5 = vadd.f32 1e-05, %v2148_v46  ;;  %v2245_v56 = vmax.f32 %v2229_v47, 0.0  ;;  %v2211_v52 = vmul.f32 %v4045_v13, %v2189_v49  ;;  %v3329_v40 = vpop.eup %3328 }
 0x4a4   : > { %v2159_v57 = vadd.f32 1e-05, %v2143_v2  ;;  %v2133_v55 = vpop.xlane.xlu1 %2132  ;;  %v2232_v61 = vadd.f32 %v4054_v28, %v2210_v22  ;;  %v2194_v11 = vmul.f32 %v3329_v40, %v3969_v60 }
 0x4a5   : > { %3338 = vrsqrt.f32 %v2164_v5  ;;  %v2150_v58 = vmul.f32 0.0078125, %v2133_v55  ;;  %v2131_v1 = vpop.xlane.xlu0 %2130  ;;  %v2276_v62 = vpack.c.bf16 %v2245_v56, %v2244_v54  ;;  %v2233_v4 = vadd.f32 %v4054_v28, %v2211_v52 }
 0x4a6   : > { %3340 = vrsqrt.f32 %v2159_v57  ;;  %v2149_v3 = vmul.f32 0.0078125, %v2131_v1  ;;  %v2248_v9 = vmax.f32 %v2232_v61, 0.0  ;;  %v2216_v60 = vmul.f32 %v4045_v13, %v2194_v11 }
 0x4a7   : > { %v3331_v6 = vpop.eup %3330  ;;  %v2166_v8 = vadd.f32 1e-05, %v2150_v58  ;;  %3168 = vmatprep.mubr.bf16.mxu0 %v2276_v62  ;;  %v2249_v15 = vmax.f32 %v2233_v4, 0.0 }
 0x4a8   : > { %v3333_v10 = vpop.eup %3332  ;;  %v2165_v14 = vadd.f32 1e-05, %v2149_v3  ;;  %3169 = vmatmul.mubr.bf16.vlgmr.msra.gmra.mrb[80].mxu0 %v2277_v51  ;;  %v2192_v16 = vmul.f32 %v3331_v6, %v3971_v36  ;;  %v2238_v39 = vadd.f32 %v4054_v28, %v2216_v60 }
 0x4a9   : > { %v2195_v17 = vmul.f32 %v3333_v10, %v3978_v63  ;;  %3342 = vrsqrt.f32 %v2166_v8  ;;  %v2135_v19 = vpop.xlane.xlu0 %2134  ;;  %v2278_v25 = vpack.c.bf16 %v2249_v15, %v2248_v9  ;;  %v3380_v15 = vld [vmem:[%s3828_s21 + $0x10] sm:$0xff] }
 0x4aa   : > { %3344 = vrsqrt.f32 %v2165_v14  ;;  %v2151_v20 = vmul.f32 0.0078125, %v2135_v19  ;;  %v2214_v38 = vmul.f32 %v4045_v13, %v2192_v16  ;;  %v2254_v48 = vmax.f32 %v2238_v39, 0.0  ;;  %v3381_v19 = vld [vmem:[%s3828_s21 + $0x18] sm:$0xff]  ;;  %v3384_v39 = vld [vmem:[%s3828_s21 + $0x30] sm:$0xff] }
 0x4ab   : > { %v3335_v37 = vpop.eup %3334  ;;  %v2217_v26 = vmul.f32 %v4045_v13, %v2195_v17  ;;  %3172 = vmatprep.mubr.bf16.mxu0 %v2278_v25  ;;  %v3382_v25 = vld [vmem:[%s3828_s21] sm:$0xff] }
 0x4ac   : > { %v3337_v27 = vpop.eup %3336  ;;  %v2167_v21 = vadd.f32 1e-05, %v2151_v20  ;;  %v2190_v29 = vmul.f32 %v3335_v37, %v3981_v0  ;;  %v2236_v33 = vadd.f32 %v4054_v28, %v2214_v38 }
 0x4ad   : > { %v2193_v36 = vmul.f32 %v3337_v27, %v3991_v7  ;;  %v2239_v63 = vadd.f32 %v4054_v28, %v2217_v26  ;;  %v3383_v26 = vld [vmem:[%s3828_s21 + $0x8] sm:$0xff] }
 0x4ae   : > { %3346 = vrsqrt.f32 %v2167_v21  ;;  %v2212_v50 = vmul.f32 %v4045_v13, %v2190_v29  ;;  %v2252_v44 = vmax.f32 %v2236_v33, 0.0 }
 0x4af   : > { %v3339_v53 = vpop.eup %3338  ;;  %v2215_v32 = vmul.f32 %v4045_v13, %v2193_v36  ;;  %v2255_v7 = vmax.f32 %v2239_v63, 0.0 }
 0x4b0   : > { %v3341_v35 = vpop.eup %3340  ;;  %v2196_v41 = vmul.f32 %v3339_v53, %v3994_v12  ;;  %v2234_v42 = vadd.f32 %v4054_v28, %v2212_v50 }
 0x4b1   : > { %v2237_v31 = vadd.f32 %v4054_v28, %v2215_v32  ;;  %v2191_v0 = vmul.f32 %v3341_v35, %v4004_v23  ;;  %v2281_v23 = vpack.c.bf16 %v2255_v7, %v2254_v48 }
 0x4b2   : > { %v2218_v18 = vmul.f32 %v4045_v13, %v2196_v41  ;;  %v2250_v5 = vmax.f32 %v2234_v42, 0.0 }
 0x4b3   : > { %v3343_v43 = vpop.eup %3342  ;;  %v2253_v45 = vmax.f32 %v2237_v31, 0.0  ;;  %v2213_v46 = vmul.f32 %v4045_v13, %v2191_v0  ;;  %v3385_v0 = vld [vmem:[%s3828_s21 + $0x38] sm:$0xff] }
 0x4b4   : > { %v3345_v47 = vpop.eup %3344  ;;  %v2198_v2 = vmul.f32 %v3343_v43, %v4007_v24  ;;  %v2240_v57 = vadd.f32 %v4054_v28, %v2218_v18  ;;  %v3386_v43 = vld [vmem:[%s3828_s21 + $0x20] sm:$0xff] }
 0x4b5   : > { %v2280_v49 = vpack.c.bf16 %v2253_v45, %v2252_v44  ;;  %v2235_v12 = vadd.f32 %v4054_v28, %v2213_v46  ;;  %v2197_v22 = vmul.f32 %v3345_v47, %v4017_v34  ;;  %v3387_v47 = vld [vmem:[%s3828_s21 + $0x28] sm:$0xff] }
 0x4b6   : > { %v2220_v55 = vmul.f32 %v4045_v13, %v2198_v2  ;;  %v2256_v40 = vmax.f32 %v2240_v57, 0.0 }
 0x4b7   : > { %3176 = vmatprep.mubr.bf16.mxu1 %v2280_v49  ;;  %v2251_v54 = vmax.f32 %v2235_v12, 0.0  ;;  %v2219_v56 = vmul.f32 %v4045_v13, %v2197_v22  ;;  %v3388_v22 = vld [vmem:[%s3828_s21 + $0x50] sm:$0xff] }
 0x4b8   : > { %v3347_v59 = vpop.eup %3346  ;;  %3177 = vmatmul.mubr.bf16.vlgmr.msra.gmra.mrb[80].mxu1 %v2281_v23  ;;  %v2242_v1 = vadd.f32 %v4054_v28, %v2220_v55  ;;  %v3390_v55 = vld [vmem:[%s3828_s21 + $0x40] sm:$0xff] }
 0x4b9   : > { %v2279_v52 = vpack.c.bf16 %v2251_v54, %v2250_v5  ;;  %v2241_v24 = vadd.f32 %v4054_v28, %v2219_v56  ;;  %v2199_v61 = vmul.f32 %v3347_v59, %v4027_v30  ;;  %v4101_v30 = vld [vmem:[%s4358_s12] ss:$0 sm:$0xff]  ;;  %v3389_v54 = vld [vmem:[%s3828_s21 + $0x58] sm:$0xff] }
 0x4ba   : > { %v2258_v51 = vmax.f32 %v2242_v1, 0.0 }
 0x4bb   : > { %3173 = vmatmul.mubr.bf16.gmra.mrb[84].mxu0 %v2279_v52  ;;  %v2257_v34 = vmax.f32 %v2241_v24, 0.0  ;;  %v2221_v58 = vmul.f32 %v4045_v13, %v2199_v61  ;;  %v3391_v24 = vld [vmem:[%s3828_s21 + $0x48] sm:$0xff] }
 0x4bd   : > { %v2282_v62 = vpack.c.bf16 %v2257_v34, %v2256_v40  ;;  %v2243_v3 = vadd.f32 %v4054_v28, %v2221_v58  ;;  %v3392_v34 = vld [vmem:[%s3828_s21 + $0x60] sm:$0xff] }
 0x4bf   : > { %3180 = vmatprep.mubr.bf16.mxu1 %v2282_v62  ;;  %v2259_v4 = vmax.f32 %v2243_v3, 0.0  ;;  %v3393_v62 = vld [vmem:[%s3828_s21 + $0x68] sm:$0xff] }
 0x4c1   : > { %v2283_v6 = vpack.c.bf16 %v2259_v4, %v2258_v51  ;;  %v3394_v51 = vld [vmem:[%s3828_s21 + $0x70] sm:$0xff] }
 0x4c3   : > { %3181 = vmatmul.mubr.bf16.gmra.mrb[84].mxu1 %v2283_v6  ;;  %v3395_v6 = vld [vmem:[%s3828_s21 + $0x78] sm:$0xff] }
 0x57b   : > { %v3170_v8 = vpop.f32.mrb[80].mxu0 }
 0x57c   : > { %v2382_v13 = vadd.f32 %v3170_v8, %v4101_v30  ;;  %v2373_v9 = vpop.f32.mrb[81].mxu0 }
 0x57d   : > { %v3171_v10 = vpop.f32.mrb[82].mxu0  ;;  %v2374_v28 = vadd.f32 %v4101_v30, %v2373_v9 }
 0x57e   : > { %v2385_v11 = vadd.f32 %v3171_v10, %v4101_v30  ;;  %v2376_v14 = vpop.f32.mrb[83].mxu0  ;;  %v4107_v16 = vadd.f32 %v3380_v15, %v2382_v13 }
 0x57f   : > { %v2377_v17 = vadd.f32 %v4101_v30, %v2376_v14  ;;  %v4116_v37 = vadd.f32 %v3382_v25, %v2374_v28 }
 0x580   : > { %2458 = vadd.xlane.f32.xlu1 %v4107_v16  ;;  %v4112_v20 = vadd.f32 %v3381_v19, %v2385_v11 }
 0x581   : > { %v4120_v38 = vadd.f32 %v3383_v26, %v2377_v17 }
 0x582   : > { %2460 = vadd.xlane.f32.xlu0 %v4112_v20 }
 0x584   : > { %2454 = vadd.xlane.f32.xlu1 %v4116_v37 }
 0x586   : > { %2456 = vadd.xlane.f32.xlu0 %v4120_v38 }
 0x58b   : > { %v3178_v27 = vpop.f32.mrb[80].mxu1 }
 0x58c   : > { %v2405_v60 = vpop.f32.mrb[81].mxu1  ;;  %v2414_v42 = vadd.f32 %v3178_v27, %v4101_v30 }
 0x58d   : > { %v3179_v21 = vpop.f32.mrb[82].mxu1  ;;  %v2406_v49 = vadd.f32 %v4101_v30, %v2405_v60 }
 0x58e   : > { %v3174_v29 = vpop.f32.mrb[84].mxu0  ;;  %v2408_v36 = vpop.f32.mrb[83].mxu1  ;;  %v2417_v46 = vadd.f32 %v3179_v21, %v4101_v30  ;;  %v4147_v23 = vadd.f32 %v3388_v22, %v2414_v42 }
 0x58f   : > { %v2398_v63 = vadd.f32 %v3174_v29, %v4101_v30  ;;  %v2389_v50 = vpop.f32.mrb[85].mxu0  ;;  %v2409_v5 = vadd.f32 %v4101_v30, %v2408_v36  ;;  %v4157_v59 = vadd.f32 %v3390_v55, %v2406_v49 }
 0x590   : > { %v3175_v53 = vpop.f32.mrb[86].mxu0  ;;  %v2390_v32 = vadd.f32 %v4101_v30, %v2389_v50  ;;  %v4152_v56 = vadd.f32 %v3389_v54, %v2417_v46 }
 0x591   : > { %v2401_v33 = vadd.f32 %v3175_v53, %v4101_v30  ;;  %v2392_v35 = vpop.f32.mrb[87].mxu0  ;;  %v4127_v41 = vadd.f32 %v3384_v39, %v2398_v63  ;;  %v4162_v61 = vadd.f32 %v3391_v24, %v2409_v5 }
 0x592   : > { %v2393_v31 = vadd.f32 %v4101_v30, %v2392_v35  ;;  %v4137_v44 = vadd.f32 %v3386_v43, %v2390_v32 }
 0x593   : > { %2466 = vadd.xlane.f32.xlu1 %v4127_v41  ;;  %v4132_v7 = vadd.f32 %v3385_v0, %v2401_v33 }
 0x594   : > { %v4142_v48 = vadd.f32 %v3387_v47, %v2393_v31 }
 0x595   : > { %2468 = vadd.xlane.f32.xlu0 %v4132_v7 }
 0x596   : > { %v3182_v45 = vpop.f32.mrb[84].mxu1 }
 0x597   : > { %2462 = vadd.xlane.f32.xlu1 %v4137_v44  ;;  %v2421_v18 = vpop.f32.mrb[85].mxu1  ;;  %v2430_v40 = vadd.f32 %v3182_v45, %v4101_v30 }
 0x598   : > { %v3183_v2 = vpop.f32.mrb[86].mxu1  ;;  %v2422_v57 = vadd.f32 %v4101_v30, %v2421_v18 }
 0x599   : > { %2464 = vadd.xlane.f32.xlu0 %v4142_v48  ;;  %v2424_v12 = vpop.f32.mrb[87].mxu1  ;;  %v2433_v1 = vadd.f32 %v3183_v2, %v4101_v30  ;;  %v4176_v4 = vadd.f32 %v3394_v51, %v2430_v40 }
 0x59a   : > { %v2425_v52 = vadd.f32 %v4101_v30, %v2424_v12  ;;  %v4167_v58 = vadd.f32 %v3392_v34, %v2422_v57 }
 0x59b   : > { %2474 = vadd.xlane.f32.xlu1 %v4147_v23  ;;  %v4180_v8 = vadd.f32 %v3395_v6, %v2433_v1 }
 0x59c   : > { %v4172_v3 = vadd.f32 %v3393_v62, %v2425_v52 }
 0x59d   : > { %2476 = vadd.xlane.f32.xlu0 %v4152_v56 }
 0x59f   : > { %2470 = vadd.xlane.f32.xlu1 %v4157_v59 }
 0x5a1   : > { %2472 = vadd.xlane.f32.xlu0 %v4162_v61 }
 0x5a3   : > { %2478 = vadd.xlane.f32.xlu1 %v4167_v58 }
 0x5a5   : > { %2480 = vadd.xlane.f32.xlu0 %v4172_v3 }
 0x5a7   : > { %2482 = vadd.xlane.f32.xlu1 %v4176_v4 }
 0x5a9   : > { %2484 = vadd.xlane.f32.xlu0 %v4180_v8 }
 0x60d   : > { %v2459_v13 = vpop.xlane.xlu1 %2458 }
 0x60e   : > { %v2488_v9 = vmul.f32 0.0078125, %v2459_v13 }
 0x60f   : > { %v2461_v30 = vpop.xlane.xlu0 %2460 }
 0x610   : > { %v4184_v10 = vsub.f32 %v4107_v16, %v2488_v9  ;;  %v2489_v28 = vmul.f32 0.0078125, %v2461_v30 }
 0x611   : > { %v2455_v11 = vpop.xlane.xlu1 %2454 }
 0x612   : > { %v4187_v14 = vsub.f32 %v4112_v20, %v2489_v28  ;;  %v2486_v15 = vmul.f32 0.0078125, %v2455_v11  ;;  %v2520_v17 = vmul.f32 %v4184_v10, %v4184_v10 }
 0x613   : > { %v2457_v19 = vpop.xlane.xlu0 %2456 }
 0x614   : > { %v4192_v25 = vsub.f32 %v4116_v37, %v2486_v15  ;;  %v2487_v26 = vmul.f32 0.0078125, %v2457_v19  ;;  %2538 = vadd.xlane.f32.xlu1 %v2520_v17  ;;  %v2521_v27 = vmul.f32 %v4187_v14, %v4187_v14 }
 0x616   : > { %v4197_v16 = vsub.f32 %v4120_v38, %v2487_v26  ;;  %2540 = vadd.xlane.f32.xlu0 %v2521_v27  ;;  %v2518_v20 = vmul.f32 %v4192_v25, %v4192_v25 }
 0x618   : > { %2534 = vadd.xlane.f32.xlu1 %v2518_v20  ;;  %v2519_v60 = vmul.f32 %v4197_v16, %v4197_v16 }
 0x61a   : > { %2536 = vadd.xlane.f32.xlu0 %v2519_v60 }
 0x620   : > { %v2467_v21 = vpop.xlane.xlu1 %2466 }
 0x621   : > { %v2492_v37 = vmul.f32 0.0078125, %v2467_v21 }
 0x622   : > { %v2469_v29 = vpop.xlane.xlu0 %2468 }
 0x623   : > { %v4204_v36 = vsub.f32 %v4127_v41, %v2492_v37  ;;  %v2493_v63 = vmul.f32 0.0078125, %v2469_v29  ;;  %v4266_v37 = vld [vmem:[%s4359_s13] ss:$0 sm:$0xff] }
 0x624   : > { %v2463_v50 = vpop.xlane.xlu1 %2462 }
 0x625   : > { %v4207_v38 = vsub.f32 %v4132_v7, %v2493_v63  ;;  %v2490_v53 = vmul.f32 0.0078125, %v2463_v50  ;;  %v2524_v32 = vmul.f32 %v4204_v36, %v4204_v36  ;;  %v4272_v50 = vld [vmem:[%s4360_s14] ss:$0 sm:$0xff] }
 0x626   : > { %v2465_v33 = vpop.xlane.xlu0 %2464 }
 0x627   : > { %v4212_v35 = vsub.f32 %v4137_v44, %v2490_v53  ;;  %v2491_v39 = vmul.f32 0.0078125, %v2465_v33  ;;  %2546 = vadd.xlane.f32.xlu1 %v2524_v32  ;;  %v2525_v31 = vmul.f32 %v4207_v38, %v4207_v38 }
 0x628   : > { %v2475_v41 = vpop.xlane.xlu1 %2474 }
 0x629   : > { %v4217_v0 = vsub.f32 %v4142_v48, %v2491_v39  ;;  %v2496_v42 = vmul.f32 0.0078125, %v2475_v41  ;;  %2548 = vadd.xlane.f32.xlu0 %v2525_v31  ;;  %v2522_v7 = vmul.f32 %v4212_v35, %v4212_v35 }
 0x62a   : > { %v2477_v43 = vpop.xlane.xlu0 %2476 }
 0x62b   : > { %v4222_v45 = vsub.f32 %v4147_v23, %v2496_v42  ;;  %v2497_v44 = vmul.f32 0.0078125, %v2477_v43  ;;  %2542 = vadd.xlane.f32.xlu1 %v2522_v7  ;;  %v2523_v46 = vmul.f32 %v4217_v0, %v4217_v0 }
 0x62c   : > { %v2471_v18 = vpop.xlane.xlu1 %2470 }
 0x62d   : > { %v4227_v47 = vsub.f32 %v4152_v56, %v2497_v44  ;;  %v2494_v48 = vmul.f32 0.0078125, %v2471_v18  ;;  %2544 = vadd.xlane.f32.xlu0 %v2523_v46  ;;  %v2528_v2 = vmul.f32 %v4222_v45, %v4222_v45 }
 0x62e   : > { %v2473_v49 = vpop.xlane.xlu0 %2472 }
 0x62f   : > { %v4232_v12 = vsub.f32 %v4157_v59, %v2494_v48  ;;  %v2495_v22 = vmul.f32 0.0078125, %v2473_v49  ;;  %2554 = vadd.xlane.f32.xlu1 %v2528_v2  ;;  %v2529_v23 = vmul.f32 %v4227_v47, %v4227_v47 }
 0x630   : > { %v2479_v5 = vpop.xlane.xlu1 %2478 }
 0x631   : > { %v4237_v54 = vsub.f32 %v4162_v61, %v2495_v22  ;;  %v2498_v56 = vmul.f32 0.0078125, %v2479_v5  ;;  %2556 = vadd.xlane.f32.xlu0 %v2529_v23  ;;  %v2526_v57 = vmul.f32 %v4232_v12, %v4232_v12 }
 0x632   : > { %v2481_v55 = vpop.xlane.xlu0 %2480 }
 0x633   : > { %v4242_v52 = vsub.f32 %v4167_v58, %v2498_v56  ;;  %v2499_v59 = vmul.f32 0.0078125, %v2481_v55  ;;  %2550 = vadd.xlane.f32.xlu1 %v2526_v57  ;;  %v2527_v24 = vmul.f32 %v4237_v54, %v4237_v54 }
 0x634   : > { %v2483_v40 = vpop.xlane.xlu1 %2482 }
 0x635   : > { %v4247_v34 = vsub.f32 %v4172_v3, %v2499_v59  ;;  %v2500_v61 = vmul.f32 0.0078125, %v2483_v40  ;;  %2552 = vadd.xlane.f32.xlu0 %v2527_v24  ;;  %v2530_v1 = vmul.f32 %v4242_v52, %v4242_v52 }
 0x636   : > { %v2485_v62 = vpop.xlane.xlu0 %2484 }
 0x637   : > { %v4252_v51 = vsub.f32 %v4176_v4, %v2500_v61  ;;  %v2501_v58 = vmul.f32 0.0078125, %v2485_v62  ;;  %2558 = vadd.xlane.f32.xlu1 %v2530_v1  ;;  %v2531_v6 = vmul.f32 %v4247_v34, %v4247_v34 }
 0x639   : > { %v4257_v13 = vsub.f32 %v4180_v8, %v2501_v58  ;;  %2560 = vadd.xlane.f32.xlu0 %v2531_v6  ;;  %v2532_v3 = vmul.f32 %v4252_v51, %v4252_v51 }
 0x63b   : > { %2562 = vadd.xlane.f32.xlu1 %v2532_v3  ;;  %v2533_v9 = vmul.f32 %v4257_v13, %v4257_v13 }
 0x63d   : > { %2564 = vadd.xlane.f32.xlu0 %v2533_v9 }
 0x6a1   : > { %v2539_v30 = vpop.xlane.xlu1 %2538 }
 0x6a2   : > { %v2568_v4 = vmul.f32 0.0078125, %v2539_v30 }
 0x6a3   : > { %v2541_v28 = vpop.xlane.xlu0 %2540 }
 0x6a4   : > { %v2584_v11 = vadd.f32 1e-05, %v2568_v4  ;;  %v2569_v15 = vmul.f32 0.0078125, %v2541_v28 }
 0x6a5   : > { %v2535_v17 = vpop.xlane.xlu1 %2534 }
 0x6a6   : > { %3348 = vrsqrt.f32 %v2584_v11  ;;  %v2585_v19 = vadd.f32 1e-05, %v2569_v15  ;;  %v2566_v26 = vmul.f32 0.0078125, %v2535_v17 }
 0x6a7   : > { %v2537_v8 = vpop.xlane.xlu0 %2536 }
 0x6a8   : > { %3350 = vrsqrt.f32 %v2585_v19  ;;  %v2582_v27 = vadd.f32 1e-05, %v2566_v26  ;;  %v2567_v20 = vmul.f32 0.0078125, %v2537_v8 }
 0x6aa   : > { %3352 = vrsqrt.f32 %v2582_v27  ;;  %v2583_v60 = vadd.f32 1e-05, %v2567_v20 }
 0x6ac   : > { %3354 = vrsqrt.f32 %v2583_v60 }
 0x6b0   : > { %v3349_v21 = vpop.eup %3348 }
 0x6b1   : > { %v2616_v29 = vmul.f32 %v3349_v21, %v4184_v10 }
 0x6b2   : > { %v3351_v63 = vpop.eup %3350 }
 0x6b3   : > { %v2638_v53 = vmul.f32 %v4266_v37, %v2616_v29  ;;  %v2617_v32 = vmul.f32 %v3351_v63, %v4187_v14 }
 0x6b4   : > { %v3353_v33 = vpop.eup %3352  ;;  %v2547_v39 = vpop.xlane.xlu1 %2546 }
 0x6b5   : > { %v2660_v10 = vadd.f32 %v4272_v50, %v2638_v53  ;;  %v2639_v31 = vmul.f32 %v4266_v37, %v2617_v32  ;;  %v2614_v41 = vmul.f32 %v3353_v33, %v4192_v25  ;;  %v2572_v42 = vmul.f32 0.0078125, %v2547_v39 }
 0x6b6   : > { %v3355_v7 = vpop.eup %3354  ;;  %v2549_v43 = vpop.xlane.xlu0 %2548 }
 0x6b7   : > { %2676 = vst [vmem:[%s4280_s25 + $0x10] sm:$0xff] %v2660_v10  ;;  %v2661_v14 = vadd.f32 %v4272_v50, %v2639_v31  ;;  %v2636_v44 = vmul.f32 %v4266_v37, %v2614_v41  ;;  %v2615_v46 = vmul.f32 %v3355_v7, %v4197_v16  ;;  %v2588_v18 = vadd.f32 1e-05, %v2572_v42 }
 0x6b8   : > { %v2573_v48 = vmul.f32 0.0078125, %v2549_v43  ;;  %v2543_v2 = vpop.xlane.xlu1 %2542 }
 0x6b9   : > { %2677 = vst [vmem:[%s4280_s25 + $0x18] sm:$0xff] %v2661_v14  ;;  %v2658_v49 = vadd.f32 %v4272_v50, %v2636_v44  ;;  %v2637_v25 = vmul.f32 %v4266_v37, %v2615_v46  ;;  %3356 = vrsqrt.f32 %v2588_v18  ;;  %v2570_v22 = vmul.f32 0.0078125, %v2543_v2 }
 0x6ba   : > { %v2589_v23 = vadd.f32 1e-05, %v2573_v48  ;;  %v2545_v5 = vpop.xlane.xlu0 %2544 }
 0x6bb   : > { %2674 = vst [vmem:[%s4280_s25] sm:$0xff] %v2658_v49  ;;  %v2659_v56 = vadd.f32 %v4272_v50, %v2637_v25  ;;  %v2586_v57 = vadd.f32 1e-05, %v2570_v22  ;;  %v2571_v55 = vmul.f32 0.0078125, %v2545_v5 }
 0x6bc   : > { %3358 = vrsqrt.f32 %v2589_v23  ;;  %v2555_v16 = vpop.xlane.xlu1 %2554 }
 0x6bd   : > { %2675 = vst [vmem:[%s4280_s25 + $0x8] sm:$0xff] %v2659_v56  ;;  %3360 = vrsqrt.f32 %v2586_v57  ;;  %v2587_v59 = vadd.f32 1e-05, %v2571_v55  ;;  %v2576_v24 = vmul.f32 0.0078125, %v2555_v16 }
 0x6be   : > { %v2557_v40 = vpop.xlane.xlu0 %2556 }
 0x6bf   : > { %3362 = vrsqrt.f32 %v2587_v59  ;;  %v2592_v61 = vadd.f32 1e-05, %v2576_v24  ;;  %v2577_v1 = vmul.f32 0.0078125, %v2557_v40 }
 0x6c0   : > { %v2551_v62 = vpop.xlane.xlu1 %2550 }
 0x6c1   : > { %3364 = vrsqrt.f32 %v2592_v61  ;;  %v2593_v58 = vadd.f32 1e-05, %v2577_v1  ;;  %v2574_v6 = vmul.f32 0.0078125, %v2551_v62 }
 0x6c2   : > { %v2553_v3 = vpop.xlane.xlu0 %2552 }
 0x6c3   : > { %v3357_v9 = vpop.eup %3356  ;;  %3366 = vrsqrt.f32 %v2593_v58  ;;  %v2590_v30 = vadd.f32 1e-05, %v2574_v6  ;;  %v2575_v4 = vmul.f32 0.0078125, %v2553_v3 }
 0x6c4   : > { %v2620_v28 = vmul.f32 %v3357_v9, %v4204_v36  ;;  %v2559_v11 = vpop.xlane.xlu1 %2558 }
 0x6c5   : > { %3368 = vrsqrt.f32 %v2590_v30  ;;  %v2591_v15 = vadd.f32 1e-05, %v2575_v4  ;;  %v2578_v17 = vmul.f32 0.0078125, %v2559_v11 }
 0x6c6   : > { %v3359_v19 = vpop.eup %3358  ;;  %v2642_v26 = vmul.f32 %v4266_v37, %v2620_v28  ;;  %v2561_v8 = vpop.xlane.xlu0 %2560 }
 0x6c7   : > { %v3361_v27 = vpop.eup %3360  ;;  %v2621_v20 = vmul.f32 %v3359_v19, %v4207_v38  ;;  %3370 = vrsqrt.f32 %v2591_v15  ;;  %v2594_v60 = vadd.f32 1e-05, %v2578_v17  ;;  %v2579_v21 = vmul.f32 0.0078125, %v2561_v8 }
 0x6c8   : > { %v2664_v29 = vadd.f32 %v4272_v50, %v2642_v26  ;;  %v2618_v63 = vmul.f32 %v3361_v27, %v4212_v35  ;;  %v2563_v36 = vpop.xlane.xlu1 %2562 }
 0x6c9   : > { %v3363_v53 = vpop.eup %3362  ;;  %v2643_v32 = vmul.f32 %v4266_v37, %v2621_v20  ;;  %3372 = vrsqrt.f32 %v2594_v60  ;;  %v2595_v33 = vadd.f32 1e-05, %v2579_v21  ;;  %v2580_v39 = vmul.f32 0.0078125, %v2563_v36 }
 0x6ca   : > { %2680 = vst [vmem:[%s4280_s25 + $0x30] sm:$0xff] %v2664_v29  ;;  %v2640_v10 = vmul.f32 %v4266_v37, %v2618_v63  ;;  %v2619_v38 = vmul.f32 %v3363_v53, %v4217_v0  ;;  %v2565_v31 = vpop.xlane.xlu0 %2564 }
 0x6cb   : > { %v3365_v41 = vpop.eup %3364  ;;  %v2665_v42 = vadd.f32 %v4272_v50, %v2643_v32  ;;  %3374 = vrsqrt.f32 %v2595_v33  ;;  %v2596_v35 = vadd.f32 1e-05, %v2580_v39  ;;  %v2581_v7 = vmul.f32 0.0078125, %v2565_v31 }
 0x6cc   : > { %v2662_v43 = vadd.f32 %v4272_v50, %v2640_v10  ;;  %v2641_v14 = vmul.f32 %v4266_v37, %v2619_v38  ;;  %v2624_v44 = vmul.f32 %v3365_v41, %v4222_v45 }
 0x6cd   : > { %v3367_v46 = vpop.eup %3366  ;;  %2681 = vst [vmem:[%s4280_s25 + $0x38] sm:$0xff] %v2665_v42  ;;  %3376 = vrsqrt.f32 %v2596_v35  ;;  %v2597_v18 = vadd.f32 1e-05, %v2581_v7 }
 0x6ce   : > { %2678 = vst [vmem:[%s4280_s25 + $0x20] sm:$0xff] %v2662_v43  ;;  %v2663_v0 = vadd.f32 %v4272_v50, %v2641_v14  ;;  %v2646_v48 = vmul.f32 %v4266_v37, %v2624_v44  ;;  %v2625_v2 = vmul.f32 %v3367_v46, %v4227_v47 }
 0x6cf   : > { %v3369_v49 = vpop.eup %3368  ;;  %3378 = vrsqrt.f32 %v2597_v18 }
 0x6d0   : > { %2679 = vst [vmem:[%s4280_s25 + $0x28] sm:$0xff] %v2663_v0  ;;  %v2668_v25 = vadd.f32 %v4272_v50, %v2646_v48  ;;  %v2647_v45 = vmul.f32 %v4266_v37, %v2625_v2  ;;  %v2622_v22 = vmul.f32 %v3369_v49, %v4232_v12 }
 0x6d1   : > { %v3371_v23 = vpop.eup %3370 }
 0x6d2   : > { %2684 = vst [vmem:[%s4280_s25 + $0x50] sm:$0xff] %v2668_v25  ;;  %v2669_v5 = vadd.f32 %v4272_v50, %v2647_v45  ;;  %v2644_v56 = vmul.f32 %v4266_v37, %v2622_v22  ;;  %v2623_v57 = vmul.f32 %v3371_v23, %v4237_v54 }
 0x6d3   : > { %v3373_v47 = vpop.eup %3372 }
 0x6d4   : > { %2685 = vst [vmem:[%s4280_s25 + $0x58] sm:$0xff] %v2669_v5  ;;  %v2666_v55 = vadd.f32 %v4272_v50, %v2644_v56  ;;  %v2645_v16 = vmul.f32 %v4266_v37, %v2623_v57  ;;  %v2626_v59 = vmul.f32 %v3373_v47, %v4242_v52 }
 0x6d5   : > { %v3375_v12 = vpop.eup %3374 }
 0x6d6   : > { %2682 = vst [vmem:[%s4280_s25 + $0x40] sm:$0xff] %v2666_v55  ;;  %v2667_v24 = vadd.f32 %v4272_v50, %v2645_v16  ;;  %v2648_v40 = vmul.f32 %v4266_v37, %v2626_v59  ;;  %v2627_v61 = vmul.f32 %v3375_v12, %v4247_v34 }
 0x6d7   : > { %v3377_v54 = vpop.eup %3376 }
 0x6d8   : > { %2683 = vst [vmem:[%s4280_s25 + $0x48] sm:$0xff] %v2667_v24  ;;  %v2670_v1 = vadd.f32 %v4272_v50, %v2648_v40  ;;  %v2649_v62 = vmul.f32 %v4266_v37, %v2627_v61  ;;  %v2628_v58 = vmul.f32 %v3377_v54, %v4252_v51 }
 0x6d9   : > { %v3379_v52 = vpop.eup %3378 }
 0x6da   : > { %2686 = vst [vmem:[%s4280_s25 + $0x60] sm:$0xff] %v2670_v1  ;;  %v2671_v6 = vadd.f32 %v4272_v50, %v2649_v62  ;;  %v2650_v3 = vmul.f32 %v4266_v37, %v2628_v58  ;;  %v2629_v9 = vmul.f32 %v3379_v52, %v4257_v13 }
 0x6dc   : > { %2687 = vst [vmem:[%s4280_s25 + $0x68] sm:$0xff] %v2671_v6  ;;  %v2672_v34 = vadd.f32 %v4272_v50, %v2650_v3  ;;  %v2651_v30 = vmul.f32 %v4266_v37, %v2629_v9 }
 0x6de   : > { %2688 = vst [vmem:[%s4280_s25 + $0x70] sm:$0xff] %v2672_v34  ;;  %v2673_v4 = vadd.f32 %v4272_v50, %v2651_v30 }
 0x6e0   : > { %2689 = vst [vmem:[%s4280_s25 + $0x78] sm:$0xff] %v2673_v4 }
 0x6e1 PF: > { %s25_s18 = sadd.s32 1, %s3402_s18  }
 0x6e2   : > { %p22_p4 = scmp.ge.s32.totalorder %s25_s18, 4  }
 0x6e4   :  { %24 = sbr.rel (!%p22_p4) target bundleno = 1 (0x1), region = 116 }

</bundles_post_ra>
